<compile_context>
chip_gen: v5e
topology: v5e:2x2
jax: 0.10.0
libtpu: 0.0.40
codegen_flags: <defaults>
</compile_context>

<pallas_src>
import numpy as np
import jax
import jax.numpy as jnp
from jax import lax
from jax.experimental import pallas as pl
from jax.experimental.pallas import tpu as pltpu

_K = 10                                # temporal width of every Conv2d(.., (1,10))
_HP = jax.lax.Precision.HIGHEST        # used only in the pure-JAX reference
_PAD = {25: 32, 50: 64, 100: 128, 200: 200}


# ------------------------------- the kernel ------------------------------

def _stage(h, w_ref, sc_ref, sh_ref, sel_ref, bt, ts):
    """conv(1,10) as im2col matmul -> folded BN -> ELU -> maxpool(1,2) per sample.

    h: (in_ch_pad, bt*ts) with bt samples packed along the lane axis (equal-width
    segments).  im2col columns that would mix samples are dropped by the per-sample
    slices before the selection matmul, so they never reach the output.
    """
    wcf = bt * ts - _K + 1            # packed conv width (incl. cross-sample cols)
    wc = ts - _K + 1                  # per-sample valid conv width
    n = wc // 2                       # per-sample pooled width

    # im2col: K lane-shifted copies stacked along the (sublane-aligned) channel axis.
    rhs = jnp.concatenate([h[:, k:k + wcf] for k in range(_K)], axis=0)
    z = jnp.dot(w_ref[...], rhs, preferred_element_type=jnp.float32)
    z = z * sc_ref[...] + sh_ref[...]                              # folded BN (eval)
    z = jnp.where(z > 0, z, jnp.exp(jnp.minimum(z, 0.0)) - 1.0)    # ELU(alpha=1)

    # adjacent max along time, then per-sample stride-2 selection with a TINY
    # (wc-1, n) 0/1 matrix (block-diagonal structure exploited -> no O(N^2) matmul).
    m = jnp.maximum(z[:, :wcf - 1], z[:, 1:wcf])
    sel = sel_ref[...]
    segs = [jnp.dot(m[:, b * ts:b * ts + wc - 1], sel,
                    preferred_element_type=jnp.float32)
            for b in range(bt)]
    return segs[0] if bt == 1 else jnp.concatenate(segs, axis=1)


def _make_kernel(bt, t):
    def kernel(x_ref,
               w1_ref, sc1_ref, sh1_ref, sel1_ref,
               w3_ref, sc2_ref, sh2_ref, sel2_ref,
               w4_ref, sc3_ref, sh3_ref, sel3_ref,
               w5_ref, sc4_ref, sh4_ref, sel4_ref,
               out_ref):
        h = x_ref[0]                                   # (C_pad, bt*T)
        ts = t
        for w_ref, sc_ref, sh_ref, sel_ref in (
                (w1_ref, sc1_ref, sh1_ref, sel1_ref),  # fused conv1+conv2 block
                (w3_ref, sc2_ref, sh2_ref, sel2_ref),
                (w4_ref, sc3_ref, sh3_ref, sel3_ref),
                (w5_ref, sc4_ref, sh4_ref, sel4_ref)):
            h = _stage(h, w_ref, sc_ref, sh_ref, sel_ref, bt, ts)
            ts = (ts - (_K - 1)) // 2
        out_ref[0] = h                                 # (200, bt*t_out)
    return kernel


# ------------------------------- wrapper ---------------------------------

def _full_spec(arr):
    nd = arr.ndim
    return pl.BlockSpec(arr.shape, lambda i, _nd=nd: (0,) * _nd)


def _out_time(t):
    for _ in range(4):
        t = (t - (_K - 1)) // 2
    return t


def _pool_sels(t):
    """Per-sample 0/1 selection matrices (one per stage): pick column 2*i of the
    adjacent-max output -> MaxPool2d((1,2),(1,2)).  Shapes are O(T), not O((B*T)^2)."""
    sels = []
    ts = t
    for _ in range(4):
        wc = ts - (_K - 1)
        n = wc // 2
        sel = np.zeros((wc - 1, n), np.float32)
        for i in range(n):
            sel[2 * i, i] = 1.0
        sels.append(jnp.asarray(sel))
        ts = n
    return sels


def _default_bt(b, t):
    # Prefer >= 2 grid steps (software pipelining + v7x megacore sharding of the
    # "parallel" axis) while keeping the packed lane width (and hence the per-step
    # VMEM working set) modest for v7x's 64 MiB VMEM.
    cands = [d for d in range(1, b + 1)
             if b % d == 0 and b // d >= 2 and d * t <= 4096]
    return max(cands) if cands else 1


def deepconvnet_forward(x, kp, block_batch=None):
    b, c, t = x.shape
    bt = _default_bt(b, t) if block_batch is None else block_batch
    assert b % bt == 0
    g = b // bt
    c_p = kp["w1"].shape[1] // _K                  # padded input-channel count
    t_out = _out_time(t)
    assert t_out >= 1, "freq_time too small for 4x conv(10)+pool(2)"
    n4 = kp["w5"].shape[0]                         # 200

    # (B, C, T) -> (G, C_pad, bt*T): bt samples per block, packed along lanes.
    xg = x.reshape(g, bt, c, t).transpose(0, 2, 1, 3).reshape(g, c, bt * t)
    if c_p > c:
        xg = jnp.pad(xg, ((0, 0), (0, c_p - c), (0, 0)))

    sels = _pool_sels(t)

    args = (xg,
            kp["w1"], kp["sc1"], kp["sh1"], sels[0],
            kp["w3"], kp["sc2"], kp["sh2"], sels[1],
            kp["w4"], kp["sc3"], kp["sh3"], sels[2],
            kp["w5"], kp["sc4"], kp["sh4"], sels[3])

    # 3-D blocks with full last dim -> (8,128) rule satisfied for any bt.
    in_specs = [pl.BlockSpec((1, c_p, bt * t), lambda i: (i, 0, 0))]
    in_specs += [_full_spec(a) for a in args[1:]]

    out = pl.pallas_call(
        _make_kernel(bt, t),
        grid=(g,),
        in_specs=in_specs,
        out_specs=pl.BlockSpec((1, n4, bt * t_out), lambda i: (i, 0, 0)),
        out_shape=jax.ShapeDtypeStruct((g, n4, bt * t_out), jnp.float32),
        compiler_params=pltpu.CompilerParams(
            dimension_semantics=("parallel",),
            vmem_limit_bytes=32 * 1024 * 1024),
    )(*args)

    # back to PyTorch NCHW convnet output: (B, 200, 1, t_out)
    out = out.reshape(g, n4, bt, t_out).transpose(0, 2, 1, 3).reshape(b, n4, t_out)
    return out[:, :, None, :]


# --------------------- deterministic parameter setup ---------------------

def init_params(key, c_in):
    ks = jax.random.split(key, 10)
    w1 = 0.20 * jax.random.normal(ks[0], (25, 1, 1, _K), jnp.float32)
    b1 = 0.10 * jax.random.normal(ks[1], (25,), jnp.float32)
    w2 = 0.10 * jax.random.normal(ks[2], (25, 25, c_in, 1), jnp.float32)
    w3 = 0.06 * jax.random.normal(ks[3], (50, 25, 1, _K), jnp.float32)
    w4 = 0.04 * jax.random.normal(ks[4], (100, 50, 1, _K), jnp.float32)
    w5 = 0.03 * jax.random.normal(ks[5], (200, 100, 1, _K), jnp.float32)

    def bn(k, ch):
        a, b_, c_, d = jax.random.split(k, 4)
        gamma = 1.0 + 0.1 * jax.random.normal(a, (ch,), jnp.float32)
        beta = 0.1 * jax.random.normal(b_, (ch,), jnp.float32)
        mean = 0.1 * jax.random.normal(c_, (ch,), jnp.float32)
        var = 0.9 + 0.2 * jax.random.uniform(d, (ch,), jnp.float32)
        return gamma, beta, mean, var

    bns = [bn(ks[6 + i], ch) for i, ch in enumerate((25, 50, 100, 200))]
    return dict(w1=w1, b1=b1, w2=w2, w3=w3, w4=w4, w5=w5, bns=bns)


def pack_kernel_params(p):
    """Fold BN, fuse conv1+bias+conv2, im2col-reshape conv weights, pad channels."""
    eps = 1e-5

    def fold(bn):
        gamma, beta, mean, var = bn
        scale = gamma / jnp.sqrt(var + eps)
        shift = beta - mean * scale
        return scale, shift

    def pad_col(v, out_real, out_p):
        return jnp.zeros((out_p, 1), jnp.float32).at[:out_real, 0].set(v)

    # ---- stage 1: fuse Conv2d(1,25,(1,10)) (+bias) with Conv2d(25,25,(C,1)) --------
    w1 = p["w1"][:, 0, 0, :]                 # (25, K)
    b1 = p["b1"]                             # (25,)
    w2 = p["w2"][:, :, :, 0]                 # (out=25, mid=25, C)
    c_in = w2.shape[2]
    c_p = -(-c_in // 8) * 8                  # pad input channels to sublane multiple
    w_eff = jnp.einsum("ojc,jk->okc", w2, w1)          # (25, K, C)
    b_eff = jnp.einsum("ojc,j->o", w2, b1)             # (25,)
    sc1, sh1 = fold(p["bns"][0])
    sh1 = sh1 + b_eff * sc1                  # fold the fused bias into the BN shift
    out_p1 = _PAD[25]
    w_eff_c = jnp.zeros((25, _K, c_p), jnp.float32).at[:, :, :c_in].set(w_eff)
    w1m = jnp.zeros((out_p1, _K * c_p), jnp.float32).at[:25].set(
        w_eff_c.reshape(25, _K * c_p))                 # row order: k*c_p + c

    # ---- stages 2..4: im2col-reshaped, channel-padded conv weights -----------------
    def pack_conv(w, bn, in_real, out_real):
        in_p, out_p = _PAD[in_real], _PAD[out_real]
        wk = w[:, :, 0, :]                   # (out, in, K)
        wpad = jnp.zeros((out_p, in_p, _K), jnp.float32).at[:out_real, :in_real].set(wk)
        wmat = jnp.transpose(wpad, (0, 2, 1)).reshape(out_p, _K * in_p)
        sc, sh = fold(bn)
        return wmat, pad_col(sc, out_real, out_p), pad_col(sh, out_real, out_p)

    w3m, sc2p, sh2p = pack_conv(p["w3"], p["bns"][1], 25, 50)
    w4m, sc3p, sh3p = pack_conv(p["w4"], p["bns"][2], 50, 100)
    w5m, sc4p, sh4p = pack_conv(p["w5"], p["bns"][3], 100, 200)

    return dict(
        w1=w1m, sc1=pad_col(sc1, 25, out_p1), sh1=pad_col(sh1, 25, out_p1),
        w3=w3m, sc2=sc2p, sh2=sh2p,
        w4=w4m, sc3=sc3p, sh3=sh3p,
        w5=w5m, sc4=sc4p, sh4=sh4p)


# --------------------------- pure-JAX reference ---------------------------

def reference_forward(x, p):
    dn = ("NCHW", "OIHW", "NCHW")
    eps = 1e-5

    def conv(h, w):
        return lax.conv_general_dilated(h, w, (1, 1), "VALID",
                                        dimension_numbers=dn, precision=_HP)

    def bn(h, params):
        gamma, beta, mean, var = params
        s = gamma / jnp.sqrt(var + eps)
        t = beta - mean * s
        return h * s.reshape(1, -1, 1, 1) + t.reshape(1, -1, 1, 1)

    def elu(h):
        return jnp.where(h > 0, h, jnp.exp(jnp.minimum(h, 0.0)) - 1.0)

    def pool(h):
        return lax.reduce_window(h, -jnp.inf, lax.max,
                                 (1, 1, 1, 2), (1, 1, 1, 2), "VALID")

    h = x[:, None, :, :]                                 # unsqueeze(1): (B,1,C,T)
    h = conv(h, p["w1"]) + p["b1"].reshape(1, -1, 1, 1)
    h = conv(h, p["w2"])
    h = pool(elu(bn(h, p["bns"][0])))
    h = pool(elu(bn(conv(h, p["w3"]), p["bns"][1])))
    h = pool(elu(bn(conv(h, p["w4"]), p["bns"][2])))
    h = pool(elu(bn(conv(h, p["w5"]), p["bns"][3])))
    return h


# --------------------------------- main -----------------------------------

if __name__ == "__main__":
    # mod == 0 path: x is (batch, n_channels, freq_time); freq_time must be >= 151
    # for the four conv(kernel 10)+pool(2) stages, so use a small but valid T=200.
    B, C, T = 2, 4, 200
    key = jax.random.PRNGKey(0)
    kx, kparams_key = jax.random.split(key)
    x = jax.random.normal(kx, (B, C, T), jnp.float32)

    params = init_params(kparams_key, C)
    kparams = pack_kernel_params(params)

    out = jax.block_until_ready(deepconvnet_forward(x, kparams))
    ref = jax.block_until_ready(reference_forward(x, params))

    assert out.shape == ref.shape, (out.shape, ref.shape)
    err = float(jnp.max(jnp.abs(out - ref)))
    assert err < 2e-3, f"max abs error {err}"
    print("KERNEL_OK")
</pallas_src>

<mosaic_0001>
module attributes {stable_mosaic.version = 11 : i64} {
  func.func @kernel(%arg0: i32, %arg1: memref<1x8x200xf32, #tpu.memory_space<vmem>>, %arg2: memref<32x80xf32, #tpu.memory_space<vmem>>, %arg3: memref<32x1xf32, #tpu.memory_space<vmem>>, %arg4: memref<32x1xf32, #tpu.memory_space<vmem>>, %arg5: memref<190x95xf32, #tpu.memory_space<vmem>>, %arg6: memref<64x320xf32, #tpu.memory_space<vmem>>, %arg7: memref<64x1xf32, #tpu.memory_space<vmem>>, %arg8: memref<64x1xf32, #tpu.memory_space<vmem>>, %arg9: memref<85x43xf32, #tpu.memory_space<vmem>>, %arg10: memref<128x640xf32, #tpu.memory_space<vmem>>, %arg11: memref<128x1xf32, #tpu.memory_space<vmem>>, %arg12: memref<128x1xf32, #tpu.memory_space<vmem>>, %arg13: memref<33x17xf32, #tpu.memory_space<vmem>>, %arg14: memref<200x1280xf32, #tpu.memory_space<vmem>>, %arg15: memref<200x1xf32, #tpu.memory_space<vmem>>, %arg16: memref<200x1xf32, #tpu.memory_space<vmem>>, %arg17: memref<7x4xf32, #tpu.memory_space<vmem>>, %arg18: memref<1x200x4xf32, #tpu.memory_space<vmem>>) attributes {dimension_semantics = [#tpu.dimension_semantics<parallel>], iteration_bounds = array<i64: 2>, scalar_prefetch = 0 : i64, scratch_operands = 0 : i64, tpu.core_type = #tpu.core_type<tc>, window_params = [{transform_indices = @transform_0, window_bounds = array<i64: 1, 8, 200>}, {pipeline_mode = #tpu.pipeline_mode<synchronous>, transform_indices = @transform_1, window_bounds = array<i64: 32, 80>}, {pipeline_mode = #tpu.pipeline_mode<synchronous>, transform_indices = @transform_2, window_bounds = array<i64: 32, 1>}, {pipeline_mode = #tpu.pipeline_mode<synchronous>, transform_indices = @transform_3, window_bounds = array<i64: 32, 1>}, {pipeline_mode = #tpu.pipeline_mode<synchronous>, transform_indices = @transform_4, window_bounds = array<i64: 190, 95>}, {pipeline_mode = #tpu.pipeline_mode<synchronous>, transform_indices = @transform_5, window_bounds = array<i64: 64, 320>}, {pipeline_mode = #tpu.pipeline_mode<synchronous>, transform_indices = @transform_6, window_bounds = array<i64: 64, 1>}, {pipeline_mode = #tpu.pipeline_mode<synchronous>, transform_indices = @transform_7, window_bounds = array<i64: 64, 1>}, {pipeline_mode = #tpu.pipeline_mode<synchronous>, transform_indices = @transform_8, window_bounds = array<i64: 85, 43>}, {pipeline_mode = #tpu.pipeline_mode<synchronous>, transform_indices = @transform_9, window_bounds = array<i64: 128, 640>}, {pipeline_mode = #tpu.pipeline_mode<synchronous>, transform_indices = @transform_10, window_bounds = array<i64: 128, 1>}, {pipeline_mode = #tpu.pipeline_mode<synchronous>, transform_indices = @transform_11, window_bounds = array<i64: 128, 1>}, {pipeline_mode = #tpu.pipeline_mode<synchronous>, transform_indices = @transform_12, window_bounds = array<i64: 33, 17>}, {pipeline_mode = #tpu.pipeline_mode<synchronous>, transform_indices = @transform_13, window_bounds = array<i64: 200, 1280>}, {pipeline_mode = #tpu.pipeline_mode<synchronous>, transform_indices = @transform_14, window_bounds = array<i64: 200, 1>}, {pipeline_mode = #tpu.pipeline_mode<synchronous>, transform_indices = @transform_15, window_bounds = array<i64: 200, 1>}, {pipeline_mode = #tpu.pipeline_mode<synchronous>, transform_indices = @transform_16, window_bounds = array<i64: 7, 4>}, {transform_indices = @transform_17, window_bounds = array<i64: 1, 200, 4>}]} {
    %c0 = arith.constant 0 : index
    %c0_0 = arith.constant 0 : index
    %c0_1 = arith.constant 0 : index
    %0 = vector.load %arg1[%c0, %c0_0, %c0_1] : memref<1x8x200xf32, #tpu.memory_space<vmem>>, vector<1x8x200xf32>
    %1 = vector.shape_cast %0 : vector<1x8x200xf32> to vector<8x200xf32>
    %2 = vector.extract_strided_slice %1 {offsets = [0, 0], sizes = [8, 191], strides = [1, 1]} : vector<8x200xf32> to vector<8x191xf32>
    %3 = vector.extract_strided_slice %1 {offsets = [0, 1], sizes = [8, 191], strides = [1, 1]} : vector<8x200xf32> to vector<8x191xf32>
    %4 = vector.extract_strided_slice %1 {offsets = [0, 2], sizes = [8, 191], strides = [1, 1]} : vector<8x200xf32> to vector<8x191xf32>
    %5 = vector.extract_strided_slice %1 {offsets = [0, 3], sizes = [8, 191], strides = [1, 1]} : vector<8x200xf32> to vector<8x191xf32>
    %6 = vector.extract_strided_slice %1 {offsets = [0, 4], sizes = [8, 191], strides = [1, 1]} : vector<8x200xf32> to vector<8x191xf32>
    %7 = vector.extract_strided_slice %1 {offsets = [0, 5], sizes = [8, 191], strides = [1, 1]} : vector<8x200xf32> to vector<8x191xf32>
    %8 = vector.extract_strided_slice %1 {offsets = [0, 6], sizes = [8, 191], strides = [1, 1]} : vector<8x200xf32> to vector<8x191xf32>
    %9 = vector.extract_strided_slice %1 {offsets = [0, 7], sizes = [8, 191], strides = [1, 1]} : vector<8x200xf32> to vector<8x191xf32>
    %10 = vector.extract_strided_slice %1 {offsets = [0, 8], sizes = [8, 191], strides = [1, 1]} : vector<8x200xf32> to vector<8x191xf32>
    %11 = vector.extract_strided_slice %1 {offsets = [0, 9], sizes = [8, 191], strides = [1, 1]} : vector<8x200xf32> to vector<8x191xf32>
    %12 = tpu.concatenate %2, %3, %4, %5, %6, %7, %8, %9, %10, %11 in 0 : vector<8x191xf32>, vector<8x191xf32>, vector<8x191xf32>, vector<8x191xf32>, vector<8x191xf32>, vector<8x191xf32>, vector<8x191xf32>, vector<8x191xf32>, vector<8x191xf32>, vector<8x191xf32> -> vector<80x191xf32>
    %c0_2 = arith.constant 0 : index
    %c0_3 = arith.constant 0 : index
    %13 = vector.load %arg2[%c0_2, %c0_3] : memref<32x80xf32, #tpu.memory_space<vmem>>, vector<32x80xf32>
    %cst = arith.constant dense<0.000000e+00> : vector<32x191xf32>
    %14 = tpu.matmul %13, %12, %cst {dimension_numbers = #tpu.dot_dimension_numbers<[1], [0], [0], [1], [0, 0, 1, 1], [], []>} : vector<32x80xf32>, vector<80x191xf32>, vector<32x191xf32> -> vector<32x191xf32>
    %c0_4 = arith.constant 0 : index
    %c0_5 = arith.constant 0 : index
    %15 = vector.load %arg3[%c0_4, %c0_5] : memref<32x1xf32, #tpu.memory_space<vmem>>, vector<32x1xf32>
    %16 = vector.broadcast %15 : vector<32x1xf32> to vector<32x191xf32>
    %17 = arith.mulf %14, %16 : vector<32x191xf32>
    %c0_6 = arith.constant 0 : index
    %c0_7 = arith.constant 0 : index
    %18 = vector.load %arg4[%c0_6, %c0_7] : memref<32x1xf32, #tpu.memory_space<vmem>>, vector<32x1xf32>
    %19 = vector.broadcast %18 : vector<32x1xf32> to vector<32x191xf32>
    %20 = arith.addf %17, %19 : vector<32x191xf32>
    %cst_8 = arith.constant 0.000000e+00 : f32
    %21 = vector.broadcast %cst_8 : f32 to vector<32x191xf32>
    %22 = arith.cmpf ogt, %20, %21 : vector<32x191xf32>
    %cst_9 = arith.constant 0.000000e+00 : f32
    %23 = vector.broadcast %cst_9 : f32 to vector<32x191xf32>
    %24 = arith.minimumf %20, %23 : vector<32x191xf32>
    %25 = math.exp %24 : vector<32x191xf32>
    %cst_10 = arith.constant 1.000000e+00 : f32
    %26 = vector.broadcast %cst_10 : f32 to vector<32x191xf32>
    %27 = arith.subf %25, %26 : vector<32x191xf32>
    %28 = arith.select %22, %20, %27 : vector<32x191xi1>, vector<32x191xf32>
    %29 = vector.extract_strided_slice %28 {offsets = [0, 0], sizes = [32, 190], strides = [1, 1]} : vector<32x191xf32> to vector<32x190xf32>
    %30 = vector.extract_strided_slice %28 {offsets = [0, 1], sizes = [32, 190], strides = [1, 1]} : vector<32x191xf32> to vector<32x190xf32>
    %31 = arith.maximumf %29, %30 : vector<32x190xf32>
    %c0_11 = arith.constant 0 : index
    %c0_12 = arith.constant 0 : index
    %32 = vector.load %arg5[%c0_11, %c0_12] : memref<190x95xf32, #tpu.memory_space<vmem>>, vector<190x95xf32>
    %cst_13 = arith.constant dense<0.000000e+00> : vector<32x95xf32>
    %33 = tpu.matmul %31, %32, %cst_13 {dimension_numbers = #tpu.dot_dimension_numbers<[1], [0], [0], [1], [0, 0, 1, 1], [], []>} : vector<32x190xf32>, vector<190x95xf32>, vector<32x95xf32> -> vector<32x95xf32>
    %34 = vector.extract_strided_slice %33 {offsets = [0, 0], sizes = [32, 86], strides = [1, 1]} : vector<32x95xf32> to vector<32x86xf32>
    %35 = vector.extract_strided_slice %33 {offsets = [0, 1], sizes = [32, 86], strides = [1, 1]} : vector<32x95xf32> to vector<32x86xf32>
    %36 = vector.extract_strided_slice %33 {offsets = [0, 2], sizes = [32, 86], strides = [1, 1]} : vector<32x95xf32> to vector<32x86xf32>
    %37 = vector.extract_strided_slice %33 {offsets = [0, 3], sizes = [32, 86], strides = [1, 1]} : vector<32x95xf32> to vector<32x86xf32>
    %38 = vector.extract_strided_slice %33 {offsets = [0, 4], sizes = [32, 86], strides = [1, 1]} : vector<32x95xf32> to vector<32x86xf32>
    %39 = vector.extract_strided_slice %33 {offsets = [0, 5], sizes = [32, 86], strides = [1, 1]} : vector<32x95xf32> to vector<32x86xf32>
    %40 = vector.extract_strided_slice %33 {offsets = [0, 6], sizes = [32, 86], strides = [1, 1]} : vector<32x95xf32> to vector<32x86xf32>
    %41 = vector.extract_strided_slice %33 {offsets = [0, 7], sizes = [32, 86], strides = [1, 1]} : vector<32x95xf32> to vector<32x86xf32>
    %42 = vector.extract_strided_slice %33 {offsets = [0, 8], sizes = [32, 86], strides = [1, 1]} : vector<32x95xf32> to vector<32x86xf32>
    %43 = vector.extract_strided_slice %33 {offsets = [0, 9], sizes = [32, 86], strides = [1, 1]} : vector<32x95xf32> to vector<32x86xf32>
    %44 = tpu.concatenate %34, %35, %36, %37, %38, %39, %40, %41, %42, %43 in 0 : vector<32x86xf32>, vector<32x86xf32>, vector<32x86xf32>, vector<32x86xf32>, vector<32x86xf32>, vector<32x86xf32>, vector<32x86xf32>, vector<32x86xf32>, vector<32x86xf32>, vector<32x86xf32> -> vector<320x86xf32>
    %c0_14 = arith.constant 0 : index
    %c0_15 = arith.constant 0 : index
    %45 = vector.load %arg6[%c0_14, %c0_15] : memref<64x320xf32, #tpu.memory_space<vmem>>, vector<64x320xf32>
    %cst_16 = arith.constant dense<0.000000e+00> : vector<64x86xf32>
    %46 = tpu.matmul %45, %44, %cst_16 {dimension_numbers = #tpu.dot_dimension_numbers<[1], [0], [0], [1], [0, 0, 1, 1], [], []>} : vector<64x320xf32>, vector<320x86xf32>, vector<64x86xf32> -> vector<64x86xf32>
    %c0_17 = arith.constant 0 : index
    %c0_18 = arith.constant 0 : index
    %47 = vector.load %arg7[%c0_17, %c0_18] : memref<64x1xf32, #tpu.memory_space<vmem>>, vector<64x1xf32>
    %48 = vector.broadcast %47 : vector<64x1xf32> to vector<64x86xf32>
    %49 = arith.mulf %46, %48 : vector<64x86xf32>
    %c0_19 = arith.constant 0 : index
    %c0_20 = arith.constant 0 : index
    %50 = vector.load %arg8[%c0_19, %c0_20] : memref<64x1xf32, #tpu.memory_space<vmem>>, vector<64x1xf32>
    %51 = vector.broadcast %50 : vector<64x1xf32> to vector<64x86xf32>
    %52 = arith.addf %49, %51 : vector<64x86xf32>
    %cst_21 = arith.constant 0.000000e+00 : f32
    %53 = vector.broadcast %cst_21 : f32 to vector<64x86xf32>
    %54 = arith.cmpf ogt, %52, %53 : vector<64x86xf32>
    %cst_22 = arith.constant 0.000000e+00 : f32
    %55 = vector.broadcast %cst_22 : f32 to vector<64x86xf32>
    %56 = arith.minimumf %52, %55 : vector<64x86xf32>
    %57 = math.exp %56 : vector<64x86xf32>
    %cst_23 = arith.constant 1.000000e+00 : f32
    %58 = vector.broadcast %cst_23 : f32 to vector<64x86xf32>
    %59 = arith.subf %57, %58 : vector<64x86xf32>
    %60 = arith.select %54, %52, %59 : vector<64x86xi1>, vector<64x86xf32>
    %61 = vector.extract_strided_slice %60 {offsets = [0, 0], sizes = [64, 85], strides = [1, 1]} : vector<64x86xf32> to vector<64x85xf32>
    %62 = vector.extract_strided_slice %60 {offsets = [0, 1], sizes = [64, 85], strides = [1, 1]} : vector<64x86xf32> to vector<64x85xf32>
    %63 = arith.maximumf %61, %62 : vector<64x85xf32>
    %c0_24 = arith.constant 0 : index
    %c0_25 = arith.constant 0 : index
    %64 = vector.load %arg9[%c0_24, %c0_25] : memref<85x43xf32, #tpu.memory_space<vmem>>, vector<85x43xf32>
    %cst_26 = arith.constant dense<0.000000e+00> : vector<64x43xf32>
    %65 = tpu.matmul %63, %64, %cst_26 {dimension_numbers = #tpu.dot_dimension_numbers<[1], [0], [0], [1], [0, 0, 1, 1], [], []>} : vector<64x85xf32>, vector<85x43xf32>, vector<64x43xf32> -> vector<64x43xf32>
    %66 = vector.extract_strided_slice %65 {offsets = [0, 0], sizes = [64, 34], strides = [1, 1]} : vector<64x43xf32> to vector<64x34xf32>
    %67 = vector.extract_strided_slice %65 {offsets = [0, 1], sizes = [64, 34], strides = [1, 1]} : vector<64x43xf32> to vector<64x34xf32>
    %68 = vector.extract_strided_slice %65 {offsets = [0, 2], sizes = [64, 34], strides = [1, 1]} : vector<64x43xf32> to vector<64x34xf32>
    %69 = vector.extract_strided_slice %65 {offsets = [0, 3], sizes = [64, 34], strides = [1, 1]} : vector<64x43xf32> to vector<64x34xf32>
    %70 = vector.extract_strided_slice %65 {offsets = [0, 4], sizes = [64, 34], strides = [1, 1]} : vector<64x43xf32> to vector<64x34xf32>
    %71 = vector.extract_strided_slice %65 {offsets = [0, 5], sizes = [64, 34], strides = [1, 1]} : vector<64x43xf32> to vector<64x34xf32>
    %72 = vector.extract_strided_slice %65 {offsets = [0, 6], sizes = [64, 34], strides = [1, 1]} : vector<64x43xf32> to vector<64x34xf32>
    %73 = vector.extract_strided_slice %65 {offsets = [0, 7], sizes = [64, 34], strides = [1, 1]} : vector<64x43xf32> to vector<64x34xf32>
    %74 = vector.extract_strided_slice %65 {offsets = [0, 8], sizes = [64, 34], strides = [1, 1]} : vector<64x43xf32> to vector<64x34xf32>
    %75 = vector.extract_strided_slice %65 {offsets = [0, 9], sizes = [64, 34], strides = [1, 1]} : vector<64x43xf32> to vector<64x34xf32>
    %76 = tpu.concatenate %66, %67, %68, %69, %70, %71, %72, %73, %74, %75 in 0 : vector<64x34xf32>, vector<64x34xf32>, vector<64x34xf32>, vector<64x34xf32>, vector<64x34xf32>, vector<64x34xf32>, vector<64x34xf32>, vector<64x34xf32>, vector<64x34xf32>, vector<64x34xf32> -> vector<640x34xf32>
    %c0_27 = arith.constant 0 : index
    %c0_28 = arith.constant 0 : index
    %77 = vector.load %arg10[%c0_27, %c0_28] : memref<128x640xf32, #tpu.memory_space<vmem>>, vector<128x640xf32>
    %cst_29 = arith.constant dense<0.000000e+00> : vector<128x34xf32>
    %78 = tpu.matmul %77, %76, %cst_29 {dimension_numbers = #tpu.dot_dimension_numbers<[1], [0], [0], [1], [0, 0, 1, 1], [], []>} : vector<128x640xf32>, vector<640x34xf32>, vector<128x34xf32> -> vector<128x34xf32>
    %c0_30 = arith.constant 0 : index
    %c0_31 = arith.constant 0 : index
    %79 = vector.load %arg11[%c0_30, %c0_31] : memref<128x1xf32, #tpu.memory_space<vmem>>, vector<128x1xf32>
    %80 = vector.broadcast %79 : vector<128x1xf32> to vector<128x34xf32>
    %81 = arith.mulf %78, %80 : vector<128x34xf32>
    %c0_32 = arith.constant 0 : index
    %c0_33 = arith.constant 0 : index
    %82 = vector.load %arg12[%c0_32, %c0_33] : memref<128x1xf32, #tpu.memory_space<vmem>>, vector<128x1xf32>
    %83 = vector.broadcast %82 : vector<128x1xf32> to vector<128x34xf32>
    %84 = arith.addf %81, %83 : vector<128x34xf32>
    %cst_34 = arith.constant 0.000000e+00 : f32
    %85 = vector.broadcast %cst_34 : f32 to vector<128x34xf32>
    %86 = arith.cmpf ogt, %84, %85 : vector<128x34xf32>
    %cst_35 = arith.constant 0.000000e+00 : f32
    %87 = vector.broadcast %cst_35 : f32 to vector<128x34xf32>
    %88 = arith.minimumf %84, %87 : vector<128x34xf32>
    %89 = math.exp %88 : vector<128x34xf32>
    %cst_36 = arith.constant 1.000000e+00 : f32
    %90 = vector.broadcast %cst_36 : f32 to vector<128x34xf32>
    %91 = arith.subf %89, %90 : vector<128x34xf32>
    %92 = arith.select %86, %84, %91 : vector<128x34xi1>, vector<128x34xf32>
    %93 = vector.extract_strided_slice %92 {offsets = [0, 0], sizes = [128, 33], strides = [1, 1]} : vector<128x34xf32> to vector<128x33xf32>
    %94 = vector.extract_strided_slice %92 {offsets = [0, 1], sizes = [128, 33], strides = [1, 1]} : vector<128x34xf32> to vector<128x33xf32>
    %95 = arith.maximumf %93, %94 : vector<128x33xf32>
    %c0_37 = arith.constant 0 : index
    %c0_38 = arith.constant 0 : index
    %96 = vector.load %arg13[%c0_37, %c0_38] : memref<33x17xf32, #tpu.memory_space<vmem>>, vector<33x17xf32>
    %cst_39 = arith.constant dense<0.000000e+00> : vector<128x17xf32>
    %97 = tpu.matmul %95, %96, %cst_39 {dimension_numbers = #tpu.dot_dimension_numbers<[1], [0], [0], [1], [0, 0, 1, 1], [], []>} : vector<128x33xf32>, vector<33x17xf32>, vector<128x17xf32> -> vector<128x17xf32>
    %98 = vector.extract_strided_slice %97 {offsets = [0, 0], sizes = [128, 8], strides = [1, 1]} : vector<128x17xf32> to vector<128x8xf32>
    %99 = vector.extract_strided_slice %97 {offsets = [0, 1], sizes = [128, 8], strides = [1, 1]} : vector<128x17xf32> to vector<128x8xf32>
    %100 = vector.extract_strided_slice %97 {offsets = [0, 2], sizes = [128, 8], strides = [1, 1]} : vector<128x17xf32> to vector<128x8xf32>
    %101 = vector.extract_strided_slice %97 {offsets = [0, 3], sizes = [128, 8], strides = [1, 1]} : vector<128x17xf32> to vector<128x8xf32>
    %102 = vector.extract_strided_slice %97 {offsets = [0, 4], sizes = [128, 8], strides = [1, 1]} : vector<128x17xf32> to vector<128x8xf32>
    %103 = vector.extract_strided_slice %97 {offsets = [0, 5], sizes = [128, 8], strides = [1, 1]} : vector<128x17xf32> to vector<128x8xf32>
    %104 = vector.extract_strided_slice %97 {offsets = [0, 6], sizes = [128, 8], strides = [1, 1]} : vector<128x17xf32> to vector<128x8xf32>
    %105 = vector.extract_strided_slice %97 {offsets = [0, 7], sizes = [128, 8], strides = [1, 1]} : vector<128x17xf32> to vector<128x8xf32>
    %106 = vector.extract_strided_slice %97 {offsets = [0, 8], sizes = [128, 8], strides = [1, 1]} : vector<128x17xf32> to vector<128x8xf32>
    %107 = vector.extract_strided_slice %97 {offsets = [0, 9], sizes = [128, 8], strides = [1, 1]} : vector<128x17xf32> to vector<128x8xf32>
    %108 = tpu.concatenate %98, %99, %100, %101, %102, %103, %104, %105, %106, %107 in 0 : vector<128x8xf32>, vector<128x8xf32>, vector<128x8xf32>, vector<128x8xf32>, vector<128x8xf32>, vector<128x8xf32>, vector<128x8xf32>, vector<128x8xf32>, vector<128x8xf32>, vector<128x8xf32> -> vector<1280x8xf32>
    %c0_40 = arith.constant 0 : index
    %c0_41 = arith.constant 0 : index
    %109 = vector.load %arg14[%c0_40, %c0_41] : memref<200x1280xf32, #tpu.memory_space<vmem>>, vector<200x1280xf32>
    %cst_42 = arith.constant dense<0.000000e+00> : vector<200x8xf32>
    %110 = tpu.matmul %109, %108, %cst_42 {dimension_numbers = #tpu.dot_dimension_numbers<[1], [0], [0], [1], [0, 0, 1, 1], [], []>} : vector<200x1280xf32>, vector<1280x8xf32>, vector<200x8xf32> -> vector<200x8xf32>
    %c0_43 = arith.constant 0 : index
    %c0_44 = arith.constant 0 : index
    %111 = vector.load %arg15[%c0_43, %c0_44] : memref<200x1xf32, #tpu.memory_space<vmem>>, vector<200x1xf32>
    %112 = vector.broadcast %111 : vector<200x1xf32> to vector<200x8xf32>
    %113 = arith.mulf %110, %112 : vector<200x8xf32>
    %c0_45 = arith.constant 0 : index
    %c0_46 = arith.constant 0 : index
    %114 = vector.load %arg16[%c0_45, %c0_46] : memref<200x1xf32, #tpu.memory_space<vmem>>, vector<200x1xf32>
    %115 = vector.broadcast %114 : vector<200x1xf32> to vector<200x8xf32>
    %116 = arith.addf %113, %115 : vector<200x8xf32>
    %cst_47 = arith.constant 0.000000e+00 : f32
    %117 = vector.broadcast %cst_47 : f32 to vector<200x8xf32>
    %118 = arith.cmpf ogt, %116, %117 : vector<200x8xf32>
    %cst_48 = arith.constant 0.000000e+00 : f32
    %119 = vector.broadcast %cst_48 : f32 to vector<200x8xf32>
    %120 = arith.minimumf %116, %119 : vector<200x8xf32>
    %121 = math.exp %120 : vector<200x8xf32>
    %cst_49 = arith.constant 1.000000e+00 : f32
    %122 = vector.broadcast %cst_49 : f32 to vector<200x8xf32>
    %123 = arith.subf %121, %122 : vector<200x8xf32>
    %124 = arith.select %118, %116, %123 : vector<200x8xi1>, vector<200x8xf32>
    %125 = vector.extract_strided_slice %124 {offsets = [0, 0], sizes = [200, 7], strides = [1, 1]} : vector<200x8xf32> to vector<200x7xf32>
    %126 = vector.extract_strided_slice %124 {offsets = [0, 1], sizes = [200, 7], strides = [1, 1]} : vector<200x8xf32> to vector<200x7xf32>
    %127 = arith.maximumf %125, %126 : vector<200x7xf32>
    %c0_50 = arith.constant 0 : index
    %c0_51 = arith.constant 0 : index
    %128 = vector.load %arg17[%c0_50, %c0_51] : memref<7x4xf32, #tpu.memory_space<vmem>>, vector<7x4xf32>
    %cst_52 = arith.constant dense<0.000000e+00> : vector<200x4xf32>
    %129 = tpu.matmul %127, %128, %cst_52 {dimension_numbers = #tpu.dot_dimension_numbers<[1], [0], [0], [1], [0, 0, 1, 1], [], []>} : vector<200x7xf32>, vector<7x4xf32>, vector<200x4xf32> -> vector<200x4xf32>
    %c0_53 = arith.constant 0 : index
    %c0_54 = arith.constant 0 : index
    %c0_55 = arith.constant 0 : index
    %130 = vector.load %arg18[%c0_53, %c0_54, %c0_55] : memref<1x200x4xf32, #tpu.memory_space<vmem>>, vector<1x200x4xf32>
    %131 = vector.shape_cast %130 : vector<1x200x4xf32> to vector<200x4xf32>
    %132 = vector.shape_cast %129 : vector<200x4xf32> to vector<1x200x4xf32>
    tpu.vector_store %arg18[%c0_53, %c0_54, %c0_55], %132 {strides = array<i32>} : memref<1x200x4xf32, #tpu.memory_space<vmem>>, vector<1x200x4xf32>,
    return
  }
  func.func @transform_0(%arg0: i32) -> (i32, i32, i32) {
    %c0_i32 = arith.constant 0 : i32
    %c0_i32_0 = arith.constant 0 : i32
    %c0_i32_1 = arith.constant 0 : i32
    return %arg0, %c0_i32, %c0_i32_0 : i32, i32, i32
  }
  func.func @transform_1(%arg0: i32) -> (i32, i32) {
    %c0_i32 = arith.constant 0 : i32
    %c0_i32_0 = arith.constant 0 : i32
    %c0_i32_1 = arith.constant 0 : i32
    return %c0_i32, %c0_i32_0 : i32, i32
  }
  func.func @transform_2(%arg0: i32) -> (i32, i32) {
    %c0_i32 = arith.constant 0 : i32
    %c0_i32_0 = arith.constant 0 : i32
    %c0_i32_1 = arith.constant 0 : i32
    return %c0_i32, %c0_i32_0 : i32, i32
  }
  func.func @transform_3(%arg0: i32) -> (i32, i32) {
    %c0_i32 = arith.constant 0 : i32
    %c0_i32_0 = arith.constant 0 : i32
    %c0_i32_1 = arith.constant 0 : i32
    return %c0_i32, %c0_i32_0 : i32, i32
  }
  func.func @transform_4(%arg0: i32) -> (i32, i32) {
    %c0_i32 = arith.constant 0 : i32
    %c0_i32_0 = arith.constant 0 : i32
    %c0_i32_1 = arith.constant 0 : i32
    return %c0_i32, %c0_i32_0 : i32, i32
  }
  func.func @transform_5(%arg0: i32) -> (i32, i32) {
    %c0_i32 = arith.constant 0 : i32
    %c0_i32_0 = arith.constant 0 : i32
    %c0_i32_1 = arith.constant 0 : i32
    return %c0_i32, %c0_i32_0 : i32, i32
  }
  func.func @transform_6(%arg0: i32) -> (i32, i32) {
    %c0_i32 = arith.constant 0 : i32
    %c0_i32_0 = arith.constant 0 : i32
    %c0_i32_1 = arith.constant 0 : i32
    return %c0_i32, %c0_i32_0 : i32, i32
  }
  func.func @transform_7(%arg0: i32) -> (i32, i32) {
    %c0_i32 = arith.constant 0 : i32
    %c0_i32_0 = arith.constant 0 : i32
    %c0_i32_1 = arith.constant 0 : i32
    return %c0_i32, %c0_i32_0 : i32, i32
  }
  func.func @transform_8(%arg0: i32) -> (i32, i32) {
    %c0_i32 = arith.constant 0 : i32
    %c0_i32_0 = arith.constant 0 : i32
    %c0_i32_1 = arith.constant 0 : i32
    return %c0_i32, %c0_i32_0 : i32, i32
  }
  func.func @transform_9(%arg0: i32) -> (i32, i32) {
    %c0_i32 = arith.constant 0 : i32
    %c0_i32_0 = arith.constant 0 : i32
    %c0_i32_1 = arith.constant 0 : i32
    return %c0_i32, %c0_i32_0 : i32, i32
  }
  func.func @transform_10(%arg0: i32) -> (i32, i32) {
    %c0_i32 = arith.constant 0 : i32
    %c0_i32_0 = arith.constant 0 : i32
    %c0_i32_1 = arith.constant 0 : i32
    return %c0_i32, %c0_i32_0 : i32, i32
  }
  func.func @transform_11(%arg0: i32) -> (i32, i32) {
    %c0_i32 = arith.constant 0 : i32
    %c0_i32_0 = arith.constant 0 : i32
    %c0_i32_1 = arith.constant 0 : i32
    return %c0_i32, %c0_i32_0 : i32, i32
  }
  func.func @transform_12(%arg0: i32) -> (i32, i32) {
    %c0_i32 = arith.constant 0 : i32
    %c0_i32_0 = arith.constant 0 : i32
    %c0_i32_1 = arith.constant 0 : i32
    return %c0_i32, %c0_i32_0 : i32, i32
  }
  func.func @transform_13(%arg0: i32) -> (i32, i32) {
    %c0_i32 = arith.constant 0 : i32
    %c0_i32_0 = arith.constant 0 : i32
    %c0_i32_1 = arith.constant 0 : i32
    return %c0_i32, %c0_i32_0 : i32, i32
  }
  func.func @transform_14(%arg0: i32) -> (i32, i32) {
    %c0_i32 = arith.constant 0 : i32
    %c0_i32_0 = arith.constant 0 : i32
    %c0_i32_1 = arith.constant 0 : i32
    return %c0_i32, %c0_i32_0 : i32, i32
  }
  func.func @transform_15(%arg0: i32) -> (i32, i32) {
    %c0_i32 = arith.constant 0 : i32
    %c0_i32_0 = arith.constant 0 : i32
    %c0_i32_1 = arith.constant 0 : i32
    return %c0_i32, %c0_i32_0 : i32, i32
  }
  func.func @transform_16(%arg0: i32) -> (i32, i32) {
    %c0_i32 = arith.constant 0 : i32
    %c0_i32_0 = arith.constant 0 : i32
    %c0_i32_1 = arith.constant 0 : i32
    return %c0_i32, %c0_i32_0 : i32, i32
  }
  func.func @transform_17(%arg0: i32) -> (i32, i32, i32) {
    %c0_i32 = arith.constant 0 : i32
    %c0_i32_0 = arith.constant 0 : i32
    %c0_i32_1 = arith.constant 0 : i32
    return %arg0, %c0_i32, %c0_i32_0 : i32, i32, i32
  }
}

</mosaic_0001>

<bundles_post_ra>
// kernel: tpu_custom_call.1
= control target key start
LH: loop header
LB: loop body
LE: loop exit
PB: predicated region body
PF: predicated region fallthrough
CT: control target
= control target key end

     0   :  { %s8516_s0 = inlined_call_operand.vmem [shape: f32[2,8,200], index: 0, kind: input, shape index: {}]   ;;  %s8517_s1 = inlined_call_operand.vmem [shape: f32[32,80], index: 1, kind: input, shape index: {}]   ;;  %s8518_s2 = inlined_call_operand.vmem [shape: f32[32,1], index: 2, kind: input, shape index: {}]   ;;  %s8519_s3 = inlined_call_operand.vmem [shape: f32[32,1], index: 3, kind: input, shape index: {}]   ;;  %s8520_s4 = inlined_call_operand.vmem [shape: f32[190,95], index: 4, kind: input, shape index: {}]   ;;  %s8521_s5 = inlined_call_operand.vmem [shape: f32[64,320], index: 5, kind: input, shape index: {}]   ;;  %s8522_s6 = inlined_call_operand.vmem [shape: f32[64,1], index: 6, kind: input, shape index: {}]   ;;  %s8523_s7 = inlined_call_operand.vmem [shape: f32[64,1], index: 7, kind: input, shape index: {}]   ;;  %s8524_s8 = inlined_call_operand.vmem [shape: f32[85,43], index: 8, kind: input, shape index: {}]   ;;  %s8525_s9 = inlined_call_operand.hbm [shape: f32[128,640], index: 9, kind: input, shape index: {}]   ;;  %s8526_s10 = inlined_call_operand.vmem [shape: f32[128,1], index: 10, kind: input, shape index: {}]   ;;  %s8527_s11 = inlined_call_operand.vmem [shape: f32[128,1], index: 11, kind: input, shape index: {}]   ;;  %s8528_s12 = inlined_call_operand.vmem [shape: f32[33,17], index: 12, kind: input, shape index: {}]   ;;  %s8529_s13 = inlined_call_operand.hbm [shape: f32[200,1280], index: 13, kind: input, shape index: {}]   ;;  %s8530_s14 = inlined_call_operand.vmem [shape: f32[200,1], index: 14, kind: input, shape index: {}]   ;;  %s8531_s15 = inlined_call_operand.vmem [shape: f32[200,1], index: 15, kind: input, shape index: {}]   ;;  %s8532_s16 = inlined_call_operand.vmem [shape: f32[7,4], index: 16, kind: input, shape index: {}]   ;;  %s8533_s17 = inlined_call_operand.vmem [shape: f32[2,200,4], index: 17, kind: output, shape index: {}]  }
   0x1   :  { %8553 = sst [smem:[#allocation27_spill]] %s8516_s0 }
   0x2   :  { %8554 = sst [smem:[#allocation28_spill]] %s8517_s1 }
   0x3   :  { %8555 = sst [smem:[#allocation29_spill]] %s8518_s2 }
   0x4   :  { %8556 = sst [smem:[#allocation30_spill]] %s8519_s3 }
   0x5   :  { %8557 = sst [smem:[#allocation31_spill]] %s8520_s4 }
   0x6   :  { %8558 = sst [smem:[#allocation32_spill]] %s8525_s9 }
   0x7   :  { %8559 = sst [smem:[#allocation33_spill]] %s8529_s13 }
   0x8   :  { %22 = vsyncpa [#allocation3], 0 }
   0x9   :  { %23 = vsyncpa [#allocation5], 0  ;;  %s6405_s24 = smov 0  }
   0xa LB: > { %s8560_s9 = sld [smem:[#allocation32_spill]]  ;;  %s5225_s28 = sadd.s32 4294967295, %s6297_s24   ;;  %s6297_s24 = sphi %s6405_s24, %s29_s24  }
   0xb   : > { %p5227_p0 = scmp.ge.s32.totalorder %s6297_s24, 1  ;;  %p422_p1 = scmp.lt.s32.totalorder %s6297_s24, 3 }
   0xc   : > { %p5403_p2 = scmp.eq.s32.totalorder %s5225_s28, 0  ;;  %s6299_s0 = smov [#allocation2]  }
   0xd   : > { %p6416_p3 = pnand %p5227_p0, %p422_p1  ;;  %s459_s30 = sshll.u32 %s6299_s0, 4  ;;  %s460_s30 = int_to_ptr.vmem [resolvable:$true] %s459_s30 }
   0xe   : > { %s8562_s13 = sld [smem:[#allocation33_spill]]  ;;  %s6300_s20 = smov [#allocation4]  }
   0xf   : > { %p5396_p4 = pneg %p6416_p3  ;;  %s482_s21 = sshll.u32 %s6300_s20, 4  ;;  %s483_s21 = int_to_ptr.vmem [resolvable:$true] %s482_s21 }
  0x10   : > { %s457_s27 = sshll.u32 %s8560_s9, 4  ;;  %s6301_s22 = smov 640   ;;  %s458_s27 = int_to_ptr.hbm [resolvable:$true] %s457_s27 }
  0x11   : > { %p5397_p5 = pnand %p5403_p2, %p5396_p4  ;;  %s6302_s23 = smov 40  }
  0x12   : > { %s6303_s25 = smov 1280   ;;  %s6304_s26 = smov 80  }
  0x13   : > { %5399 = dma.hbm_to_vmem [thread:$0]  (!%p5397_p5), %s458_s27, 10240, %s460_s30, [#allocation3], %s6301_s22, %s6301_s22, %s6302_s23  }
  0x14   : > { %s480_s1 = sshll.u32 %s8562_s13, 4  ;;  %515 = sbr.rel (%p6416_p3) target bundleno = 3138 (0xc42), region = 88  ;;  %s481_s1 = int_to_ptr.hbm [resolvable:$true] %s480_s1 }
  0x15   : > { %5402 = dma.hbm_to_vmem [thread:$0]  (!%p5397_p5), %s481_s1, 32000, %s483_s21, [#allocation5], %s6303_s25, %s6303_s25, %s6304_s26  }
  0x19   : > { %6288 = dma.done.wait (%p5403_p2), [#allocation3], 10240  }
  0x1a   : > { %6290 = vsyncadd (%p5403_p2), [#allocation3], 4294957056 }
  0x1b   : > { %6292 = dma.done.wait (%p5403_p2), [#allocation5], 32000  }
  0x1c   : > { %6294 = vsyncadd (%p5403_p2), [#allocation5], 4294935296  ;;  %p573_p6 = scmp.lt.s32.totalorder %s5225_s28, 1  ;;  %s8563_s18 = sld [smem:[#allocation27_spill]]  ;;  %v6314_v3 = vmov 0   ;;  %vm655_vm0 = vcmask 973824  }
  0x1d   : > { %s8539_s29 = smov 119   ;;  %s8547_s1 = smov 121   ;;  %5477 = vset.pattern.permute.xlu1 %v6314_v3  ;;  %5476 = vset.pattern.permute.xlu0 %v6314_v3  ;;  %vm647_vm1 = vcmask 982016   ;;  %vm639_vm2 = vcmask 990208   ;;  %vm631_vm3 = vcmask 998400   ;;  %vm623_vm4 = vcmask 1006592  }
  0x1e   : > { %s8616_s28 = smov (!%p573_p6, %s5225_s28), 1  ;;  %s8543_s20 = smov 123   ;;  %5478 = vset.pattern.permute.xlu2 %v6314_v3  ;;  %vm615_vm5 = vcmask 1014784   ;;  %vm607_vm6 = vcmask 1022976   ;;  %vm599_vm7 = vcmask 1031168   ;;  %vm591_vm8 = vcmask 1039360  }
  0x1f   : > { %s5369_s0 = sshll.u32 %s8616_s28, 4  ;;  %s8535_s21 = smov 120   ;;  %vm663_vm9 = vcmask 654336  }
  0x20   : > { %s8541_s22 = smov 122   ;;  %s8537_s23 = smov 124  }
  0x21   : > { %s8551_s25 = smov 125   ;;  %s8549_s26 = smov 126  }
  0x22   : > { %s577_s19 = scalar_lea.vmem %s8563_s18, %s5369_s0  ;;  %s8545_s0 = smov 127  }
  0x23   : > { %v6438_v0 = vld [vmem:[%s577_s19] sm:$0xff]  ;;  %v6440_v1 = vld [vmem:[%s577_s19 + $0x8] sm:$0xff]  ;;  %s8564_s3 = sld [smem:[#allocation30_spill]]  ;;  %s8568_s30 = smov 121  }
  0x24   : > { %v5431_v2 = vpack.i.bf16 %v6440_v1, %v6438_v0  ;;  %s8565_s2 = sld [smem:[#allocation29_spill]]  ;;  %s8572_s19 = smov 119  }
  0x25   : > { %s8566_s18 = sld [smem:[#allocation28_spill]]  ;;  %s8574_s27 = smov 120  }
  0x26   : > { %5432 = vrot.lane.b32.xlu0 %v5431_v2, %s8539_s29  ;;  %5442 = vrot.lane.b32.xlu1 %v5431_v2, %s8547_s1  ;;  %s8567_s4 = sld [smem:[#allocation31_spill]]  ;;  %s8569_s1 = smov 127  }
  0x27   : > { %5452 = vrot.lane.b32.xlu2 %v5431_v2, %s8543_s20  ;;  %s8571_s29 = smov 122  }
  0x29   : > { %v766_v4 = vld [vmem:[%s8564_s3] sm:$0xff]  ;;  %v767_v7 = vld [vmem:[%s8564_s3 + $0x8] sm:$0xff]  ;;  %v768_v14 = vld [vmem:[%s8564_s3 + $0x10] sm:$0xff] }
  0x2a   : > { %v734_v6 = vld [vmem:[%s8565_s2] sm:$0xff]  ;;  %v737_v15 = vld [vmem:[%s8565_s2 + $0x18] sm:$0xff]  ;;  %v735_v44 = vld [vmem:[%s8565_s2 + $0x8] sm:$0xff] }
  0x2b   : > { %v659_v46 = vld [vmem:[%s8566_s18] sm:$0xff]  ;;  %v736_v47 = vld [vmem:[%s8565_s2 + $0x10] sm:$0xff]  ;;  %v660_v48 = vld [vmem:[%s8566_s18 + $0x8] sm:$0xff]  ;;  %s8575_s2 = smov 125  }
  0x2c   : > { %v769_v49 = vld [vmem:[%s8564_s3 + $0x18] sm:$0xff]  ;;  %v661_v50 = vld [vmem:[%s8566_s18 + $0x10] sm:$0xff] }
  0x2d   : > { %v662_v51 = vld [vmem:[%s8566_s18 + $0x18] sm:$0xff] }
  0x2e   : > { %5437 = vrot.lane.b32.xlu0 %v5431_v2, %s8535_s21  ;;  %5447 = vrot.lane.b32.xlu1 %v5431_v2, %s8541_s22  ;;  %s8573_s21 = smov 124  }
  0x2f   : > { %5457 = vrot.lane.b32.xlu2 %v5431_v2, %s8537_s23 }
  0x36   : > { %5462 = vrot.lane.b32.xlu0 %v5431_v2, %s8551_s25  ;;  %5467 = vrot.lane.b32.xlu1 %v5431_v2, %s8549_s26 }
  0x37   : > { %5472 = vrot.lane.b32.xlu2 %v5431_v2, %s8545_s0 }
  0x3e   : > { %772 = vperm.xlu1 %5477, %v766_v4   ;;  %740 = vperm.xlu0 %5476, %v734_v6  }
  0x3f   : > { %745 = vperm.xlu2 %5478, %v735_v44  }
  0x46   : > { %777 = vperm.xlu1 %5477, %v767_v7   ;;  %782 = vperm.xlu0 %5476, %v768_v14  }
  0x47   : > { %750 = vperm.xlu2 %5478, %v736_v47  }
  0x4e   : > { %755 = vperm.xlu1 %5477, %v737_v15  }
  0x4f   : > { %787 = vperm.xlu2 %5478, %v769_v49  }
  0x81   : > { %v5453_v5 = vpop.permute.xlu2 %5452 }
  0x82   : > { %v5454_v25 = vunpack.i.l.bf16 %v5453_v5  ;;  %v5455_v26 = vunpack.i.h.bf16 %v5453_v5 }
  0x84   : > { %v624_v33 = vsel %vm623_vm4, %v5454_v25, %v5455_v26  ;;  %vm1125_vm4 = vcmask 523264  }
  0x89   : > { %v5458_v13 = vpop.permute.xlu2 %5457 }
  0x8a   : > { %v5459_v29 = vunpack.i.l.bf16 %v5458_v13  ;;  %v5460_v30 = vunpack.i.h.bf16 %v5458_v13 }
  0x8c   : > { %v616_v39 = vsel %vm615_vm5, %v5459_v29, %v5460_v30 }
  0x91   : > { %v5473_v31 = vpop.permute.xlu2 %5472 }
  0x92   : > { %v5474_v40 = vunpack.i.l.bf16 %v5473_v31  ;;  %v5475_v42 = vunpack.i.h.bf16 %v5473_v31  ;;  %v900_v31 = vld [vmem:[%s8567_s4 + $0x50] sm:$0xff] }
  0x94   : > { %v592_v45 = vsel %vm591_vm8, %v5474_v40, %v5475_v42 }
  0x98   : > { %v5433_v8 = vpop.permute.xlu0 %5432  ;;  %v5443_v9 = vpop.permute.xlu1 %5442 }
  0x99   : > { %v5434_v10 = vunpack.i.l.bf16 %v5433_v8  ;;  %v5435_v11 = vunpack.i.h.bf16 %v5433_v8  ;;  %v5444_v16 = vunpack.i.l.bf16 %v5443_v9  ;;  %v5445_v19 = vunpack.i.h.bf16 %v5443_v9  ;;  %v746_v61 = vpop.permute.xlu2 %745  ;;  %v905_v8 = vld [vmem:[%s8567_s4 + $0x78] sm:$0xff]  ;;  %v904_v9 = vld [vmem:[%s8567_s4 + $0x70] sm:$0xff] }
  0x9a   : > { %931 = vmatpush.msra.mxu2 %v905_v8  ;;  %v896_v8 = vld [vmem:[%s8567_s4 + $0x30] sm:$0xff] }
  0x9b   : > { %711 = vmatpush.msra.mxu1 %v5435_v11  ;;  %v656_v12 = vsel %vm655_vm0, %v5434_v10, %v5435_v11  ;;  %v640_v27 = vsel %vm639_vm2, %v5444_v16, %v5445_v19  ;;  %vm927_vm2 = vcmask 1045504  }
  0x9c   : > { %682 = vmatpush.msra.mxu0 %v656_v12  ;;  %v903_v12 = vld [vmem:[%s8567_s4 + $0x68] sm:$0xff]  ;;  %932 = vmatpush.msra.mxu2 %v904_v9 }
  0x9d   : > { %v895_v9 = vld [vmem:[%s8567_s4 + $0x28] sm:$0xff] }
  0x9e   : > { %933 = vmatpush.msra.mxu2 %v903_v12  ;;  %v909_v12 = vld [vmem:[%s8567_s4 + $0x98] sm:$0xff] }
  0xa0   : > { %v5438_v17 = vpop.permute.xlu0 %5437  ;;  %v5448_v18 = vpop.permute.xlu1 %5447 }
  0xa1   : > { %v5439_v20 = vunpack.i.l.bf16 %v5438_v17  ;;  %v5440_v21 = vunpack.i.h.bf16 %v5438_v17  ;;  %v5449_v22 = vunpack.i.l.bf16 %v5448_v18  ;;  %v5450_v23 = vunpack.i.h.bf16 %v5448_v18  ;;  %v751_v16 = vpop.permute.xlu2 %750 }
  0xa3   : > { %712 = vmatpush.msra.mxu1 %v5440_v21  ;;  %v648_v24 = vsel %vm647_vm1, %v5439_v20, %v5440_v21  ;;  %v632_v28 = vsel %vm631_vm3, %v5449_v22, %v5450_v23  ;;  %v902_v20 = vld [vmem:[%s8567_s4 + $0x60] sm:$0xff]  ;;  %vm914_vm3 = vcmask 506880  }
  0xa4   : > { %683 = vmatpush.msra.mxu0 %v648_v24  ;;  %934 = vmatpush.msra.mxu2 %v902_v20 }
  0xa5   : > { %713 = vmatpush.msra.mxu1 %v5445_v19 }
  0xa6   : > { %684 = vmatpush.msra.mxu0 %v640_v27  ;;  %v901_v27 = vld [vmem:[%s8567_s4 + $0x58] sm:$0xff] }
  0xa7   : > { %714 = vmatpush.msra.mxu1 %v5450_v23  ;;  %935 = vmatpush.msra.mxu2 %v901_v27 }
  0xa8   : > { %685 = vmatpush.msra.mxu0 %v632_v28  ;;  %v5463_v32 = vpop.permute.xlu0 %5462  ;;  %v5468_v34 = vpop.permute.xlu1 %5467 }
  0xa9   : > { %715 = vmatpush.msra.mxu1 %v5455_v26  ;;  %v5464_v35 = vunpack.i.l.bf16 %v5463_v32  ;;  %v5469_v36 = vunpack.i.l.bf16 %v5468_v34  ;;  %v5465_v37 = vunpack.i.h.bf16 %v5463_v32  ;;  %v5470_v38 = vunpack.i.h.bf16 %v5468_v34  ;;  %936 = vmatpush.msra.mxu2 %v900_v31  ;;  %v788_v44 = vpop.permute.xlu2 %787 }
  0xaa   : > { %686 = vmatpush.msra.mxu0 %v624_v33 }
  0xab   : > { %716 = vmatpush.msra.mxu1 %v5460_v30  ;;  %v608_v41 = vsel %vm607_vm6, %v5464_v35, %v5465_v37  ;;  %v600_v43 = vsel %vm599_vm7, %v5469_v36, %v5470_v38 }
  0xac   : > { %687 = vmatpush.msra.mxu0 %v616_v39 }
  0xad   : > { %717 = vmatpush.msra.mxu1 %v5465_v37 }
  0xae   : > { %688 = vmatpush.msra.mxu0 %v608_v41 }
  0xaf   : > { %718 = vmatpush.msra.mxu1 %v5470_v38 }
  0xb0   : > { %689 = vmatpush.msra.mxu0 %v600_v43  ;;  %v773_v52 = vpop.permute.xlu1 %772  ;;  %v741_v53 = vpop.permute.xlu0 %740 }
  0xb1   : > { %719 = vmatpush.msra.mxu1 %v5475_v42 }
  0xb2   : > { %690 = vmatpush.msra.mxu0 %v592_v45 }
  0xb3   : > { %720 = vmatpush.msra.mxu1 %v6440_v1 }
  0xb4   : > { %691 = vmatpush.msra.mxu0 %v6438_v0  ;;  %5241 = vmatmul.msk.f32.vlgmr.msra.gmra.mxu1 %vm663_vm9, %v659_v46 }
  0xb5   : > { %5237 = vmatmul.msk.f32.vlgmr.msra.gmra.mxu0 %vm663_vm9, %v659_v46 }
  0xb8   : > { %v778_v4 = vpop.permute.xlu1 %777  ;;  %v783_v24 = vpop.permute.xlu0 %782 }
  0xbc   : > { %5242 = vmatmul.msk.f32.gmra.mxu1 %vm663_vm9, %v660_v48 }
  0xbd   : > { %5238 = vmatmul.msk.f32.gmra.mxu0 %vm663_vm9, %v660_v48 }
  0xc0   : > { %v756_v37 = vpop.permute.xlu1 %755 }
  0xc4   : > { %5243 = vmatmul.msk.f32.gmra.mxu1 %vm663_vm9, %v661_v50 }
  0xc5   : > { %5239 = vmatmul.msk.f32.gmra.mxu0 %vm663_vm9, %v661_v50 }
  0xcc   : > { %5244 = vmatmul.msk.f32.gmra.mxu1 %vm663_vm9, %v662_v51 }
  0xcd   : > { %5240 = vmatmul.msk.f32.gmra.mxu0 %vm663_vm9, %v662_v51  ;;  %vm1509_vm9 = vcmask 1044480  }
 0x131   : > { %v722_v54 = vpop.f32.mrf.mxu1 }
 0x132   : > { %v759_v55 = vmul.f32 %v741_v53, %v722_v54  ;;  %v693_v56 = vpop.f32.mrf.mxu0 }
 0x133   : > { %v758_v57 = vmul.f32 %v741_v53, %v693_v56 }
 0x134   : > { %v791_v58 = vadd.f32 %v773_v52, %v759_v55 }
 0x135   : > { %v790_v59 = vadd.f32 %v773_v52, %v758_v57 }
 0x136   : > { %v807_v60 = vmin.f32 %v791_v58, 0.0  ;;  %vm799_vm10 = vcmp.gt.f32.partialorder %v791_v58, 0.0 }
 0x137   : > { %v806_v62 = vmin.f32 %v790_v59, 0.0  ;;  %vm798_vm11 = vcmp.gt.f32.partialorder %v790_v59, 0.0 }
 0x138   : > { %v816_v63 = vmul.f32 1.442695, %v807_v60 }
 0x139   : > { %v725_v0 = vpop.f32.mrf.mxu1  ;;  %v814_v1 = vmul.f32 1.442695, %v806_v62 }
 0x13a   : > { %v761_v2 = vmul.f32 %v746_v61, %v725_v0  ;;  %v696_v3 = vpop.f32.mrf.mxu0  ;;  %6109 = vpow2.f32 %v816_v63 }
 0x13b   : > { %v760_v5 = vmul.f32 %v746_v61, %v696_v3  ;;  %6111 = vpow2.f32 %v814_v1  ;;  %v898_v3 = vld [vmem:[%s8567_s4 + $0x40] sm:$0xff] }
 0x13c   : > { %v793_v6 = vadd.f32 %v778_v4, %v761_v2  ;;  %v899_v2 = vld [vmem:[%s8567_s4 + $0x48] sm:$0xff] }
 0x13d   : > { %v792_v7 = vadd.f32 %v778_v4, %v760_v5  ;;  %v913_v4 = vld [vmem:[%s8567_s4 + $0xb8] sm:$0x3f]  ;;  %937 = vmatpush.msra.mxu2 %v899_v2  ;;  %v912_v5 = vld [vmem:[%s8567_s4 + $0xb0] sm:$0xff] }
 0x13e   : > { %v809_v10 = vmin.f32 %v793_v6, 0.0  ;;  %vm801_vm12 = vcmp.gt.f32.partialorder %v793_v6, 0.0  ;;  %5253 = vmatpush.msk.msra.mxu3 %vm927_vm2, %v913_v4  ;;  %v1336_v2 = vld [vmem:[%s8523_s7 + $0x38] sm:$0xff]  ;;  %v1333_v4 = vld [vmem:[%s8523_s7 + $0x20] sm:$0xff] }
 0x13f   : > { %v808_v11 = vmin.f32 %v792_v7, 0.0  ;;  %vm800_vm13 = vcmp.gt.f32.partialorder %v792_v7, 0.0  ;;  %938 = vmatpush.msra.mxu2 %v898_v3  ;;  %v1280_v3 = vld [vmem:[%s8522_s6 + $0x38] sm:$0xff] }
 0x140   : > { %v6110_v13 = vpop.eup %6109  ;;  %v820_v14 = vmul.f32 1.442695, %v809_v10  ;;  %969 = vmatpush.msra.mxu3 %v912_v5  ;;  %v910_v10 = vld [vmem:[%s8567_s4 + $0xa0] sm:$0xff]  ;;  %v1279_v5 = vld [vmem:[%s8522_s6 + $0x30] sm:$0xff] }
 0x141   : > { %v6112_v15 = vpop.eup %6111  ;;  %v728_v17 = vpop.f32.mrf.mxu1  ;;  %v5246_v18 = vadd.f32 -1.0, %v6110_v13  ;;  %v818_v19 = vmul.f32 1.442695, %v808_v11  ;;  %v894_v11 = vld [vmem:[%s8567_s4 + $0x20] sm:$0xff]  ;;  %v893_v13 = vld [vmem:[%s8567_s4 + $0x18] sm:$0xff] }
 0x142   : > { %v763_v21 = vmul.f32 %v751_v16, %v728_v17  ;;  %v699_v22 = vpop.f32.mrf.mxu0  ;;  %v5245_v23 = vadd.f32 -1.0, %v6112_v15  ;;  %6113 = vpow2.f32 %v820_v14  ;;  %v908_v14 = vld [vmem:[%s8567_s4 + $0x90] sm:$0xff]  ;;  %v891_v17 = vld [vmem:[%s8567_s4 + $0x8] sm:$0xff] }
 0x143   : > { %v762_v25 = vmul.f32 %v751_v16, %v699_v22  ;;  %v6512_v26 = vsel %vm799_vm10, %v791_v58, %v5246_v18  ;;  %6115 = vpow2.f32 %v818_v19  ;;  %v892_v15 = vld [vmem:[%s8567_s4 + $0x10] sm:$0xff]  ;;  %v907_v16 = vld [vmem:[%s8567_s4 + $0x88] sm:$0xff]  ;;  %v906_v18 = vld [vmem:[%s8567_s4 + $0x80] sm:$0xff] }
 0x144   : > { %v795_v28 = vadd.f32 %v783_v24, %v763_v21  ;;  %856 = vrot.lane.b32.xlu1 %v6512_v26, %s8545_s0  ;;  %v6519_v29 = vsel %vm798_vm11, %v790_v59, %v5245_v23  ;;  %v890_v19 = vld [vmem:[%s8567_s4] sm:$0xff] }
 0x145   : > { %v794_v30 = vadd.f32 %v783_v24, %v762_v25  ;;  %854 = vrot.lane.b32.xlu0 %v6519_v29, %s8545_s0 }
 0x146   : > { %v811_v32 = vmin.f32 %v795_v28, 0.0  ;;  %vm803_vm14 = vcmp.gt.f32.partialorder %v795_v28, 0.0 }
 0x147   : > { %v810_v33 = vmin.f32 %v794_v30, 0.0  ;;  %vm802_vm15 = vcmp.gt.f32.partialorder %v794_v30, 0.0 }
 0x148   : > { %v6114_v34 = vpop.eup %6113  ;;  %v824_v35 = vmul.f32 1.442695, %v811_v32 }
 0x149   : > { %v6116_v36 = vpop.eup %6115  ;;  %v731_v38 = vpop.f32.mrf.mxu1  ;;  %v5248_v39 = vadd.f32 -1.0, %v6114_v34  ;;  %v822_v40 = vmul.f32 1.442695, %v810_v33 }
 0x14a   : > { %v765_v41 = vmul.f32 %v756_v37, %v731_v38  ;;  %v702_v42 = vpop.f32.mrf.mxu0  ;;  %v5247_v43 = vadd.f32 -1.0, %v6116_v36  ;;  %6117 = vpow2.f32 %v824_v35 }
 0x14b   : > { %v764_v45 = vmul.f32 %v756_v37, %v702_v42  ;;  %v6526_v46 = vsel %vm801_vm12, %v793_v6, %v5248_v39  ;;  %6119 = vpow2.f32 %v822_v40  ;;  %v897_v6 = vld [vmem:[%s8567_s4 + $0x38] sm:$0xff] }
 0x14c   : > { %v797_v47 = vadd.f32 %v788_v44, %v765_v41  ;;  %v6528_v48 = vsel %vm800_vm13, %v792_v7, %v5247_v43  ;;  %v911_v7 = vld [vmem:[%s8567_s4 + $0xa8] sm:$0xff]  ;;  %939 = vmatpush.msra.mxu2 %v897_v6 }
 0x14d   : > { %v796_v49 = vadd.f32 %v788_v44, %v764_v45  ;;  %860 = vrot.lane.b32.xlu0 %v6526_v46, %s8545_s0  ;;  %858 = vrot.lane.b32.xlu2 %v6528_v48, %s8545_s0 }
 0x14e   : > { %v813_v50 = vmin.f32 %v797_v47, 0.0  ;;  %vm805_vm0 = vcmp.gt.f32.partialorder %v797_v47, 0.0  ;;  %970 = vmatpush.msra.mxu3 %v911_v7  ;;  %940 = vmatpush.msra.mxu2 %v896_v8 }
 0x14f   : > { %v812_v51 = vmin.f32 %v796_v49, 0.0  ;;  %vm804_vm1 = vcmp.gt.f32.partialorder %v796_v49, 0.0 }
 0x150   : > { %v6118_v52 = vpop.eup %6117  ;;  %v828_v53 = vmul.f32 1.442695, %v813_v50  ;;  %941 = vmatpush.msra.mxu2 %v895_v9  ;;  %971 = vmatpush.msra.mxu3 %v910_v10 }
 0x151   : > { %v6120_v54 = vpop.eup %6119  ;;  %v5250_v55 = vadd.f32 -1.0, %v6118_v52  ;;  %v826_v56 = vmul.f32 1.442695, %v812_v51 }
 0x152   : > { %v5249_v57 = vadd.f32 -1.0, %v6120_v54  ;;  %6121 = vpow2.f32 %v828_v53  ;;  %942 = vmatpush.msra.mxu2 %v894_v11  ;;  %972 = vmatpush.msra.mxu3 %v909_v12  ;;  %v1329_v54 = vld [vmem:[%s8523_s7] sm:$0xff] }
 0x153   : > { %v6534_v58 = vsel %vm803_vm14, %v795_v28, %v5250_v55  ;;  %6123 = vpow2.f32 %v826_v56  ;;  %v1275_v55 = vld [vmem:[%s8522_s6 + $0x10] sm:$0xff]  ;;  %v1274_v56 = vld [vmem:[%s8522_s6 + $0x8] sm:$0xff]  ;;  %vm1484_vm14 = vcmask 695296  }
 0x154   : > { %v6536_v59 = vsel %vm802_vm15, %v794_v30, %v5249_v57  ;;  %943 = vmatpush.msra.mxu2 %v893_v13  ;;  %973 = vmatpush.msra.mxu3 %v908_v14  ;;  %v1332_v57 = vld [vmem:[%s8523_s7 + $0x18] sm:$0xff] }
 0x155   : > { %864 = vrot.lane.b32.xlu2 %v6534_v58, %s8545_s0  ;;  %862 = vrot.lane.b32.xlu1 %v6536_v59, %s8545_s0 }
 0x156   : > { %944 = vmatpush.msra.mxu2 %v892_v15  ;;  %974 = vmatpush.msra.mxu3 %v907_v16 }
 0x158   : > { %v6122_v60 = vpop.eup %6121  ;;  %945 = vmatpush.msra.mxu2 %v891_v17  ;;  %975 = vmatpush.msra.mxu3 %v906_v18 }
 0x159   : > { %v6124_v61 = vpop.eup %6123  ;;  %v5252_v62 = vadd.f32 -1.0, %v6122_v60  ;;  %v1278_v60 = vld [vmem:[%s8522_s6 + $0x28] sm:$0xff] }
 0x15a   : > { %v5251_v63 = vadd.f32 -1.0, %v6124_v61  ;;  %946 = vmatpush.msra.mxu2 %v890_v19  ;;  %v1277_v61 = vld [vmem:[%s8522_s6 + $0x20] sm:$0xff] }
 0x15b   : > { %v6542_v0 = vsel %vm805_vm0, %v797_v47, %v5252_v62  ;;  %v1330_v62 = vld [vmem:[%s8523_s7 + $0x8] sm:$0xff] }
 0x15c   : > { %v6544_v1 = vsel %vm804_vm1, %v796_v49, %v5251_v63  ;;  %v1335_v63 = vld [vmem:[%s8523_s7 + $0x30] sm:$0xff] }
 0x15d   : > { %868 = vrot.lane.b32.xlu1 %v6542_v0, %s8545_s0  ;;  %866 = vrot.lane.b32.xlu0 %v6544_v1, %s8545_s0  ;;  %s8570_s0 = smov 123  }
 0x1a7   : > { %v859_v25 = vpop.permute.xlu2 %858 }
 0x1b6   : > { %v857_v20 = vpop.permute.xlu1 %856 }
 0x1b7   : > { %v883_v21 = vmax.f32 %v6512_v26, %v857_v20  ;;  %v855_v22 = vpop.permute.xlu0 %854  ;;  %v865_v26 = vpop.permute.xlu2 %864 }
 0x1b8   : > { %v870_v23 = vsel %vm591_vm8, %v855_v22, %v857_v20  ;;  %v887_v33 = vmax.f32 %v6534_v58, %v865_v26  ;;  %v1331_v58 = vld [vmem:[%s8523_s7 + $0x10] sm:$0xff] }
 0x1b9   : > { %5254 = vmatmul.msk.f32.vlgmr.msra.gmra.mxu3 %vm914_vm3, %v883_v21  ;;  %v882_v24 = vmax.f32 %v6519_v29, %v870_v23 }
 0x1bb   : > { %947 = vmatmul.f32.vlgmr.msra.gmra.mxu2 %v882_v24 }
 0x1bf   : > { %v861_v27 = vpop.permute.xlu0 %860 }
 0x1c0   : > { %v885_v28 = vmax.f32 %v6526_v46, %v861_v27  ;;  %v871_v30 = vsel %vm591_vm8, %v859_v25, %v861_v27 }
 0x1c1   : > { %v884_v31 = vmax.f32 %v6528_v48, %v871_v30 }
 0x1c2   : > { %5255 = vmatmul.msk.f32.gmra.mxu3 %vm914_vm3, %v885_v28 }
 0x1c3   : > { %950 = vmatmul.f32.gmra.mxu2 %v884_v31 }
 0x1c7   : > { %v863_v32 = vpop.permute.xlu1 %862 }
 0x1c8   : > { %v872_v34 = vsel %vm591_vm8, %v863_v32, %v865_v26 }
 0x1c9   : > { %v886_v29 = vmax.f32 %v6536_v59, %v872_v34  ;;  %v1273_v59 = vld [vmem:[%s8522_s6] sm:$0xff] }
 0x1ca   : > { %5256 = vmatmul.msk.f32.gmra.mxu3 %vm914_vm3, %v887_v33 }
 0x1cb   : > { %953 = vmatmul.f32.gmra.mxu2 %v886_v29 }
 0x1cf   : > { %v869_v35 = vpop.permute.xlu1 %868  ;;  %v867_v36 = vpop.permute.xlu0 %866 }
 0x1d0   : > { %v889_v37 = vmax.f32 %v6542_v0, %v869_v35  ;;  %v873_v38 = vsel %vm591_vm8, %v867_v36, %v869_v35  ;;  %v1334_v0 = vld [vmem:[%s8523_s7 + $0x28] sm:$0xff] }
 0x1d1   : > { %v888_v39 = vmax.f32 %v6544_v1, %v873_v38  ;;  %v1276_v1 = vld [vmem:[%s8522_s6 + $0x18] sm:$0xff]  ;;  %v1101_v38 = vld [vmem:[%s8521_s5] sm:$0xff] }
 0x1d2   : > { %5257 = vmatmul.msk.f32.gmra.mxu3 %vm914_vm3, %v889_v37 }
 0x1d3   : > { %956 = vmatmul.f32.gmra.mxu2 %v888_v39 }
 0x23c   : > { %v977_v40 = vpop.f32.mrf.mxu3 }
 0x23e   : > { %v948_v41 = vpop.f32.mrf.mxu2 }
 0x23f   : > { %v6620_v44 = vadd.f32 %v977_v40, %v948_v41 }
 0x245   : > { %v980_v42 = vpop.f32.mrf.mxu3 }
 0x246   : > { %v951_v43 = vpop.f32.mrf.mxu2 }
 0x247   : > { %v6622_v45 = vadd.f32 %v980_v42, %v951_v43 }
 0x249   : > { %v5489_v46 = vpack.i.bf16 %v6620_v44, %v6622_v45 }
 0x24b   : > { %5490 = vrot.lane.b32.xlu1 %v5489_v46, %s8549_s26  ;;  %5480 = vrot.lane.b32.xlu0 %v5489_v46, %s8551_s25 }
 0x24d   : > { %v983_v47 = vpop.f32.mrf.mxu3 }
 0x24e   : > { %v954_v48 = vpop.f32.mrf.mxu2 }
 0x24f   : > { %v6629_v51 = vadd.f32 %v983_v47, %v954_v48 }
 0x253   : > { %5485 = vrot.lane.b32.xlu0 %v5489_v46, %s8568_s30 }
 0x255   : > { %v986_v49 = vpop.f32.mrf.mxu3 }
 0x256   : > { %v957_v50 = vpop.f32.mrf.mxu2 }
 0x257   : > { %v6631_v52 = vadd.f32 %v986_v49, %v957_v50 }
 0x259   : > { %v5529_v53 = vpack.i.bf16 %v6629_v51, %v6631_v52 }
 0x25b   : > { %5530 = vrot.lane.b32.xlu0 %v5529_v53, %s8569_s1  ;;  %5500 = vrot.lane.b32.xlu1 %v5529_v53, %s8568_s30 }
 0x25c   : > { %5495 = vrot.lane.b32.xlu2 %v5529_v53, %s8551_s25  ;;  %s8576_s25 = smov 126  }
 0x263   : > { %5535 = vrot.lane.b32.xlu0 %v5529_v53, %s8570_s0  ;;  %5505 = vrot.lane.b32.xlu1 %v5489_v46, %s8571_s29 }
 0x264   : > { %5510 = vrot.lane.b32.xlu2 %v5529_v53, %s8549_s26 }
 0x26b   : > { %5540 = vrot.lane.b32.xlu0 %v5489_v46, %s8572_s19  ;;  %5545 = vrot.lane.b32.xlu1 %v5529_v53, %s8572_s19 }
 0x26c   : > { %5515 = vrot.lane.b32.xlu2 %v5529_v53, %s8571_s29 }
 0x273   : > { %5560 = vrot.lane.b32.xlu0 %v5489_v46, %s8573_s21  ;;  %5550 = vrot.lane.b32.xlu1 %v5529_v53, %s8573_s21 }
 0x274   : > { %5520 = vrot.lane.b32.xlu2 %v5489_v46, %s8569_s1 }
 0x27b   : > { %1339 = vperm.xlu0 %5476, %v1329_v54   ;;  %5565 = vrot.lane.b32.xlu1 %v5489_v46, %s8574_s27 }
 0x27c   : > { %5525 = vrot.lane.b32.xlu2 %v5489_v46, %s8570_s0 }
 0x283   : > { %1293 = vperm.xlu0 %5476, %v1275_v55   ;;  %1288 = vperm.xlu1 %5477, %v1274_v56  }
 0x284   : > { %5555 = vrot.lane.b32.xlu2 %v5529_v53, %s8574_s27 }
 0x28b   : > { %1354 = vperm.xlu0 %5476, %v1332_v57   ;;  %1349 = vperm.xlu1 %5477, %v1331_v58  }
 0x28c   : > { %1283 = vperm.xlu2 %5478, %v1273_v59   ;;  %v1102_v59 = vld [vmem:[%s8521_s5 + $0x8] sm:$0xff] }
 0x293   : > { %1308 = vperm.xlu0 %5476, %v1278_v60   ;;  %1303 = vperm.xlu1 %5477, %v1277_v61   ;;  %v1107_v60 = vld [vmem:[%s8521_s5 + $0x30] sm:$0xff] }
 0x294   : > { %1344 = vperm.xlu2 %5478, %v1330_v62  }
 0x29b   : > { %1369 = vperm.xlu0 %5476, %v1335_v63   ;;  %1364 = vperm.xlu1 %5477, %v1334_v0   ;;  %v1103_v0 = vld [vmem:[%s8521_s5 + $0x10] sm:$0xff] }
 0x29c   : > { %1298 = vperm.xlu2 %5478, %v1276_v1   ;;  %v1105_v1 = vld [vmem:[%s8521_s5 + $0x20] sm:$0xff] }
 0x2a3   : > { %1374 = vperm.xlu0 %5476, %v1336_v2   ;;  %1318 = vperm.xlu1 %5477, %v1280_v3   ;;  %v1110_v2 = vld [vmem:[%s8521_s5 + $0x48] sm:$0xff] }
 0x2a4   : > { %1359 = vperm.xlu2 %5478, %v1333_v4   ;;  %v1106_v3 = vld [vmem:[%s8521_s5 + $0x28] sm:$0xff]  ;;  %v1108_v4 = vld [vmem:[%s8521_s5 + $0x38] sm:$0xff] }
 0x2ac   : > { %1313 = vperm.xlu2 %5478, %v1279_v5   ;;  %v1113_v5 = vld [vmem:[%s8521_s5 + $0x60] sm:$0xff] }
 0x2b6   : > { %v5496_v6 = vpop.permute.xlu2 %5495 }
 0x2b7   : > { %v5497_v7 = vunpack.i.l.bf16 %v5496_v6  ;;  %v5498_v8 = vunpack.i.h.bf16 %v5496_v6  ;;  %v1109_v6 = vld [vmem:[%s8521_s5 + $0x40] sm:$0xff] }
 0x2b9   : > { %1150 = vmatpush.msrb.mxu3 %v5497_v7  ;;  %v1111_v7 = vld [vmem:[%s8521_s5 + $0x50] sm:$0xff] }
 0x2bb   : > { %1151 = vmatpush.msrb.mxu3 %v5498_v8  ;;  %v1116_v8 = vld [vmem:[%s8521_s5 + $0x78] sm:$0xff] }
 0x2bd   : > { %v5481_v9 = vpop.permute.xlu0 %5480  ;;  %v5491_v14 = vpop.permute.xlu1 %5490 }
 0x2be   : > { %v5511_v10 = vpop.permute.xlu2 %5510  ;;  %v5482_v11 = vunpack.i.l.bf16 %v5481_v9  ;;  %v5483_v12 = vunpack.i.h.bf16 %v5481_v9  ;;  %v5492_v18 = vunpack.i.l.bf16 %v5491_v14  ;;  %v5493_v19 = vunpack.i.h.bf16 %v5491_v14  ;;  %v1112_v9 = vld [vmem:[%s8521_s5 + $0x58] sm:$0xff]  ;;  %v1122_v14 = vld [vmem:[%s8521_s5 + $0xa8] sm:$0xff] }
 0x2bf   : > { %v5512_v13 = vunpack.i.l.bf16 %v5511_v10  ;;  %v5513_v15 = vunpack.i.h.bf16 %v5511_v10  ;;  %v1114_v10 = vld [vmem:[%s8521_s5 + $0x68] sm:$0xff] }
 0x2c0   : > { %1152 = vmatpush.msrb.mxu3 %v5482_v11  ;;  %v1119_v11 = vld [vmem:[%s8521_s5 + $0x90] sm:$0xff] }
 0x2c2   : > { %1153 = vmatpush.msrb.mxu3 %v5483_v12  ;;  %v1115_v12 = vld [vmem:[%s8521_s5 + $0x70] sm:$0xff] }
 0x2c4   : > { %1154 = vmatpush.msrb.mxu3 %v5512_v13  ;;  %v1117_v13 = vld [vmem:[%s8521_s5 + $0x80] sm:$0xff] }
 0x2c5   : > { %v5486_v16 = vpop.permute.xlu0 %5485 }
 0x2c6   : > { %v5516_v17 = vpop.permute.xlu2 %5515  ;;  %1155 = vmatpush.msrb.mxu3 %v5513_v15  ;;  %v5487_v30 = vunpack.i.l.bf16 %v5486_v16  ;;  %v5488_v26 = vunpack.i.h.bf16 %v5486_v16  ;;  %v1118_v15 = vld [vmem:[%s8521_s5 + $0x88] sm:$0xff]  ;;  %v1120_v16 = vld [vmem:[%s8521_s5 + $0x98] sm:$0xff] }
 0x2c7   : > { %v5517_v34 = vunpack.i.l.bf16 %v5516_v17  ;;  %v5518_v29 = vunpack.i.h.bf16 %v5516_v17  ;;  %v1121_v17 = vld [vmem:[%s8521_s5 + $0xa0] sm:$0xff] }
 0x2c8   : > { %1156 = vmatpush.msrb.mxu3 %v5492_v18  ;;  %v1123_v18 = vld [vmem:[%s8521_s5 + $0xb0] sm:$0xff] }
 0x2ca   : > { %1157 = vmatpush.msrb.mxu3 %v5493_v19  ;;  %v1124_v19 = vld [vmem:[%s8521_s5 + $0xb8] sm:$0xff] }
 0x2cd   : > { %v5501_v20 = vpop.permute.xlu1 %5500  ;;  %v5531_v21 = vpop.permute.xlu0 %5530 }
 0x2ce   : > { %v5532_v22 = vunpack.i.l.bf16 %v5531_v21  ;;  %v5502_v23 = vunpack.i.l.bf16 %v5501_v20  ;;  %v5521_v24 = vpop.permute.xlu2 %5520  ;;  %v5533_v25 = vunpack.i.h.bf16 %v5531_v21  ;;  %v5503_v27 = vunpack.i.h.bf16 %v5501_v20 }
 0x2cf   : > { %v5522_v28 = vunpack.i.l.bf16 %v5521_v24  ;;  %v5523_v31 = vunpack.i.h.bf16 %v5521_v24 }
 0x2d0   : > { %1158 = vmatpush.msrb.mxu3 %v5532_v22  ;;  %1191 = vmatpush.msrb.mxu0 %v5502_v23 }
 0x2d2   : > { %1159 = vmatpush.msrb.mxu3 %v5533_v25  ;;  %1192 = vmatpush.msrb.mxu0 %v5503_v27 }
 0x2d4   : > { %1160 = vmatpush.msrb.mxu3 %v5522_v28  ;;  %1193 = vmatpush.msrb.mxu0 %v5487_v30 }
 0x2d5   : > { %v5506_v32 = vpop.permute.xlu1 %5505  ;;  %v5536_v33 = vpop.permute.xlu0 %5535 }
 0x2d6   : > { %1161 = vmatpush.msrb.mxu3 %v5523_v31  ;;  %1194 = vmatpush.msrb.mxu0 %v5488_v26  ;;  %v5526_v35 = vpop.permute.xlu2 %5525  ;;  %v5507_v36 = vunpack.i.l.bf16 %v5506_v32  ;;  %v5508_v37 = vunpack.i.h.bf16 %v5506_v32  ;;  %v5537_v41 = vunpack.i.l.bf16 %v5536_v33  ;;  %v5538_v43 = vunpack.i.h.bf16 %v5536_v33 }
 0x2d7   : > { %v5528_v49 = vunpack.i.h.bf16 %v5526_v35 }
 0x2d8   : > { %1162 = vmatpush.msrb.mxu3 %v6631_v52  ;;  %1195 = vmatpush.msrb.mxu0 %v5517_v34 }
 0x2da   : > { %1163 = vmatpush.msrb.mxu3 %v6629_v51  ;;  %1196 = vmatpush.msrb.mxu0 %v5518_v29 }
 0x2dc   : > { %1164 = vmatpush.msrb.mxu3 %v6622_v45  ;;  %1197 = vmatpush.msrb.mxu0 %v5507_v36  ;;  %v5527_v45 = vunpack.i.l.bf16 %v5526_v35 }
 0x2dd   : > { %v5546_v39 = vpop.permute.xlu1 %5545  ;;  %v5541_v40 = vpop.permute.xlu0 %5540 }
 0x2de   : > { %1165 = vmatpush.msrb.mxu3 %v6620_v44  ;;  %1198 = vmatpush.msrb.mxu0 %v5508_v37  ;;  %v5547_v42 = vunpack.i.l.bf16 %v5546_v39  ;;  %v5548_v46 = vunpack.i.h.bf16 %v5546_v39  ;;  %v5542_v47 = vunpack.i.l.bf16 %v5541_v40  ;;  %v5556_v48 = vpop.permute.xlu2 %5555  ;;  %v5543_v50 = vunpack.i.h.bf16 %v5541_v40  ;;  %v1104_v44 = vld [vmem:[%s8521_s5 + $0x18] sm:$0xff] }
 0x2df   : > { %1166 = vmatmul.f32.vlgmr.msrb.gmra.mxu3 %v1101_v38  ;;  %v5557_v53 = vunpack.i.l.bf16 %v5556_v48  ;;  %v5558_v56 = vunpack.i.h.bf16 %v5556_v48 }
 0x2e0   : > { %1199 = vmatpush.msrb.mxu0 %v5537_v41  ;;  %1240 = vmatpush.msrb.mxu1 %v5547_v42 }
 0x2e2   : > { %1200 = vmatpush.msrb.mxu0 %v5538_v43  ;;  %1241 = vmatpush.msrb.mxu1 %v5548_v46 }
 0x2e4   : > { %1201 = vmatpush.msrb.mxu0 %v5527_v45  ;;  %1242 = vmatpush.msrb.mxu1 %v5542_v47 }
 0x2e5   : > { %v5551_v51 = vpop.permute.xlu1 %5550  ;;  %v5561_v54 = vpop.permute.xlu0 %5560 }
 0x2e6   : > { %1202 = vmatpush.msrb.mxu0 %v5528_v49  ;;  %1243 = vmatpush.msrb.mxu1 %v5543_v50  ;;  %v5552_v52 = vunpack.i.l.bf16 %v5551_v51  ;;  %v5553_v55 = vunpack.i.h.bf16 %v5551_v51  ;;  %v5562_v57 = vunpack.i.l.bf16 %v5561_v54  ;;  %v5563_v58 = vunpack.i.h.bf16 %v5561_v54  ;;  %v1284_v27 = vpop.permute.xlu2 %1283 }
 0x2e7   : > { %1169 = vmatmul.f32.gmra.mxu3 %v1104_v44 }
 0x2e8   : > { %1203 = vmatpush.msrb.mxu0 %v5552_v52  ;;  %1244 = vmatpush.msrb.mxu1 %v5557_v53 }
 0x2ea   : > { %1204 = vmatpush.msrb.mxu0 %v5553_v55  ;;  %1245 = vmatpush.msrb.mxu1 %v5558_v56 }
 0x2ec   : > { %1205 = vmatpush.msrb.mxu0 %v5562_v57 }
 0x2ed   : > { %v5566_v61 = vpop.permute.xlu1 %5565  ;;  %v1340_v31 = vpop.permute.xlu0 %1339 }
 0x2ee   : > { %1206 = vmatpush.msrb.mxu0 %v5563_v58  ;;  %v5567_v62 = vunpack.i.l.bf16 %v5566_v61  ;;  %v5568_v63 = vunpack.i.h.bf16 %v5566_v61  ;;  %v1345_v40 = vpop.permute.xlu2 %1344 }
 0x2ef   : > { %1207 = vmatmul.f32.vlgmr.msrb.gmra.mxu0 %v1102_v59  ;;  %1172 = vmatmul.f32.gmra.mxu3 %v1107_v60 }
 0x2f0   : > { %1246 = vmatpush.msrb.mxu1 %v5567_v62 }
 0x2f2   : > { %1247 = vmatpush.msrb.mxu1 %v5568_v63 }
 0x2f3   : > { %5258 = vmatmul.msk.f32.vlgmr.msrb.gmra.mxu1 %vm1125_vm4, %v1103_v0 }
 0x2f5   : > { %v1289_v35 = vpop.permute.xlu1 %1288  ;;  %v1294_v50 = vpop.permute.xlu0 %1293 }
 0x2f6   : > { %v1299_v63 = vpop.permute.xlu2 %1298 }
 0x2f7   : > { %1210 = vmatmul.f32.gmra.mxu0 %v1105_v1  ;;  %1175 = vmatmul.f32.gmra.mxu3 %v1110_v2 }
 0x2fb   : > { %5259 = vmatmul.msk.f32.gmra.mxu1 %vm1125_vm4, %v1106_v3 }
 0x2fd   : > { %v1350_v51 = vpop.permute.xlu1 %1349  ;;  %v1355_v2 = vpop.permute.xlu0 %1354 }
 0x2ff   : > { %1213 = vmatmul.f32.gmra.mxu0 %v1108_v4  ;;  %1178 = vmatmul.f32.gmra.mxu3 %v1113_v5 }
 0x303   : > { %5260 = vmatmul.msk.f32.gmra.mxu1 %vm1125_vm4, %v1109_v6 }
 0x307   : > { %1216 = vmatmul.f32.gmra.mxu0 %v1111_v7  ;;  %1181 = vmatmul.f32.gmra.mxu3 %v1116_v8 }
 0x30b   : > { %5261 = vmatmul.msk.f32.gmra.mxu1 %vm1125_vm4, %v1112_v9 }
 0x30f   : > { %1219 = vmatmul.f32.gmra.mxu0 %v1114_v10  ;;  %1184 = vmatmul.f32.gmra.mxu3 %v1119_v11 }
 0x313   : > { %5262 = vmatmul.msk.f32.gmra.mxu1 %vm1125_vm4, %v1115_v12 }
 0x317   : > { %1222 = vmatmul.f32.gmra.mxu0 %v1117_v13  ;;  %1187 = vmatmul.f32.gmra.mxu3 %v1122_v14  ;;  %v1304_v13 = vpop.permute.xlu1 %1303 }
 0x31b   : > { %5263 = vmatmul.msk.f32.gmra.mxu1 %vm1125_vm4, %v1118_v15 }
 0x31f   : > { %1225 = vmatmul.f32.gmra.mxu0 %v1120_v16  ;;  %v1360_v16 = vpop.permute.xlu2 %1359 }
 0x323   : > { %5264 = vmatmul.msk.f32.gmra.mxu1 %vm1125_vm4, %v1121_v17 }
 0x327   : > { %1228 = vmatmul.f32.gmra.mxu0 %v1123_v18 }
 0x32b   : > { %5265 = vmatmul.msk.f32.gmra.mxu1 %vm1125_vm4, %v1124_v19 }
 0x362   : > { %v1167_v20 = vpop.f32.mrf.mxu3 }
 0x36a   : > { %v1170_v21 = vpop.f32.mrf.mxu3 }
 0x36c   : > { %v1208_v22 = vpop.f32.mrf.mxu0 }
 0x36d   : > { %v1209_v23 = vadd.f32 %v1208_v22, %v1167_v20 }
 0x370   : > { %v1249_v24 = vpop.f32.mrf.mxu1 }
 0x371   : > { %v1250_v25 = vadd.f32 %v1249_v24, %v1209_v23 }
 0x372   : > { %v1173_v28 = vpop.f32.mrf.mxu3 }
 0x373   : > { %v1321_v30 = vmul.f32 %v1284_v27, %v1250_v25 }
 0x374   : > { %v1211_v26 = vpop.f32.mrf.mxu0 }
 0x375   : > { %v1377_v32 = vadd.f32 %v1340_v31, %v1321_v30  ;;  %v1212_v33 = vadd.f32 %v1211_v26, %v1170_v21  ;;  %v1309_v21 = vpop.permute.xlu0 %1308  ;;  %v1365_v26 = vpop.permute.xlu1 %1364 }
 0x377   : > { %v1393_v34 = vmin.f32 %v1377_v32, 0.0  ;;  %vm1385_vm5 = vcmp.gt.f32.partialorder %v1377_v32, 0.0 }
 0x378   : > { %v1252_v29 = vpop.f32.mrf.mxu1 }
 0x379   : > { %v1253_v36 = vadd.f32 %v1252_v29, %v1212_v33  ;;  %v1401_v37 = vmul.f32 1.442695, %v1393_v34 }
 0x37a   : > { %v1176_v38 = vpop.f32.mrf.mxu3 }
 0x37b   : > { %v1322_v39 = vmul.f32 %v1289_v35, %v1253_v36  ;;  %6125 = vpow2.f32 %v1401_v37  ;;  %v1483_v35 = vld [vmem:[%s8524_s8 + $0x50] sm:$0x1f]  ;;  %v1482_v36 = vld [vmem:[%s8524_s8 + $0x48] sm:$0xff] }
 0x37c   : > { %v1214_v41 = vpop.f32.mrf.mxu0  ;;  %5274 = vmatpush.msk.msrb.mxu2 %vm1509_vm9, %v1483_v35 }
 0x37d   : > { %v1378_v42 = vadd.f32 %v1345_v40, %v1322_v39  ;;  %v1215_v43 = vadd.f32 %v1214_v41, %v1173_v28  ;;  %v1314_v41 = vpop.permute.xlu2 %1313 }
 0x37e   : > { %1519 = vmatpush.msrb.mxu2 %v1482_v36 }
 0x37f   : > { %v1394_v46 = vmin.f32 %v1378_v42, 0.0  ;;  %vm1386_vm6 = vcmp.gt.f32.partialorder %v1378_v42, 0.0 }
 0x380   : > { %v1255_v45 = vpop.f32.mrf.mxu1 }
 0x381   : > { %v6126_v47 = vpop.eup %6125  ;;  %v1256_v48 = vadd.f32 %v1255_v45, %v1215_v43  ;;  %v1403_v49 = vmul.f32 1.442695, %v1394_v46  ;;  %v1480_v46 = vld [vmem:[%s8524_s8 + $0x38] sm:$0xff]  ;;  %v1370_v45 = vpop.permute.xlu0 %1369 }
 0x382   : > { %v5266_v44 = vadd.f32 -1.0, %v6126_v47  ;;  %v1179_v55 = vpop.f32.mrf.mxu3 }
 0x383   : > { %v1323_v52 = vmul.f32 %v1294_v50, %v1256_v48  ;;  %6127 = vpow2.f32 %v1403_v49  ;;  %v1479_v50 = vld [vmem:[%s8524_s8 + $0x30] sm:$0xff] }
 0x384   : > { %v6782_v53 = vsel %vm1385_vm5, %v1377_v32, %v5266_v44  ;;  %v1217_v54 = vpop.f32.mrf.mxu0 }
 0x385   : > { %v1379_v56 = vadd.f32 %v1350_v51, %v1323_v52  ;;  %1441 = vrot.lane.b32.xlu2 %v6782_v53, %s8569_s1  ;;  %v1218_v57 = vadd.f32 %v1217_v54, %v1176_v38  ;;  %v1481_v38 = vld [vmem:[%s8524_s8 + $0x40] sm:$0xff] }
 0x386   : > { %1520 = vmatpush.msrb.mxu2 %v1481_v38 }
 0x387   : > { %v1395_v58 = vmin.f32 %v1379_v56, 0.0  ;;  %vm1387_vm7 = vcmp.gt.f32.partialorder %v1379_v56, 0.0 }
 0x388   : > { %v1258_v59 = vpop.f32.mrf.mxu1  ;;  %1521 = vmatpush.msrb.mxu2 %v1480_v46  ;;  %v2297_v46 = vld [vmem:[%s8527_s11 + $0x10] sm:$0xff] }
 0x389   : > { %v6128_v60 = vpop.eup %6127  ;;  %v1259_v61 = vadd.f32 %v1258_v59, %v1218_v57  ;;  %v1405_v62 = vmul.f32 1.442695, %v1395_v58  ;;  %v1477_v57 = vld [vmem:[%s8524_s8 + $0x20] sm:$0xff] }
 0x38a   : > { %v5267_v0 = vadd.f32 -1.0, %v6128_v60  ;;  %v1182_v7 = vpop.f32.mrf.mxu3  ;;  %1522 = vmatpush.msrb.mxu2 %v1479_v50 }
 0x38b   : > { %v1324_v1 = vmul.f32 %v1299_v63, %v1259_v61  ;;  %6129 = vpow2.f32 %v1405_v62  ;;  %v1476_v62 = vld [vmem:[%s8524_s8 + $0x18] sm:$0xff]  ;;  %v1319_v63 = vpop.permute.xlu1 %1318 }
 0x38c   : > { %v6786_v3 = vsel %vm1386_vm6, %v1378_v42, %v5267_v0  ;;  %v1220_v4 = vpop.f32.mrf.mxu0  ;;  %vm2637_vm6 = vcmask 1040384  }
 0x38d   : > { %v1380_v5 = vadd.f32 %v1355_v2, %v1324_v1  ;;  %1443 = vrot.lane.b32.xlu1 %v6786_v3, %s8569_s1  ;;  %v1221_v6 = vadd.f32 %v1220_v4, %v1179_v55  ;;  %v1478_v55 = vld [vmem:[%s8524_s8 + $0x28] sm:$0xff]  ;;  %v1475_v2 = vld [vmem:[%s8524_s8 + $0x10] sm:$0xff]  ;;  %v1375_v4 = vpop.permute.xlu0 %1374 }
 0x38e   : > { %1523 = vmatpush.msrb.mxu2 %v1478_v55  ;;  %v2183_v55 = vld [vmem:[%s8526_s10] sm:$0xff] }
 0x38f   : > { %v1396_v8 = vmin.f32 %v1380_v5, 0.0  ;;  %vm1388_vm8 = vcmp.gt.f32.partialorder %v1380_v5, 0.0 }
 0x390   : > { %v1261_v9 = vpop.f32.mrf.mxu1  ;;  %1524 = vmatpush.msrb.mxu2 %v1477_v57 }
 0x391   : > { %v6130_v10 = vpop.eup %6129  ;;  %v1262_v11 = vadd.f32 %v1261_v9, %v1221_v6  ;;  %v1407_v12 = vmul.f32 1.442695, %v1396_v8 }
 0x392   : > { %v5268_v14 = vadd.f32 -1.0, %v6130_v10  ;;  %v1185_v24 = vpop.f32.mrf.mxu3  ;;  %1525 = vmatpush.msrb.mxu2 %v1476_v62  ;;  %v2188_v62 = vld [vmem:[%s8526_s10 + $0x28] sm:$0xff] }
 0x393   : > { %v1325_v15 = vmul.f32 %v1304_v13, %v1262_v11  ;;  %6131 = vpow2.f32 %v1407_v12 }
 0x394   : > { %v6790_v17 = vsel %vm1387_vm7, %v1379_v56, %v5268_v14  ;;  %v1223_v18 = vpop.f32.mrf.mxu0  ;;  %1526 = vmatpush.msrb.mxu2 %v1475_v2 }
 0x395   : > { %v1381_v19 = vadd.f32 %v1360_v16, %v1325_v15  ;;  %1445 = vrot.lane.b32.xlu2 %v6790_v17, %s8569_s1  ;;  %v1224_v20 = vadd.f32 %v1223_v18, %v1182_v7  ;;  %v1474_v7 = vld [vmem:[%s8524_s8 + $0x8] sm:$0xff]  ;;  %v1473_v16 = vld [vmem:[%s8524_s8] sm:$0xff] }
 0x396   : > { %1527 = vmatpush.msrb.mxu2 %v1474_v7 }
 0x397   : > { %v1397_v22 = vmin.f32 %v1381_v19, 0.0  ;;  %vm1389_vm10 = vcmp.gt.f32.partialorder %v1381_v19, 0.0 }
 0x398   : > { %v1264_v23 = vpop.f32.mrf.mxu1  ;;  %1528 = vmatpush.msrb.mxu2 %v1473_v16  ;;  %v2299_v16 = vld [vmem:[%s8527_s11 + $0x20] sm:$0xff] }
 0x399   : > { %v6132_v25 = vpop.eup %6131  ;;  %v1265_v27 = vadd.f32 %v1264_v23, %v1224_v20  ;;  %v1409_v28 = vmul.f32 1.442695, %v1397_v22 }
 0x39a   : > { %v5269_v30 = vadd.f32 -1.0, %v6132_v25  ;;  %v1188_v48 = vpop.f32.mrf.mxu3 }
 0x39b   : > { %v1326_v31 = vmul.f32 %v1309_v21, %v1265_v27  ;;  %6133 = vpow2.f32 %v1409_v28 }
 0x39c   : > { %v6794_v32 = vsel %vm1388_vm8, %v1380_v5, %v5269_v30  ;;  %v1226_v33 = vpop.f32.mrf.mxu0 }
 0x39d   : > { %v1382_v34 = vadd.f32 %v1365_v26, %v1326_v31  ;;  %1447 = vrot.lane.b32.xlu0 %v6794_v32, %s8569_s1  ;;  %v1227_v29 = vadd.f32 %v1226_v33, %v1185_v24 }
 0x39f   : > { %v1398_v37 = vmin.f32 %v1382_v34, 0.0  ;;  %vm1390_vm11 = vcmp.gt.f32.partialorder %v1382_v34, 0.0 }
 0x3a0   : > { %v1267_v39 = vpop.f32.mrf.mxu1 }
 0x3a1   : > { %v6134_v40 = vpop.eup %6133  ;;  %v1268_v42 = vadd.f32 %v1267_v39, %v1227_v29  ;;  %v1411_v43 = vmul.f32 1.442695, %v1398_v37 }
 0x3a2   : > { %v5270_v47 = vadd.f32 -1.0, %v6134_v40 }
 0x3a3   : > { %v1327_v49 = vmul.f32 %v1314_v41, %v1268_v42  ;;  %6135 = vpow2.f32 %v1411_v43  ;;  %v2184_v43 = vld [vmem:[%s8526_s10 + $0x8] sm:$0xff] }
 0x3a4   : > { %v1429_v44 = vsel %vm1389_vm10, %v1381_v19, %v5270_v47  ;;  %v1229_v51 = vpop.f32.mrf.mxu0  ;;  %v2187_v47 = vld [vmem:[%s8526_s10 + $0x20] sm:$0xff] }
 0x3a5   : > { %v1383_v52 = vadd.f32 %v1370_v45, %v1327_v49  ;;  %1449 = vrot.lane.b32.xlu1 %v1429_v44, %s8569_s1  ;;  %v1230_v54 = vadd.f32 %v1229_v51, %v1188_v48  ;;  %v2295_v45 = vld [vmem:[%s8527_s11] sm:$0xff]  ;;  %v2185_v48 = vld [vmem:[%s8526_s10 + $0x10] sm:$0xff] }
 0x3a7   : > { %v1399_v56 = vmin.f32 %v1383_v52, 0.0  ;;  %vm1391_vm12 = vcmp.gt.f32.partialorder %v1383_v52, 0.0 }
 0x3a8   : > { %v1270_v58 = vpop.f32.mrf.mxu1 }
 0x3a9   : > { %v6136_v59 = vpop.eup %6135  ;;  %v1271_v60 = vadd.f32 %v1270_v58, %v1230_v54  ;;  %v1413_v61 = vmul.f32 1.442695, %v1399_v56  ;;  %v2298_v54 = vld [vmem:[%s8527_s11 + $0x18] sm:$0xff] }
 0x3aa   : > { %v5271_v0 = vadd.f32 -1.0, %v6136_v59 }
 0x3ab   : > { %v1328_v1 = vmul.f32 %v1319_v63, %v1271_v60  ;;  %6137 = vpow2.f32 %v1413_v61  ;;  %v2190_v61 = vld [vmem:[%s8526_s10 + $0x38] sm:$0xff]  ;;  %v2296_v63 = vld [vmem:[%s8527_s11 + $0x8] sm:$0xff] }
 0x3ac   : > { %v1430_v5 = vsel %vm1390_vm11, %v1382_v34, %v5271_v0 }
 0x3ad   : > { %v1384_v6 = vadd.f32 %v1375_v4, %v1328_v1  ;;  %1451 = vrot.lane.b32.xlu2 %v1430_v5, %s8569_s1 }
 0x3af   : > { %v1400_v8 = vmin.f32 %v1384_v6, 0.0  ;;  %vm1392_vm13 = vcmp.gt.f32.partialorder %v1384_v6, 0.0 }
 0x3b1   : > { %v6138_v9 = vpop.eup %6137  ;;  %v1415_v10 = vmul.f32 1.442695, %v1400_v8  ;;  %v2191_v8 = vld [vmem:[%s8526_s10 + $0x40] sm:$0xff] }
 0x3b2   : > { %v5272_v11 = vadd.f32 -1.0, %v6138_v9  ;;  %v2301_v9 = vld [vmem:[%s8527_s11 + $0x30] sm:$0xff] }
 0x3b3   : > { %6139 = vpow2.f32 %v1415_v10  ;;  %v2186_v10 = vld [vmem:[%s8526_s10 + $0x18] sm:$0xff] }
 0x3b4   : > { %v1431_v12 = vsel %vm1391_vm12, %v1383_v52, %v5272_v11  ;;  %v2300_v52 = vld [vmem:[%s8527_s11 + $0x28] sm:$0xff]  ;;  %vm2588_vm12 = vcmask 269312  }
 0x3b5   : > { %1453 = vrot.lane.b32.xlu0 %v1431_v12, %s8569_s1 }
 0x3b9   : > { %v6140_v13 = vpop.eup %6139 }
 0x3ba   : > { %v5273_v14 = vadd.f32 -1.0, %v6140_v13 }
 0x3bc   : > { %v1432_v15 = vsel %vm1392_vm13, %v1384_v6, %v5273_v14  ;;  %v2192_v14 = vld [vmem:[%s8526_s10 + $0x48] sm:$0xff] }
 0x3bd   : > { %1455 = vrot.lane.b32.xlu1 %v1432_v15, %s8569_s1 }
 0x3df   : > { %v1442_v18 = vpop.permute.xlu2 %1441 }
 0x3e0   : > { %v1465_v19 = vmax.f32 %v6782_v53, %v1442_v18 }
 0x3e2   : > { %5275 = vmatmul.msk.f32.vlgmr.msrb.gmra.mxu2 %vm1484_vm14, %v1465_v19 }
 0x3ef   : > { %v1446_v22 = vpop.permute.xlu2 %1445 }
 0x3f0   : > { %v1467_v23 = vmax.f32 %v6790_v17, %v1446_v22  ;;  %v2303_v22 = vld [vmem:[%s8527_s11 + $0x40] sm:$0xff] }
 0x3ff   : > { %v1444_v20 = vpop.permute.xlu1 %1443 }
 0x400   : > { %v1466_v21 = vmax.f32 %v6786_v3, %v1444_v20 }
 0x402   : > { %5276 = vmatmul.msk.f32.gmra.mxu2 %vm1484_vm14, %v1466_v21  ;;  %v2193_v21 = vld [vmem:[%s8526_s10 + $0x50] sm:$0xff] }
 0x407   : > { %v1452_v53 = vpop.permute.xlu2 %1451 }
 0x408   : > { %v1470_v30 = vmax.f32 %v1430_v5, %v1452_v53  ;;  %v2194_v53 = vld [vmem:[%s8526_s10 + $0x58] sm:$0xff] }
 0x40a   : > { %5277 = vmatmul.msk.f32.gmra.mxu2 %vm1484_vm14, %v1467_v23  ;;  %v2189_v23 = vld [vmem:[%s8526_s10 + $0x30] sm:$0xff] }
 0x40f   : > { %v1448_v24 = vpop.permute.xlu0 %1447 }
 0x410   : > { %v1468_v25 = vmax.f32 %v6794_v32, %v1448_v24  ;;  %v1778_v24 = vld [vmem:[#allocation2] sm:$0xff] }
 0x412   : > { %5278 = vmatmul.msk.f32.gmra.mxu2 %vm1484_vm14, %v1468_v25 }
 0x417   : > { %v1450_v27 = vpop.permute.xlu1 %1449 }
 0x418   : > { %v1469_v28 = vmax.f32 %v1429_v44, %v1450_v27 }
 0x41a   : > { %5279 = vmatmul.msk.f32.gmra.mxu2 %vm1484_vm14, %v1469_v28 }
 0x422   : > { %5280 = vmatmul.msk.f32.gmra.mxu2 %vm1484_vm14, %v1470_v30  ;;  %v2304_v30 = vld [vmem:[%s8527_s11 + $0x48] sm:$0xff] }
 0x427   : > { %v1454_v3 = vpop.permute.xlu0 %1453 }
 0x428   : > { %v1471_v31 = vmax.f32 %v1431_v12, %v1454_v3  ;;  %v1783_v3 = vld [vmem:[#allocation2 + $0x28] sm:$0xff] }
 0x42a   : > { %5281 = vmatmul.msk.f32.gmra.mxu2 %vm1484_vm14, %v1471_v31 }
 0x42f   : > { %v1456_v17 = vpop.permute.xlu1 %1455 }
 0x430   : > { %v1472_v26 = vmax.f32 %v1432_v15, %v1456_v17  ;;  %v2302_v15 = vld [vmem:[%s8527_s11 + $0x38] sm:$0xff] }
 0x432   : > { %5282 = vmatmul.msk.f32.gmra.mxu2 %vm1484_vm14, %v1472_v26 }
 0x465   : > { %v6847_v33 = vpop.f32.mrf.mxu2 }
 0x485   : > { %v6849_v32 = vpop.f32.mrf.mxu2 }
 0x486   : > { %v5629_v42 = vpack.i.bf16 %v6847_v33, %v6849_v32 }
 0x48d   : > { %v6851_v34 = vpop.f32.mrf.mxu2 }
 0x495   : > { %v6853_v29 = vpop.f32.mrf.mxu2 }
 0x496   : > { %v5579_v35 = vpack.i.bf16 %v6851_v34, %v6853_v29 }
 0x498   : > { %5580 = vrot.lane.b32.xlu1 %v5579_v35, %s8569_s1 }
 0x49d   : > { %v6858_v36 = vpop.f32.mrf.mxu2 }
 0x4a5   : > { %v6860_v37 = vpop.f32.mrf.mxu2 }
 0x4a6   : > { %v5574_v38 = vpack.i.bf16 %v6858_v36, %v6860_v37 }
 0x4a8   : > { %5575 = vrot.lane.b32.xlu0 %v5574_v38, %s8569_s1  ;;  %5590 = vrot.lane.b32.xlu1 %v5574_v38, %s8568_s30 }
 0x4ad   : > { %v6866_v39 = vpop.f32.mrf.mxu2 }
 0x4b0   : > { %5600 = vrot.lane.b32.xlu0 %v5574_v38, %s8572_s19  ;;  %5605 = vrot.lane.b32.xlu1 %v5574_v38, %s8570_s0 }
 0x4b5   : > { %v6870_v40 = vpop.f32.mrf.mxu2 }
 0x4b6   : > { %v5569_v41 = vpack.i.bf16 %v6866_v39, %v6870_v40 }
 0x4b8   : > { %5615 = vrot.lane.b32.xlu0 %v5579_v35, %s8575_s2  ;;  %5620 = vrot.lane.b32.xlu1 %v5579_v35, %s8572_s19 }
 0x4b9   : > { %5570 = vrot.lane.b32.xlu2 %v5569_v41, %s8569_s1 }
 0x4c0   : > { %5630 = vrot.lane.b32.xlu0 %v5629_v42, %s8568_s30  ;;  %5635 = vrot.lane.b32.xlu1 %v5629_v42, %s8575_s2 }
 0x4c1   : > { %5585 = vrot.lane.b32.xlu2 %v5629_v42, %s8569_s1 }
 0x4c8   : > { %5645 = vrot.lane.b32.xlu0 %v5629_v42, %s8570_s0  ;;  %5660 = vrot.lane.b32.xlu1 %v5574_v38, %s8574_s27 }
 0x4c9   : > { %5595 = vrot.lane.b32.xlu2 %v5574_v38, %s8575_s2 }
 0x4d0   : > { %5655 = vrot.lane.b32.xlu0 %v5574_v38, %s8576_s25  ;;  %5670 = vrot.lane.b32.xlu1 %v5569_v41, %s8575_s2 }
 0x4d1   : > { %5610 = vrot.lane.b32.xlu2 %v5579_v35, %s8568_s30 }
 0x4d8   : > { %5695 = vrot.lane.b32.xlu1 %v5579_v35, %s8576_s25  ;;  %5665 = vrot.lane.b32.xlu0 %v5569_v41, %s8568_s30 }
 0x4d9   : > { %5625 = vrot.lane.b32.xlu2 %v5579_v35, %s8570_s0 }
 0x4e0   : > { %5700 = vrot.lane.b32.xlu1 %v5569_v41, %s8571_s29  ;;  %5685 = vrot.lane.b32.xlu0 %v5569_v41, %s8570_s0 }
 0x4e1   : > { %5640 = vrot.lane.b32.xlu2 %v5629_v42, %s8572_s19 }
 0x4e8   : > { %5725 = vrot.lane.b32.xlu1 %v5569_v41, %s8573_s21  ;;  %5690 = vrot.lane.b32.xlu0 %v5579_v35, %s8571_s29 }
 0x4e9   : > { %5650 = vrot.lane.b32.xlu2 %v5574_v38, %s8571_s29 }
 0x4f0   : > { %5730 = vrot.lane.b32.xlu1 %v5629_v42, %s8571_s29  ;;  %5715 = vrot.lane.b32.xlu0 %v5569_v41, %s8574_s27 }
 0x4f1   : > { %5675 = vrot.lane.b32.xlu2 %v5569_v41, %s8572_s19 }
 0x4f8   : > { %5745 = vrot.lane.b32.xlu1 %v5629_v42, %s8573_s21  ;;  %5720 = vrot.lane.b32.xlu0 %v5579_v35, %s8573_s21 }
 0x4f9   : > { %5680 = vrot.lane.b32.xlu2 %v5574_v38, %s8573_s21 }
 0x500   : > { %2206 = vperm.xlu1 %5477, %v2184_v43   ;;  %5740 = vrot.lane.b32.xlu0 %v5629_v42, %s8574_s27 }
 0x501   : > { %5705 = vrot.lane.b32.xlu2 %v5569_v41, %s8576_s25 }
 0x508   : > { %2323 = vperm.xlu1 %5477, %v2297_v46   ;;  %2313 = vperm.xlu0 %5476, %v2295_v45  }
 0x509   : > { %5710 = vrot.lane.b32.xlu2 %v5579_v35, %s8574_s27  ;;  %v2305_v35 = vld [vmem:[%s8527_s11 + $0x50] sm:$0xff] }
 0x50a   : > { %v5581_v49 = vpop.permute.xlu1 %5580 }
 0x50b   : > { %v5582_v0 = vunpack.i.l.bf16 %v5581_v49  ;;  %v5583_v1 = vunpack.i.h.bf16 %v5581_v49 }
 0x510   : > { %2221 = vperm.xlu1 %5477, %v2187_v47   ;;  %2211 = vperm.xlu0 %5476, %v2185_v48  }
 0x511   : > { %5735 = vrot.lane.b32.xlu2 %v5629_v42, %s8576_s25 }
 0x513   : > { %v5571_v50 = vpop.permute.xlu2 %5570 }
 0x514   : > { %v5572_v44 = vunpack.i.l.bf16 %v5571_v50  ;;  %v5573_v51 = vunpack.i.h.bf16 %v5571_v50  ;;  %v2196_v50 = vld [vmem:[%s8526_s10 + $0x68] sm:$0xff] }
 0x516   : > { %1858 = vmatpush.msra.mxu0 %v5572_v44  ;;  %5370 = vmatpush.msra.mxu3 %v5572_v44 }
 0x518   : > { %1859 = vmatpush.msra.mxu0 %v5573_v51  ;;  %5371 = vmatpush.msra.mxu3 %v5573_v51  ;;  %v2306_v51 = vld [vmem:[%s8527_s11 + $0x58] sm:$0xff] }
 0x519   : > { %2338 = vperm.xlu1 %5477, %v2300_v52   ;;  %2328 = vperm.xlu0 %5476, %v2298_v54   ;;  %v1793_v54 = vld [vmem:[#allocation2 + $0x78] sm:$0xff] }
 0x51a   : > { %2201 = vperm.xlu2 %5478, %v2183_v55   ;;  %v5576_v56 = vpop.permute.xlu0 %5575  ;;  %v6931_v57 = vpop.permute.xlu1 %5590 }
 0x51b   : > { %v5577_v58 = vunpack.i.l.bf16 %v5576_v56  ;;  %v5586_v59 = vpop.permute.xlu2 %5585  ;;  %v5578_v60 = vunpack.i.h.bf16 %v5576_v56  ;;  %v5592_v48 = vunpack.i.l.bf16 %v6931_v57  ;;  %v5593_v55 = vunpack.i.h.bf16 %v6931_v57 }
 0x51c   : > { %v5587_v6 = vunpack.i.l.bf16 %v5586_v59  ;;  %v5588_v7 = vunpack.i.h.bf16 %v5586_v59 }
 0x51d   : > { %1860 = vmatpush.msra.mxu0 %v5577_v58  ;;  %5372 = vmatpush.msra.mxu3 %v5577_v58 }
 0x51f   : > { %1861 = vmatpush.msra.mxu0 %v5578_v60  ;;  %5373 = vmatpush.msra.mxu3 %v5578_v60 }
 0x521   : > { %2236 = vperm.xlu1 %5477, %v2190_v61   ;;  %2226 = vperm.xlu0 %5476, %v2188_v62  }
 0x522   : > { %2318 = vperm.xlu2 %5478, %v2296_v63   ;;  %1862 = vmatpush.msra.mxu0 %v5582_v0  ;;  %v6942_v2 = vpop.permute.xlu0 %5600  ;;  %v6944_v4 = vpop.permute.xlu1 %5605 }
 0x523   : > { %5374 = vmatpush.msra.mxu3 %v5582_v0  ;;  %v6946_v5 = vpop.permute.xlu2 %5595  ;;  %v5602_v44 = vunpack.i.l.bf16 %v6942_v2  ;;  %v5603_v59 = vunpack.i.h.bf16 %v6942_v2 }
 0x524   : > { %1863 = vmatpush.msra.mxu0 %v5583_v1 }
 0x525   : > { %5375 = vmatpush.msra.mxu3 %v5583_v1  ;;  %v5607_v1 = vunpack.i.l.bf16 %v6944_v4 }
 0x526   : > { %1864 = vmatpush.msra.mxu0 %v5587_v6 }
 0x527   : > { %5376 = vmatpush.msra.mxu3 %v5587_v6 }
 0x528   : > { %1865 = vmatpush.msra.mxu0 %v5588_v7 }
 0x529   : > { %5377 = vmatpush.msra.mxu3 %v5588_v7  ;;  %2241 = vperm.xlu1 %5477, %v2191_v8   ;;  %v2307_v7 = vld [vmem:[%s8527_s11 + $0x60] sm:$0xff] }
 0x52a   : > { %2343 = vperm.xlu0 %5476, %v2301_v9   ;;  %2216 = vperm.xlu2 %5478, %v2186_v10   ;;  %v6957_v11 = vpop.permute.xlu0 %5615  ;;  %v6959_v12 = vpop.permute.xlu1 %5620  ;;  %v1798_v9 = vld [vmem:[#allocation2 + $0xa0] sm:$0xff]  ;;  %v5608_v10 = vunpack.i.h.bf16 %v6944_v4 }
 0x52b   : > { %1866 = vmatpush.msra.mxu0 %v6870_v40  ;;  %5378 = vmatpush.msra.mxu3 %v6870_v40  ;;  %v6963_v13 = vpop.permute.xlu2 %5610  ;;  %v5617_v40 = vunpack.i.l.bf16 %v6957_v11  ;;  %v5618_v46 = vunpack.i.h.bf16 %v6957_v11  ;;  %v5622_v63 = vunpack.i.l.bf16 %v6959_v12  ;;  %v5623_v2 = vunpack.i.h.bf16 %v6959_v12 }
 0x52c   : > { %v5612_v62 = vunpack.i.l.bf16 %v6963_v13  ;;  %v5613_v57 = vunpack.i.h.bf16 %v6963_v13 }
 0x52d   : > { %1867 = vmatpush.msra.mxu0 %v6866_v39  ;;  %5379 = vmatpush.msra.mxu3 %v6866_v39 }
 0x52f   : > { %1868 = vmatpush.msra.mxu0 %v6860_v37  ;;  %5380 = vmatpush.msra.mxu3 %v6860_v37  ;;  %v1788_v37 = vld [vmem:[#allocation2 + $0x50] sm:$0xff] }
 0x531   : > { %1869 = vmatpush.msra.mxu0 %v6858_v36  ;;  %5381 = vmatpush.msra.mxu3 %v6858_v36  ;;  %v5598_v36 = vunpack.i.h.bf16 %v6946_v5 }
 0x532   : > { %2246 = vperm.xlu1 %5477, %v2192_v14   ;;  %2348 = vperm.xlu0 %5476, %v2302_v15   ;;  %v6980_v18 = vpop.permute.xlu0 %5630  ;;  %v6982_v19 = vpop.permute.xlu1 %5635 }
 0x533   : > { %2333 = vperm.xlu2 %5478, %v2299_v16   ;;  %1870 = vmatpush.msra.mxu0 %v6853_v29  ;;  %v6985_v20 = vpop.permute.xlu2 %5625  ;;  %v5637_v49 = vunpack.i.l.bf16 %v6982_v19  ;;  %v5638_v52 = vunpack.i.h.bf16 %v6982_v19  ;;  %v5632_v6 = vunpack.i.l.bf16 %v6980_v18  ;;  %v5633_v13 = vunpack.i.h.bf16 %v6980_v18 }
 0x534   : > { %5382 = vmatpush.msra.mxu3 %v6853_v29  ;;  %v2195_v29 = vld [vmem:[%s8526_s10 + $0x60] sm:$0xff]  ;;  %v5627_v16 = vunpack.i.l.bf16 %v6985_v20  ;;  %v5628_v4 = vunpack.i.h.bf16 %v6985_v20 }
 0x535   : > { %1871 = vmatpush.msra.mxu0 %v6851_v34 }
 0x536   : > { %5383 = vmatpush.msra.mxu3 %v6851_v34  ;;  %v5597_v34 = vunpack.i.l.bf16 %v6946_v5  ;;  %v2197_v5 = vld [vmem:[%s8526_s10 + $0x70] sm:$0xff] }
 0x537   : > { %1872 = vmatpush.msra.mxu0 %v6849_v32 }
 0x538   : > { %5384 = vmatpush.msra.mxu3 %v6849_v32 }
 0x539   : > { %1873 = vmatpush.msra.mxu0 %v6847_v33 }
 0x53a   : > { %5385 = vmatpush.msra.mxu3 %v6847_v33  ;;  %2251 = vperm.xlu1 %5477, %v2193_v21   ;;  %v7003_v25 = vpop.permute.xlu0 %5645  ;;  %v7005_v27 = vpop.permute.xlu1 %5660  ;;  %v1838_v21 = vld [vmem:[#allocation2 + $0x1e0] sm:$0xff] }
 0x53b   : > { %2353 = vperm.xlu0 %5476, %v2303_v22   ;;  %2231 = vperm.xlu2 %5478, %v2189_v23   ;;  %v7007_v28 = vpop.permute.xlu2 %5640  ;;  %v5647_v20 = vunpack.i.l.bf16 %v7003_v25 }
 0x53c   : > { %1874 = vmatmul.f32.vlgmr.msra.gmra.mxu0 %v1778_v24  ;;  %v5642_v8 = vunpack.i.l.bf16 %v7007_v28  ;;  %v5643_v14 = vunpack.i.h.bf16 %v7007_v28  ;;  %v2198_v24 = vld [vmem:[%s8526_s10 + $0x78] sm:$0xff]  ;;  %1910 = vmatmul.f32.vlgmr.msra.gmra.mxu3 %v1838_v21 }
 0x53d   : > { %v1833_v21 = vld [vmem:[#allocation2 + $0x1b8] sm:$0xff] }
 0x542   : > { %2256 = vperm.xlu1 %5477, %v2194_v53   ;;  %v7015_v31 = vpop.permute.xlu0 %5655  ;;  %v5671_v17 = vpop.permute.xlu1 %5670  ;;  %v2308_v53 = vld [vmem:[%s8527_s11 + $0x68] sm:$0xff] }
 0x543   : > { %2358 = vperm.xlu0 %5476, %v2304_v30   ;;  %v7017_v26 = vpop.permute.xlu2 %5650  ;;  %v5672_v33 = vunpack.i.l.bf16 %v5671_v17  ;;  %v5673_v32 = vunpack.i.h.bf16 %v5671_v17  ;;  %v5657_v28 = vunpack.i.l.bf16 %v7015_v31  ;;  %v1803_v30 = vld [vmem:[#allocation2 + $0xc8] sm:$0xff] }
 0x544   : > { %1877 = vmatmul.f32.gmra.mxu0 %v1783_v3  ;;  %v5652_v3 = vunpack.i.l.bf16 %v7017_v26 }
 0x545   : > { %1923 = vmatpush.msrb.mxu0 %v5672_v33  ;;  %v5648_v33 = vunpack.i.h.bf16 %v7003_v25 }
 0x547   : > { %1924 = vmatpush.msrb.mxu0 %v5673_v32  ;;  %v5658_v32 = vunpack.i.h.bf16 %v7015_v31 }
 0x549   : > { %1925 = vmatpush.msrb.mxu0 %v5597_v34 }
 0x54a   : > { %2261 = vperm.xlu1 %5477, %v2195_v29   ;;  %v5666_v38 = vpop.permute.xlu0 %5665  ;;  %v7027_v39 = vpop.permute.xlu1 %5695 }
 0x54b   : > { %2363 = vperm.xlu0 %5476, %v2305_v35   ;;  %v5667_v41 = vunpack.i.l.bf16 %v5666_v38  ;;  %v5676_v42 = vpop.permute.xlu2 %5675  ;;  %1926 = vmatpush.msrb.mxu0 %v5598_v36  ;;  %v5668_v45 = vunpack.i.h.bf16 %v5666_v38  ;;  %v5653_v35 = vunpack.i.h.bf16 %v7017_v26  ;;  %v5698_v25 = vunpack.i.h.bf16 %v7027_v39 }
 0x54c   : > { %1880 = vmatmul.f32.gmra.mxu0 %v1788_v37  ;;  %v5677_v43 = vunpack.i.l.bf16 %v5676_v42  ;;  %v5678_v47 = vunpack.i.h.bf16 %v5676_v42  ;;  %v5697_v37 = vunpack.i.l.bf16 %v7027_v39  ;;  %v5662_v26 = vunpack.i.l.bf16 %v7005_v27 }
 0x54d   : > { %1927 = vmatpush.msrb.mxu0 %v5617_v40  ;;  %2053 = vmatpush.msra.mxu2 %v5667_v41 }
 0x54e   : > { %2118 = vmatpush.msrb.mxu3 %v5677_v43  ;;  %v2309_v43 = vld [vmem:[%s8527_s11 + $0x70] sm:$0xff] }
 0x54f   : > { %1928 = vmatpush.msrb.mxu0 %v5618_v46  ;;  %2054 = vmatpush.msra.mxu2 %v5668_v45  ;;  %v1808_v45 = vld [vmem:[#allocation2 + $0xf0] sm:$0xff] }
 0x550   : > { %2119 = vmatpush.msrb.mxu3 %v5678_v47 }
 0x551   : > { %1929 = vmatpush.msrb.mxu0 %v5637_v49  ;;  %2055 = vmatpush.msra.mxu2 %v5592_v48  ;;  %v5663_v48 = vunpack.i.h.bf16 %v7005_v27 }
 0x552   : > { %2266 = vperm.xlu1 %5477, %v2196_v50   ;;  %2120 = vmatpush.msrb.mxu3 %v5602_v44  ;;  %v5686_v56 = vpop.permute.xlu0 %5685  ;;  %v5701_v58 = vpop.permute.xlu1 %5700 }
 0x553   : > { %2368 = vperm.xlu0 %5476, %v2306_v51   ;;  %v5687_v60 = vunpack.i.l.bf16 %v5686_v56  ;;  %v7043_v61 = vpop.permute.xlu2 %5680  ;;  %1930 = vmatpush.msrb.mxu0 %v5638_v52  ;;  %v5688_v0 = vunpack.i.h.bf16 %v5686_v56  ;;  %v5702_v22 = vunpack.i.l.bf16 %v5701_v58  ;;  %v5703_v18 = vunpack.i.h.bf16 %v5701_v58 }
 0x554   : > { %1883 = vmatmul.f32.gmra.mxu0 %v1793_v54  ;;  %2056 = vmatpush.msra.mxu2 %v5593_v55  ;;  %v5682_v46 = vunpack.i.l.bf16 %v7043_v61  ;;  %v5683_v49 = vunpack.i.h.bf16 %v7043_v61  ;;  %v1843_v55 = vld [vmem:[#allocation2 + $0x208] sm:$0xff] }
 0x555   : > { %2121 = vmatpush.msrb.mxu3 %v5603_v59  ;;  %1988 = vmatpush.msra.mxu1 %v5687_v60  ;;  %v2310_v60 = vld [vmem:[%s8527_s11 + $0x78] sm:$0xff] }
 0x556   : > { %2057 = vmatpush.msra.mxu2 %v5612_v62  ;;  %1913 = vmatmul.f32.gmra.mxu3 %v1843_v55  ;;  %v1813_v62 = vld [vmem:[#allocation2 + $0x118] sm:$0xff]  ;;  %v1832_v55 = vld [vmem:[#allocation2 + $0x1b0] sm:$0xff] }
 0x557   : > { %2122 = vmatpush.msrb.mxu3 %v5622_v63  ;;  %1989 = vmatpush.msra.mxu1 %v5688_v0 }
 0x558   : > { %2058 = vmatpush.msra.mxu2 %v5613_v57 }
 0x559   : > { %2123 = vmatpush.msrb.mxu3 %v5623_v2  ;;  %1990 = vmatpush.msra.mxu1 %v5607_v1  ;;  %v1848_v2 = vld [vmem:[#allocation2 + $0x230] sm:$0xff] }
 0x55a   : > { %2271 = vperm.xlu1 %5477, %v2197_v5   ;;  %2059 = vmatpush.msra.mxu2 %v5632_v6  ;;  %v7059_v11 = vpop.permute.xlu0 %5690  ;;  %v5726_v12 = vpop.permute.xlu1 %5725  ;;  %v1781_v5 = vld [vmem:[#allocation2 + $0x18] sm:$0xff]  ;;  %v1818_v6 = vld [vmem:[#allocation2 + $0x140] sm:$0xff] }
 0x55b   : > { %2373 = vperm.xlu0 %5476, %v2307_v7   ;;  %2124 = vmatpush.msrb.mxu3 %v5642_v8  ;;  %v5706_v15 = vpop.permute.xlu2 %5705  ;;  %v5727_v38 = vunpack.i.l.bf16 %v5726_v12  ;;  %v5692_v40 = vunpack.i.l.bf16 %v7059_v11  ;;  %v5728_v31 = vunpack.i.h.bf16 %v5726_v12  ;;  %v5693_v42 = vunpack.i.h.bf16 %v7059_v11  ;;  %v1780_v7 = vld [vmem:[#allocation2 + $0x10] sm:$0xff]  ;;  %v1786_v8 = vld [vmem:[#allocation2 + $0x40] sm:$0xff]  ;;  %v1785_v11 = vld [vmem:[#allocation2 + $0x38] sm:$0xff] }
 0x55c   : > { %1886 = vmatmul.f32.gmra.mxu0 %v1798_v9  ;;  %v5707_v19 = vunpack.i.l.bf16 %v5706_v15  ;;  %1991 = vmatpush.msra.mxu1 %v5608_v10  ;;  %v5708_v23 = vunpack.i.h.bf16 %v5706_v15  ;;  %v1853_v9 = vld [vmem:[#allocation2 + $0x258] sm:$0xff]  ;;  %v1823_v10 = vld [vmem:[#allocation2 + $0x168] sm:$0xff] }
 0x55d   : > { %2060 = vmatpush.msra.mxu2 %v5633_v13  ;;  %2125 = vmatpush.msrb.mxu3 %v5643_v14  ;;  %v1791_v12 = vld [vmem:[#allocation2 + $0x68] sm:$0xff]  ;;  %v1782_v13 = vld [vmem:[#allocation2 + $0x20] sm:$0xff]  ;;  %v1828_v14 = vld [vmem:[#allocation2 + $0x190] sm:$0xff] }
 0x55e   : > { %1931 = vmatpush.msrb.mxu0 %v5707_v19  ;;  %1992 = vmatpush.msra.mxu1 %v5627_v16  ;;  %v1787_v15 = vld [vmem:[#allocation2 + $0x48] sm:$0xff]  ;;  %v1790_v16 = vld [vmem:[#allocation2 + $0x60] sm:$0xff]  ;;  %v1796_v19 = vld [vmem:[#allocation2 + $0x90] sm:$0xff] }
 0x55f   : > { %2061 = vmatpush.msra.mxu2 %v5702_v22  ;;  %1916 = vmatmul.f32.gmra.mxu3 %v1848_v2  ;;  %v1792_v22 = vld [vmem:[#allocation2 + $0x70] sm:$0xff]  ;;  %v1829_v2 = vld [vmem:[#allocation2 + $0x198] sm:$0xff] }
 0x560   : > { %1932 = vmatpush.msrb.mxu0 %v5708_v23  ;;  %1993 = vmatpush.msra.mxu1 %v5628_v4  ;;  %v1795_v4 = vld [vmem:[#allocation2 + $0x88] sm:$0xff] }
 0x561   : > { %2062 = vmatpush.msra.mxu2 %v5703_v18  ;;  %v1779_v23 = vld [vmem:[#allocation2 + $0x8] sm:$0xff]  ;;  %v1801_v18 = vld [vmem:[#allocation2 + $0xb8] sm:$0xff] }
 0x562   : > { %2276 = vperm.xlu1 %5477, %v2198_v24   ;;  %1933 = vmatpush.msrb.mxu0 %v5657_v28  ;;  %v5716_v17 = vpop.permute.xlu0 %5715  ;;  %v5731_v36 = vpop.permute.xlu1 %5730  ;;  %v1797_v24 = vld [vmem:[#allocation2 + $0x98] sm:$0xff]  ;;  %v1800_v28 = vld [vmem:[#allocation2 + $0xb0] sm:$0xff] }
 0x563   : > { %2378 = vperm.xlu0 %5476, %v2308_v53   ;;  %1994 = vmatpush.msra.mxu1 %v5647_v20  ;;  %v5717_v34 = vunpack.i.l.bf16 %v5716_v17  ;;  %v5711_v29 = vpop.permute.xlu2 %5710  ;;  %v5718_v41 = vunpack.i.h.bf16 %v5716_v17  ;;  %v5732_v47 = vunpack.i.l.bf16 %v5731_v36  ;;  %v5733_v51 = vunpack.i.h.bf16 %v5731_v36  ;;  %v1784_v53 = vld [vmem:[#allocation2 + $0x30] sm:$0xff]  ;;  %v1806_v20 = vld [vmem:[#allocation2 + $0xe0] sm:$0xff]  ;;  %v1789_v17 = vld [vmem:[#allocation2 + $0x58] sm:$0xff] }
 0x564   : > { %1889 = vmatmul.f32.gmra.mxu0 %v1803_v30  ;;  %2063 = vmatpush.msra.mxu2 %v5652_v3  ;;  %v5712_v54 = vunpack.i.l.bf16 %v5711_v29  ;;  %v5713_v59 = vunpack.i.h.bf16 %v5711_v29  ;;  %v1802_v30 = vld [vmem:[#allocation2 + $0xc0] sm:$0xff]  ;;  %v1805_v3 = vld [vmem:[#allocation2 + $0xd8] sm:$0xff]  ;;  %v1812_v36 = vld [vmem:[#allocation2 + $0x110] sm:$0xff] }
 0x565   : > { %1934 = vmatpush.msrb.mxu0 %v5658_v32  ;;  %1995 = vmatpush.msra.mxu1 %v5648_v33  ;;  %v1811_v33 = vld [vmem:[#allocation2 + $0x108] sm:$0xff]  ;;  %v1794_v29 = vld [vmem:[#allocation2 + $0x80] sm:$0xff] }
 0x566   : > { %2064 = vmatpush.msra.mxu2 %v5653_v35  ;;  %2126 = vmatpush.msrb.mxu3 %v5717_v34  ;;  %v1807_v32 = vld [vmem:[#allocation2 + $0xe8] sm:$0xff]  ;;  %v1810_v34 = vld [vmem:[#allocation2 + $0x100] sm:$0xff]  ;;  %v1816_v35 = vld [vmem:[#allocation2 + $0x130] sm:$0xff] }
 0x567   : > { %1935 = vmatpush.msrb.mxu0 %v5697_v37  ;;  %1996 = vmatpush.msra.mxu1 %v5727_v38  ;;  %v1815_v37 = vld [vmem:[#allocation2 + $0x128] sm:$0xff] }
 0x568   : > { %2065 = vmatpush.msra.mxu2 %v5692_v40  ;;  %2127 = vmatpush.msrb.mxu3 %v5718_v41  ;;  %v1799_v40 = vld [vmem:[#allocation2 + $0xa8] sm:$0xff]  ;;  %v1821_v41 = vld [vmem:[#allocation2 + $0x158] sm:$0xff] }
 0x569   : > { %1936 = vmatpush.msrb.mxu0 %v5698_v25  ;;  %1997 = vmatpush.msra.mxu1 %v5728_v31  ;;  %v1817_v25 = vld [vmem:[#allocation2 + $0x138] sm:$0xff]  ;;  %v1820_v31 = vld [vmem:[#allocation2 + $0x150] sm:$0xff] }
 0x56a   : > { %2066 = vmatpush.msra.mxu2 %v5693_v42  ;;  %2128 = vmatpush.msrb.mxu3 %v5662_v26  ;;  %v5721_v39 = vpop.permute.xlu0 %5720  ;;  %v5746_v58 = vpop.permute.xlu1 %5745  ;;  %v1804_v42 = vld [vmem:[#allocation2 + $0xd0] sm:$0xff] }
 0x56b   : > { %2383 = vperm.xlu0 %5476, %v2309_v43   ;;  %1998 = vmatpush.msra.mxu1 %v5682_v46  ;;  %v5722_v50 = vunpack.i.l.bf16 %v5721_v39  ;;  %v5736_v44 = vpop.permute.xlu2 %5735  ;;  %v5723_v27 = vunpack.i.h.bf16 %v5721_v39  ;;  %v5747_v61 = vunpack.i.l.bf16 %v5746_v58  ;;  %v5748_v0 = vunpack.i.h.bf16 %v5746_v58  ;;  %v1826_v43 = vld [vmem:[#allocation2 + $0x180] sm:$0xff]  ;;  %v1809_v39 = vld [vmem:[#allocation2 + $0xf8] sm:$0xff]  ;;  %v1819_v58 = vld [vmem:[#allocation2 + $0x148] sm:$0xff] }
 0x56c   : > { %1892 = vmatmul.f32.gmra.mxu0 %v1808_v45  ;;  %2067 = vmatpush.msra.mxu2 %v5732_v47  ;;  %v5737_v52 = vunpack.i.l.bf16 %v5736_v44  ;;  %v5738_v56 = vunpack.i.h.bf16 %v5736_v44  ;;  %v1822_v46 = vld [vmem:[#allocation2 + $0x160] sm:$0xff]  ;;  %v1825_v45 = vld [vmem:[#allocation2 + $0x178] sm:$0xff] }
 0x56d   : > { %1999 = vmatpush.msra.mxu1 %v5683_v49  ;;  %2129 = vmatpush.msrb.mxu3 %v5663_v48  ;;  %v1831_v48 = vld [vmem:[#allocation2 + $0x1a8] sm:$0xff]  ;;  %v1830_v49 = vld [vmem:[#allocation2 + $0x1a0] sm:$0xff] }
 0x56e   : > { %2068 = vmatpush.msra.mxu2 %v5733_v51  ;;  %1937 = vmatpush.msrb.mxu0 %v5737_v52  ;;  %v1814_v51 = vld [vmem:[#allocation2 + $0x120] sm:$0xff]  ;;  %v1836_v52 = vld [vmem:[#allocation2 + $0x1d0] sm:$0xff] }
 0x56f   : > { %2000 = vmatpush.msra.mxu1 %v5722_v50  ;;  %2130 = vmatpush.msrb.mxu3 %v5712_v54  ;;  %v1827_v50 = vld [vmem:[#allocation2 + $0x188] sm:$0xff] }
 0x570   : > { %1938 = vmatpush.msrb.mxu0 %v5738_v56  ;;  %2069 = vmatmul.f32.vlgmr.msra.gmra.mxu2 %v1781_v5  ;;  %v1835_v54 = vld [vmem:[#allocation2 + $0x1c8] sm:$0xff] }
 0x571   : > { %2001 = vmatpush.msra.mxu1 %v5723_v27  ;;  %2131 = vmatpush.msrb.mxu3 %v5713_v59  ;;  %v1841_v59 = vld [vmem:[#allocation2 + $0x1f8] sm:$0xff]  ;;  %v1840_v27 = vld [vmem:[#allocation2 + $0x1f0] sm:$0xff] }
 0x572   : > { %v5741_v63 = vpop.permute.xlu0 %5740  ;;  %1919 = vmatmul.f32.gmra.mxu3 %v1853_v9 }
 0x573   : > { %2388 = vperm.xlu0 %5476, %v2310_v60   ;;  %2002 = vmatpush.msra.mxu1 %v5747_v61  ;;  %v5742_v57 = vunpack.i.l.bf16 %v5741_v63  ;;  %v5743_v1 = vunpack.i.h.bf16 %v5741_v63  ;;  %v1837_v60 = vld [vmem:[#allocation2 + $0x1d8] sm:$0xff]  ;;  %v1846_v63 = vld [vmem:[#allocation2 + $0x220] sm:$0xff] }
 0x574   : > { %1895 = vmatmul.f32.gmra.mxu0 %v1813_v62  ;;  %v1824_v62 = vld [vmem:[#allocation2 + $0x170] sm:$0xff] }
 0x575   : > { %2003 = vmatpush.msra.mxu1 %v5748_v0  ;;  %2132 = vmatpush.msrb.mxu3 %v5742_v57  ;;  %v1845_v0 = vld [vmem:[#allocation2 + $0x218] sm:$0xff]  ;;  %v1842_v57 = vld [vmem:[#allocation2 + $0x200] sm:$0xff] }
 0x576   : > { %2004 = vmatmul.f32.vlgmr.msra.gmra.mxu1 %v1780_v7  ;;  %v1850_v7 = vld [vmem:[#allocation2 + $0x240] sm:$0xff] }
 0x577   : > { %2133 = vmatpush.msrb.mxu3 %v5743_v1 }
 0x578   : > { %2072 = vmatmul.f32.gmra.mxu2 %v1786_v8  ;;  %v1847_v8 = vld [vmem:[#allocation2 + $0x228] sm:$0xff] }
 0x57a   : > { %2134 = vmatmul.f32.vlgmr.msrb.gmra.mxu3 %v1782_v13  ;;  %v1855_v13 = vld [vmem:[#allocation2 + $0x268] sm:$0xff] }
 0x57c   : > { %1898 = vmatmul.f32.gmra.mxu0 %v1818_v6  ;;  %v1851_v6 = vld [vmem:[#allocation2 + $0x248] sm:$0xff] }
 0x57e   : > { %2007 = vmatmul.f32.gmra.mxu1 %v1785_v11  ;;  %v1856_v11 = vld [vmem:[#allocation2 + $0x270] sm:$0xff] }
 0x580   : > { %2075 = vmatmul.f32.gmra.mxu2 %v1791_v12 }
 0x582   : > { %2137 = vmatmul.f32.gmra.mxu3 %v1787_v15 }
 0x584   : > { %1901 = vmatmul.f32.gmra.mxu0 %v1823_v10  ;;  %v1834_v10 = vld [vmem:[#allocation2 + $0x1c0] sm:$0xff] }
 0x586   : > { %2010 = vmatmul.f32.gmra.mxu1 %v1790_v16  ;;  %v1839_v16 = vld [vmem:[#allocation2 + $0x1e8] sm:$0xff] }
 0x588   : > { %2078 = vmatmul.f32.gmra.mxu2 %v1796_v19 }
 0x58a   : > { %2140 = vmatmul.f32.gmra.mxu3 %v1792_v22  ;;  %v1857_v22 = vld [vmem:[#allocation2 + $0x278] sm:$0xff] }
 0x58c   : > { %1904 = vmatmul.f32.gmra.mxu0 %v1828_v14  ;;  %v1852_v14 = vld [vmem:[#allocation2 + $0x250] sm:$0xff] }
 0x58e   : > { %2013 = vmatmul.f32.gmra.mxu1 %v1795_v4 }
 0x590   : > { %2081 = vmatmul.f32.gmra.mxu2 %v1801_v18  ;;  %v1844_v18 = vld [vmem:[#allocation2 + $0x210] sm:$0xff] }
 0x592   : > { %2143 = vmatmul.f32.gmra.mxu3 %v1797_v24 }
 0x594   : > { %1907 = vmatmul.f32.gmra.mxu0 %v1833_v21 }
 0x596   : > { %2016 = vmatmul.f32.gmra.mxu1 %v1800_v28 }
 0x598   : > { %2084 = vmatmul.f32.gmra.mxu2 %v1806_v20 }
 0x59a   : > { %2146 = vmatmul.f32.gmra.mxu3 %v1802_v30  ;;  %v1849_v30 = vld [vmem:[#allocation2 + $0x238] sm:$0xff] }
 0x59c   : > { %1939 = vmatmul.f32.vlgmr.msrb.gmra.mxu0 %v1779_v23 }
 0x59e   : > { %2019 = vmatmul.f32.gmra.mxu1 %v1805_v3 }
 0x5a0   : > { %2087 = vmatmul.f32.gmra.mxu2 %v1811_v33 }
 0x5a2   : > { %2149 = vmatmul.f32.gmra.mxu3 %v1807_v32  ;;  %v1854_v32 = vld [vmem:[#allocation2 + $0x260] sm:$0xff] }
 0x5a4   : > { %1942 = vmatmul.f32.gmra.mxu0 %v1784_v53 }
 0x5a6   : > { %2022 = vmatmul.f32.gmra.mxu1 %v1810_v34 }
 0x5a8   : > { %2090 = vmatmul.f32.gmra.mxu2 %v1816_v35  ;;  %v2314_v35 = vpop.permute.xlu0 %2313 }
 0x5aa   : > { %2152 = vmatmul.f32.gmra.mxu3 %v1812_v36 }
 0x5ac   : > { %1945 = vmatmul.f32.gmra.mxu0 %v1789_v17 }
 0x5ae   : > { %2025 = vmatmul.f32.gmra.mxu1 %v1815_v37 }
 0x5b0   : > { %2093 = vmatmul.f32.gmra.mxu2 %v1821_v41 }
 0x5b2   : > { %2155 = vmatmul.f32.gmra.mxu3 %v1817_v25 }
 0x5b4   : > { %1948 = vmatmul.f32.gmra.mxu0 %v1794_v29 }
 0x5b6   : > { %2028 = vmatmul.f32.gmra.mxu1 %v1820_v31 }
 0x5b8   : > { %2096 = vmatmul.f32.gmra.mxu2 %v1826_v43  ;;  %v2207_v43 = vpop.permute.xlu1 %2206 }
 0x5b9   : > { %v7091_v38 = vpop.f32.mrf.mxu0 }
 0x5ba   : > { %2158 = vmatmul.f32.gmra.mxu3 %v1822_v46 }
 0x5bc   : > { %1951 = vmatmul.f32.gmra.mxu0 %v1799_v40 }
 0x5be   : > { %2031 = vmatmul.f32.gmra.mxu1 %v1825_v45  ;;  %v2202_v45 = vpop.permute.xlu2 %2201 }
 0x5bf   : > { %v7105_v5 = vpop.f32.mrf.mxu3 }
 0x5c0   : > { %2099 = vmatmul.f32.gmra.mxu2 %v1831_v48  ;;  %v2212_v48 = vpop.permute.xlu0 %2211 }
 0x5c1   : > { %v7093_v26 = vpop.f32.mrf.mxu0 }
 0x5c2   : > { %2161 = vmatmul.f32.gmra.mxu3 %v1827_v50 }
 0x5c4   : > { %1954 = vmatmul.f32.gmra.mxu0 %v1804_v42 }
 0x5c6   : > { %2034 = vmatmul.f32.gmra.mxu1 %v1830_v49 }
 0x5c8   : > { %2102 = vmatmul.f32.gmra.mxu2 %v1836_v52 }
 0x5c9   : > { %v7095_v47 = vpop.f32.mrf.mxu0 }
 0x5ca   : > { %2164 = vmatmul.f32.gmra.mxu3 %v1832_v55 }
 0x5cc   : > { %1957 = vmatmul.f32.gmra.mxu0 %v1809_v39 }
 0x5ce   : > { %2037 = vmatmul.f32.gmra.mxu1 %v1835_v54 }
 0x5d0   : > { %2105 = vmatmul.f32.gmra.mxu2 %v1841_v59 }
 0x5d1   : > { %v7097_v44 = vpop.f32.mrf.mxu0 }
 0x5d2   : > { %2167 = vmatmul.f32.gmra.mxu3 %v1837_v60 }
 0x5d4   : > { %1960 = vmatmul.f32.gmra.mxu0 %v1814_v51 }
 0x5d6   : > { %2040 = vmatmul.f32.gmra.mxu1 %v1840_v27 }
 0x5d8   : > { %2108 = vmatmul.f32.gmra.mxu2 %v1846_v63  ;;  %v2324_v63 = vpop.permute.xlu1 %2323 }
 0x5d9   : > { %v7099_v56 = vpop.f32.mrf.mxu0  ;;  %v7109_v12 = vpop.f32.mrf.mxu3 }
 0x5da   : > { %2170 = vmatmul.f32.gmra.mxu3 %v1842_v57 }
 0x5dc   : > { %1963 = vmatmul.f32.gmra.mxu0 %v1819_v58 }
 0x5de   : > { %2043 = vmatmul.f32.gmra.mxu1 %v1845_v0 }
 0x5e0   : > { %2111 = vmatmul.f32.gmra.mxu2 %v1851_v6 }
 0x5e1   : > { %v7101_v61 = vpop.f32.mrf.mxu0 }
 0x5e2   : > { %2173 = vmatmul.f32.gmra.mxu3 %v1847_v8  ;;  %v7113_v19 = vpop.f32.mrf.mxu3 }
 0x5e4   : > { %1966 = vmatmul.f32.gmra.mxu0 %v1824_v62 }
 0x5e6   : > { %2046 = vmatmul.f32.gmra.mxu1 %v1850_v7  ;;  %v2329_v7 = vpop.permute.xlu0 %2328 }
 0x5e8   : > { %2114 = vmatmul.f32.gmra.mxu2 %v1856_v11 }
 0x5e9   : > { %v7103_v1 = vpop.f32.mrf.mxu0 }
 0x5ea   : > { %2176 = vmatmul.f32.gmra.mxu3 %v1852_v14 }
 0x5ec   : > { %1969 = vmatmul.f32.gmra.mxu0 %v1829_v2  ;;  %v2319_v2 = vpop.permute.xlu2 %2318 }
 0x5ee   : > { %2049 = vmatmul.f32.gmra.mxu1 %v1855_v13 }
 0x5f1   : > { %v7107_v9 = vpop.f32.mrf.mxu0 }
 0x5f2   : > { %2179 = vmatmul.f32.gmra.mxu3 %v1857_v22 }
 0x5f3   : > { %v2005_v21 = vpop.f32.mrf.mxu1  ;;  %v2070_v4 = vpop.f32.mrf.mxu2 }
 0x5f4   : > { %1972 = vmatmul.f32.gmra.mxu0 %v1834_v10 }
 0x5f5   : > { %v7117_v24 = vpop.f32.mrf.mxu3 }
 0x5f9   : > { %v7111_v15 = vpop.f32.mrf.mxu0 }
 0x5fb   : > { %v2008_v28 = vpop.f32.mrf.mxu1  ;;  %v2073_v53 = vpop.f32.mrf.mxu2 }
 0x5fc   : > { %1975 = vmatmul.f32.gmra.mxu0 %v1839_v16 }
 0x5fd   : > { %v2135_v3 = vpop.f32.mrf.mxu3 }
 0x601   : > { %v7115_v23 = vpop.f32.mrf.mxu0 }
 0x603   : > { %v2011_v17 = vpop.f32.mrf.mxu1  ;;  %v2076_v34 = vpop.f32.mrf.mxu2 }
 0x604   : > { %1978 = vmatmul.f32.gmra.mxu0 %v1844_v18 }
 0x605   : > { %v2138_v29 = vpop.f32.mrf.mxu3 }
 0x609   : > { %v7119_v20 = vpop.f32.mrf.mxu0 }
 0x60b   : > { %v2014_v37 = vpop.f32.mrf.mxu1  ;;  %v2079_v25 = vpop.f32.mrf.mxu2 }
 0x60c   : > { %1981 = vmatmul.f32.gmra.mxu0 %v1849_v30 }
 0x60d   : > { %v2141_v41 = vpop.f32.mrf.mxu3 }
 0x611   : > { %v7121_v33 = vpop.f32.mrf.mxu0 }
 0x613   : > { %v2017_v52 = vpop.f32.mrf.mxu1  ;;  %v2082_v58 = vpop.f32.mrf.mxu2 }
 0x614   : > { %1984 = vmatmul.f32.gmra.mxu0 %v1854_v32 }
 0x615   : > { %v2144_v51 = vpop.f32.mrf.mxu3 }
 0x619   : > { %v1940_v36 = vpop.f32.mrf.mxu0 }
 0x61a   : > { %v1941_v40 = vadd.f32 %v1940_v36, %v7091_v38 }
 0x61b   : > { %v2020_v10 = vpop.f32.mrf.mxu1  ;;  %v2085_v14 = vpop.f32.mrf.mxu2 }
 0x61c   : > { %v2006_v31 = vadd.f32 %v2005_v21, %v1941_v40 }
 0x61d   : > { %v2147_v6 = vpop.f32.mrf.mxu3 }
 0x61e   : > { %v2071_v42 = vadd.f32 %v2070_v4, %v2006_v31 }
 0x620   : > { %v2136_v46 = vadd.f32 %v2135_v3, %v2071_v42 }
 0x621   : > { %v1943_v39 = vpop.f32.mrf.mxu0 }
 0x622   : > { %v2279_v49 = vmul.f32 %v2202_v45, %v2136_v46  ;;  %v1944_v50 = vadd.f32 %v1943_v39, %v7093_v26 }
 0x623   : > { %v2023_v36 = vpop.f32.mrf.mxu1  ;;  %v2088_v46 = vpop.f32.mrf.mxu2 }
 0x624   : > { %v2391_v54 = vadd.f32 %v2314_v35, %v2279_v49  ;;  %v2009_v55 = vadd.f32 %v2008_v28, %v1944_v50 }
 0x625   : > { %v2150_v30 = vpop.f32.mrf.mxu3 }
 0x626   : > { %v2074_v59 = vadd.f32 %v2073_v53, %v2009_v55  ;;  %v2423_v27 = vmin.f32 %v2391_v54, 0.0  ;;  %vm2407_vm15 = vcmp.gt.f32.partialorder %v2391_v54, 0.0 }
 0x628   : > { %v2139_v38 = vadd.f32 %v2138_v29, %v2074_v59  ;;  %v2439_v60 = vmul.f32 1.442695, %v2423_v27 }
 0x629   : > { %v1946_v62 = vpop.f32.mrf.mxu0 }
 0x62a   : > { %v2280_v0 = vmul.f32 %v2207_v43, %v2139_v38  ;;  %v1947_v57 = vadd.f32 %v1946_v62, %v7095_v47  ;;  %6141 = vpow2.f32 %v2439_v60 }
 0x62c   : > { %v2392_v8 = vadd.f32 %v2319_v2, %v2280_v0  ;;  %v2012_v26 = vadd.f32 %v2011_v17, %v1947_v57  ;;  %v2222_v17 = vpop.permute.xlu1 %2221  ;;  %v2091_v2 = vpop.f32.mrf.mxu2 }
 0x62e   : > { %v2077_v11 = vadd.f32 %v2076_v34, %v2012_v26  ;;  %v2424_v13 = vmin.f32 %v2392_v8, 0.0  ;;  %v2227_v34 = vpop.permute.xlu0 %2226  ;;  %vm2408_vm0 = vcmp.gt.f32.partialorder %v2392_v8, 0.0 }
 0x630   : > { %v6142_v16 = vpop.eup %6141  ;;  %v2142_v21 = vadd.f32 %v2141_v41, %v2077_v11  ;;  %v2441_v22 = vmul.f32 1.442695, %v2424_v13  ;;  %v2217_v41 = vpop.permute.xlu2 %2216 }
 0x631   : > { %v1949_v4 = vpop.f32.mrf.mxu0  ;;  %v5283_v18 = vadd.f32 -1.0, %v6142_v16 }
 0x632   : > { %v2281_v28 = vmul.f32 %v2212_v48, %v2142_v21  ;;  %v1950_v53 = vadd.f32 %v1949_v4, %v7097_v44  ;;  %6143 = vpow2.f32 %v2441_v22  ;;  %v2153_v48 = vpop.f32.mrf.mxu3 }
 0x633   : > { %v7127_v47 = vsel %vm2407_vm15, %v2391_v54, %v5283_v18 }
 0x634   : > { %v2393_v3 = vadd.f32 %v2324_v63, %v2281_v28  ;;  %v2015_v32 = vadd.f32 %v2014_v37, %v1950_v53  ;;  %2519 = vrot.lane.b32.xlu2 %v7127_v47, %s8569_s1 }
 0x636   : > { %v2080_v29 = vadd.f32 %v2079_v25, %v2015_v32  ;;  %v2425_v35 = vmin.f32 %v2393_v3, 0.0  ;;  %v2344_v59 = vpop.permute.xlu0 %2343  ;;  %vm2409_vm1 = vcmp.gt.f32.partialorder %v2393_v3, 0.0 }
 0x638   : > { %v6144_v40 = vpop.eup %6143  ;;  %v2145_v31 = vadd.f32 %v2144_v51, %v2080_v29  ;;  %v2443_v42 = vmul.f32 1.442695, %v2425_v35  ;;  %v2339_v51 = vpop.permute.xlu1 %2338 }
 0x639   : > { %v1952_v44 = vpop.f32.mrf.mxu0  ;;  %v5284_v43 = vadd.f32 -1.0, %v6144_v40  ;;  %v2334_v57 = vpop.permute.xlu2 %2333 }
 0x63a   : > { %v2282_v45 = vmul.f32 %v2217_v41, %v2145_v31  ;;  %v1953_v39 = vadd.f32 %v1952_v44, %v7099_v56  ;;  %6145 = vpow2.f32 %v2443_v42  ;;  %v2026_v56 = vpop.f32.mrf.mxu1 }
 0x63b   : > { %v7132_v37 = vsel %vm2408_vm0, %v2392_v8, %v5284_v43  ;;  %v2156_v8 = vpop.f32.mrf.mxu3 }
 0x63c   : > { %v2394_v49 = vadd.f32 %v2329_v7, %v2282_v45  ;;  %v2018_v50 = vadd.f32 %v2017_v52, %v1953_v39  ;;  %2521 = vrot.lane.b32.xlu2 %v7132_v37, %s8569_s1 }
 0x63e   : > { %v2083_v25 = vadd.f32 %v2082_v58, %v2018_v50  ;;  %v2426_v54 = vmin.f32 %v2394_v49, 0.0  ;;  %v2349_v4 = vpop.permute.xlu0 %2348  ;;  %vm2410_vm2 = vcmp.gt.f32.partialorder %v2394_v49, 0.0 }
 0x640   : > { %v6146_v55 = vpop.eup %6145  ;;  %v2148_v27 = vadd.f32 %v2147_v6, %v2083_v25  ;;  %v2445_v38 = vmul.f32 1.442695, %v2426_v54  ;;  %v2237_v21 = vpop.permute.xlu1 %2236 }
 0x641   : > { %v1955_v60 = vpop.f32.mrf.mxu0  ;;  %v5285_v62 = vadd.f32 -1.0, %v6146_v55 }
 0x642   : > { %v2283_v63 = vmul.f32 %v2222_v17, %v2148_v27  ;;  %v1956_v0 = vadd.f32 %v1955_v60, %v7101_v61  ;;  %6147 = vpow2.f32 %v2445_v38 }
 0x643   : > { %v7137_v52 = vsel %vm2409_vm1, %v2393_v3, %v5285_v62  ;;  %v2159_v29 = vpop.f32.mrf.mxu3 }
 0x644   : > { %v2395_v7 = vadd.f32 %v2334_v57, %v2283_v63  ;;  %v2021_v58 = vadd.f32 %v2020_v10, %v1956_v0  ;;  %2523 = vrot.lane.b32.xlu2 %v7137_v52, %s8569_s1  ;;  %v2029_v10 = vpop.f32.mrf.mxu1 }
 0x646   : > { %v2086_v6 = vadd.f32 %v2085_v14, %v2021_v58  ;;  %v2427_v26 = vmin.f32 %v2395_v7, 0.0  ;;  %v2094_v14 = vpop.f32.mrf.mxu2  ;;  %vm2411_vm3 = vcmp.gt.f32.partialorder %v2395_v7, 0.0  ;;  %v2354_v45 = vpop.permute.xlu0 %2353 }
 0x648   : > { %v6148_v11 = vpop.eup %6147  ;;  %v2151_v13 = vadd.f32 %v2150_v30, %v2086_v6  ;;  %v2447_v16 = vmul.f32 1.442695, %v2427_v26  ;;  %v2242_v43 = vpop.permute.xlu1 %2241 }
 0x649   : > { %v1958_v22 = vpop.f32.mrf.mxu0  ;;  %v5286_v61 = vadd.f32 -1.0, %v6148_v11 }
 0x64a   : > { %v2284_v18 = vmul.f32 %v2227_v34, %v2151_v13  ;;  %v1959_v28 = vadd.f32 %v1958_v22, %v7103_v1  ;;  %6149 = vpow2.f32 %v2447_v16  ;;  %v2232_v34 = vpop.permute.xlu2 %2231 }
 0x64b   : > { %v7142_v53 = vsel %vm2410_vm2, %v2394_v49, %v5286_v61  ;;  %v2162_v38 = vpop.f32.mrf.mxu3 }
 0x64c   : > { %v2396_v3 = vadd.f32 %v2339_v51, %v2284_v18  ;;  %v2024_v32 = vadd.f32 %v2023_v36, %v1959_v28  ;;  %2525 = vrot.lane.b32.xlu2 %v7142_v53, %s8569_s1 }
 0x64e   : > { %v2089_v30 = vadd.f32 %v2088_v46, %v2024_v32  ;;  %v2428_v17 = vmin.f32 %v2396_v3, 0.0  ;;  %v2032_v46 = vpop.f32.mrf.mxu1  ;;  %v2097_v25 = vpop.f32.mrf.mxu2  ;;  %vm2412_vm4 = vcmp.gt.f32.partialorder %v2396_v3, 0.0 }
 0x64f   : > { %v2359_v57 = vpop.permute.xlu0 %2358 }
 0x650   : > { %v6150_v35 = vpop.eup %6149  ;;  %v2154_v40 = vadd.f32 %v2153_v48, %v2089_v30  ;;  %v2449_v41 = vmul.f32 1.442695, %v2428_v17  ;;  %v2247_v0 = vpop.permute.xlu1 %2246 }
 0x651   : > { %v1961_v31 = vpop.f32.mrf.mxu0  ;;  %v5287_v1 = vadd.f32 -1.0, %v6150_v35 }
 0x652   : > { %v2285_v42 = vmul.f32 %v2232_v34, %v2154_v40  ;;  %v1962_v44 = vadd.f32 %v1961_v31, %v7107_v9  ;;  %6151 = vpow2.f32 %v2449_v41  ;;  %v2586_v41 = vld [vmem:[%s8528_s12 + $0x18] sm:$0xff] }
 0x653   : > { %v7147_v36 = vsel %vm2411_vm3, %v2395_v7, %v5287_v1  ;;  %v2165_v61 = vpop.f32.mrf.mxu3 }
 0x654   : > { %v2397_v39 = vadd.f32 %v2344_v59, %v2285_v42  ;;  %v2027_v49 = vadd.f32 %v2026_v56, %v1962_v44  ;;  %2527 = vrot.lane.b32.xlu2 %v7147_v36, %s8569_s1  ;;  %v2585_v44 = vld [vmem:[%s8528_s12 + $0x10] sm:$0xff] }
 0x656   : > { %v2092_v48 = vadd.f32 %v2091_v2, %v2027_v49  ;;  %v2429_v50 = vmin.f32 %v2397_v39, 0.0  ;;  %v2035_v58 = vpop.f32.mrf.mxu1  ;;  %vm2413_vm5 = vcmp.gt.f32.partialorder %v2397_v39, 0.0 }
 0x658   : > { %v6152_v54 = vpop.eup %6151  ;;  %v2157_v51 = vadd.f32 %v2156_v8, %v2092_v48  ;;  %v2451_v55 = vmul.f32 1.442695, %v2429_v50  ;;  %v2252_v32 = vpop.permute.xlu1 %2251  ;;  %v2583_v48 = vld [vmem:[%s8528_s12] sm:$0xff] }
 0x659   : > { %v1964_v27 = vpop.f32.mrf.mxu0  ;;  %v5288_v9 = vadd.f32 -1.0, %v6152_v54 }
 0x65a   : > { %v2286_v60 = vmul.f32 %v2237_v21, %v2157_v51  ;;  %v1965_v62 = vadd.f32 %v1964_v27, %v7111_v15  ;;  %6153 = vpow2.f32 %v2451_v55  ;;  %v2100_v15 = vpop.f32.mrf.mxu2 }
 0x65b   : > { %v7152_v59 = vsel %vm2412_vm4, %v2396_v3, %v5288_v9  ;;  %v2587_v3 = vld [vmem:[%s8528_s12 + $0x20] sm:$0x1] }
 0x65c   : > { %v2398_v56 = vadd.f32 %v2349_v4, %v2286_v60  ;;  %v2030_v63 = vadd.f32 %v2029_v10, %v1965_v62  ;;  %2529 = vrot.lane.b32.xlu2 %v7152_v59, %s8569_s1  ;;  %5299 = vmatpush.msk.msra.mxu0 %vm2637_vm6, %v2587_v3  ;;  %vm5026_vm6 = vcmask 1046528  }
 0x65e   : > { %v2095_v2 = vadd.f32 %v2094_v14, %v2030_v63  ;;  %v2430_v7 = vmin.f32 %v2398_v56, 0.0  ;;  %v2364_v14 = vpop.permute.xlu0 %2363  ;;  %v2038_v40 = vpop.f32.mrf.mxu1  ;;  %vm2414_vm7 = vcmp.gt.f32.partialorder %v2398_v56, 0.0  ;;  %2653 = vmatpush.msra.mxu0 %v2586_v41 }
 0x660   : > { %v6154_v8 = vpop.eup %6153  ;;  %v2160_v6 = vadd.f32 %v2159_v29, %v2095_v2  ;;  %v2453_v26 = vmul.f32 1.442695, %v2430_v7  ;;  %2654 = vmatpush.msra.mxu0 %v2585_v44  ;;  %v2257_v51 = vpop.permute.xlu1 %2256 }
 0x661   : > { %v1967_v11 = vpop.f32.mrf.mxu0  ;;  %v5289_v13 = vadd.f32 -1.0, %v6154_v8 }
 0x662   : > { %v2287_v16 = vmul.f32 %v2242_v43, %v2160_v6  ;;  %v1968_v21 = vadd.f32 %v1967_v11, %v7115_v23  ;;  %6155 = vpow2.f32 %v2453_v26  ;;  %v2103_v42 = vpop.f32.mrf.mxu2 }
 0x663   : > { %v7157_v22 = vsel %vm2413_vm5, %v2397_v39, %v5289_v13  ;;  %v2168_v39 = vpop.f32.mrf.mxu3 }
 0x664   : > { %v2399_v4 = vadd.f32 %v2354_v45, %v2287_v16  ;;  %v2033_v18 = vadd.f32 %v2032_v46, %v1968_v21  ;;  %2531 = vrot.lane.b32.xlu2 %v7157_v22, %s8569_s1 }
 0x666   : > { %v2098_v28 = vadd.f32 %v2097_v25, %v2033_v18  ;;  %v2431_v10 = vmin.f32 %v2399_v4, 0.0  ;;  %v2369_v9 = vpop.permute.xlu0 %2368  ;;  %vm2415_vm8 = vcmp.gt.f32.partialorder %v2399_v4, 0.0 }
 0x668   : > { %v6156_v23 = vpop.eup %6155  ;;  %v2163_v30 = vadd.f32 %v2162_v38, %v2098_v28  ;;  %v2455_v17 = vmul.f32 1.442695, %v2431_v10  ;;  %v2262_v16 = vpop.permute.xlu1 %2261 }
 0x669   : > { %v1970_v29 = vpop.f32.mrf.mxu0  ;;  %v5290_v35 = vadd.f32 -1.0, %v6156_v23 }
 0x66a   : > { %v2288_v34 = vmul.f32 %v2247_v0, %v2163_v30  ;;  %v1971_v31 = vadd.f32 %v1970_v29, %v7119_v20  ;;  %6157 = vpow2.f32 %v2455_v17  ;;  %v2584_v20 = vld [vmem:[%s8528_s12 + $0x8] sm:$0xff] }
 0x66b   : > { %v7168_v1 = vsel %vm2414_vm7, %v2398_v56, %v5290_v35  ;;  %2655 = vmatpush.msra.mxu0 %v2584_v20  ;;  %v2041_v56 = vpop.f32.mrf.mxu1 }
 0x66c   : > { %v2400_v43 = vadd.f32 %v2359_v57, %v2288_v34  ;;  %v2036_v45 = vadd.f32 %v2035_v58, %v1971_v31  ;;  %2533 = vrot.lane.b32.xlu2 %v7168_v1, %s8569_s1  ;;  %v2106_v57 = vpop.f32.mrf.mxu2  ;;  %v2171_v58 = vpop.f32.mrf.mxu3 }
 0x66d   : > { %2656 = vmatpush.msra.mxu0 %v2583_v48 }
 0x66e   : > { %v2101_v49 = vadd.f32 %v2100_v15, %v2036_v45  ;;  %v2432_v46 = vmin.f32 %v2400_v43, 0.0  ;;  %vm2416_vm9 = vcmp.gt.f32.partialorder %v2400_v43, 0.0 }
 0x670   : > { %v6158_v50 = vpop.eup %6157  ;;  %v2166_v25 = vadd.f32 %v2165_v61, %v2101_v49  ;;  %v2457_v54 = vmul.f32 1.442695, %v2432_v46  ;;  %v2374_v61 = vpop.permute.xlu0 %2373 }
 0x671   : > { %v1973_v55 = vpop.f32.mrf.mxu0  ;;  %v5291_v27 = vadd.f32 -1.0, %v6158_v50 }
 0x672   : > { %v2289_v38 = vmul.f32 %v2252_v32, %v2166_v25  ;;  %v1974_v60 = vadd.f32 %v1973_v55, %v7121_v33  ;;  %6159 = vpow2.f32 %v2457_v54 }
 0x673   : > { %v7182_v62 = vsel %vm2415_vm8, %v2399_v4, %v5291_v27  ;;  %v2044_v28 = vpop.f32.mrf.mxu1 }
 0x674   : > { %v2401_v63 = vadd.f32 %v2364_v14, %v2289_v38  ;;  %v2039_v0 = vadd.f32 %v2038_v40, %v1974_v60  ;;  %2535 = vrot.lane.b32.xlu2 %v7182_v62, %s8569_s1  ;;  %v2109_v32 = vpop.f32.mrf.mxu2  ;;  %v2174_v29 = vpop.f32.mrf.mxu3 }
 0x676   : > { %v2104_v2 = vadd.f32 %v2103_v42, %v2039_v0  ;;  %v2433_v7 = vmin.f32 %v2401_v63, 0.0  ;;  %vm2417_vm10 = vcmp.gt.f32.partialorder %v2401_v63, 0.0  ;;  %v2267_v42 = vpop.permute.xlu1 %2266 }
 0x678   : > { %v6160_v8 = vpop.eup %6159  ;;  %v2169_v6 = vadd.f32 %v2168_v39, %v2104_v2  ;;  %v2459_v26 = vmul.f32 1.442695, %v2433_v7  ;;  %v2379_v44 = vpop.permute.xlu0 %2378 }
 0x679   : > { %v1976_v11 = vpop.f32.mrf.mxu0  ;;  %v5292_v13 = vadd.f32 -1.0, %v6160_v8 }
 0x67a   : > { %v2290_v33 = vmul.f32 %v2257_v51, %v2169_v6  ;;  %v1977_v15 = vadd.f32 %v1976_v11, %v7105_v5  ;;  %6161 = vpow2.f32 %v2459_v26 }
 0x67b   : > { %v7187_v21 = vsel %vm2416_vm9, %v2400_v43, %v5292_v13  ;;  %v2047_v39 = vpop.f32.mrf.mxu1 }
 0x67c   : > { %v2402_v4 = vadd.f32 %v2369_v9, %v2290_v33  ;;  %v2042_v18 = vadd.f32 %v2041_v56, %v1977_v15  ;;  %2537 = vrot.lane.b32.xlu1 %v7187_v21, %s8569_s1  ;;  %v2177_v55 = vpop.f32.mrf.mxu3 }
 0x67e   : > { %v2107_v10 = vadd.f32 %v2106_v57, %v2042_v18  ;;  %v2434_v3 = vmin.f32 %v2402_v4, 0.0  ;;  %vm2418_vm11 = vcmp.gt.f32.partialorder %v2402_v4, 0.0 }
 0x680   : > { %v6162_v23 = vpop.eup %6161  ;;  %v2172_v14 = vadd.f32 %v2171_v58, %v2107_v10  ;;  %v2461_v30 = vmul.f32 1.442695, %v2434_v3  ;;  %v2384_v2 = vpop.permute.xlu0 %2383 }
 0x681   : > { %v1979_v17 = vpop.f32.mrf.mxu0  ;;  %v5293_v5 = vadd.f32 -1.0, %v6162_v23 }
 0x682   : > { %v2291_v35 = vmul.f32 %v2262_v16, %v2172_v14  ;;  %v1980_v40 = vadd.f32 %v1979_v17, %v7109_v12  ;;  %6163 = vpow2.f32 %v2461_v30  ;;  %v2112_v12 = vpop.f32.mrf.mxu2 }
 0x683   : > { %v7192_v41 = vsel %vm2417_vm10, %v2401_v63, %v5293_v5  ;;  %v2272_v63 = vpop.permute.xlu1 %2271  ;;  %v2050_v8 = vpop.f32.mrf.mxu1 }
 0x684   : > { %v2403_v34 = vadd.f32 %v2374_v61, %v2291_v35  ;;  %v2045_v31 = vadd.f32 %v2044_v28, %v1980_v40  ;;  %2539 = vrot.lane.b32.xlu2 %v7192_v41, %s8569_s1 }
 0x686   : > { %v2435_v43 = vmin.f32 %v2403_v34, 0.0  ;;  %v2110_v45 = vadd.f32 %v2109_v32, %v2045_v31  ;;  %vm2419_vm13 = vcmp.gt.f32.partialorder %v2403_v34, 0.0 }
 0x688   : > { %v6164_v20 = vpop.eup %6163  ;;  %v2175_v49 = vadd.f32 %v2174_v29, %v2110_v45  ;;  %v2463_v46 = vmul.f32 1.442695, %v2435_v43  ;;  %v2389_v30 = vpop.permute.xlu0 %2388 }
 0x689   : > { %v1982_v48 = vpop.f32.mrf.mxu0  ;;  %v5294_v50 = vadd.f32 -1.0, %v6164_v20 }
 0x68a   : > { %v2292_v25 = vmul.f32 %v2267_v42, %v2175_v49  ;;  %v1983_v54 = vadd.f32 %v1982_v48, %v7113_v19  ;;  %6165 = vpow2.f32 %v2463_v46  ;;  %v2115_v33 = vpop.f32.mrf.mxu2 }
 0x68b   : > { %v7197_v51 = vsel %vm2418_vm11, %v2402_v4, %v5294_v50 }
 0x68c   : > { %v2404_v27 = vadd.f32 %v2379_v44, %v2292_v25  ;;  %v2048_v9 = vadd.f32 %v2047_v39, %v1983_v54  ;;  %2541 = vrot.lane.b32.xlu0 %v7197_v51, %s8569_s1 }
 0x68e   : > { %v2436_v38 = vmin.f32 %v2404_v27, 0.0  ;;  %v2113_v60 = vadd.f32 %v2112_v12, %v2048_v9  ;;  %v2520_v56 = vpop.permute.xlu2 %2519  ;;  %vm2420_vm14 = vcmp.gt.f32.partialorder %v2404_v27, 0.0 }
 0x68f   : > { %v2567_v0 = vmax.f32 %v7127_v47, %v2520_v56  ;;  %v2180_v47 = vpop.f32.mrf.mxu3 }
 0x690   : > { %v6166_v57 = vpop.eup %6165  ;;  %v2178_v19 = vadd.f32 %v2177_v55, %v2113_v60  ;;  %v2465_v7 = vmul.f32 1.442695, %v2436_v38 }
 0x691   : > { %v1985_v58 = vpop.f32.mrf.mxu0  ;;  %5300 = vmatmul.msk.f32.vlgmr.msra.gmra.mxu0 %vm2588_vm12, %v2567_v0  ;;  %v5295_v6 = vadd.f32 -1.0, %v6166_v57 }
 0x692   : > { %v2293_v26 = vmul.f32 %v2272_v63, %v2178_v19  ;;  %v1986_v11 = vadd.f32 %v1985_v58, %v7117_v24  ;;  %6167 = vpow2.f32 %v2465_v7  ;;  %v2277_v24 = vpop.permute.xlu1 %2276 }
 0x693   : > { %v7204_v13 = vsel %vm2419_vm13, %v2403_v34, %v5295_v6 }
 0x694   : > { %v2405_v15 = vadd.f32 %v2384_v2, %v2293_v26  ;;  %v2051_v16 = vadd.f32 %v2050_v8, %v1986_v11  ;;  %2543 = vrot.lane.b32.xlu1 %v7204_v13, %s8569_s1 }
 0x696   : > { %v2437_v61 = vmin.f32 %v2405_v15, 0.0  ;;  %v2116_v4 = vadd.f32 %v2115_v33, %v2051_v16  ;;  %v2522_v18 = vpop.permute.xlu2 %2521  ;;  %vm2421_vm15 = vcmp.gt.f32.partialorder %v2405_v15, 0.0 }
 0x697   : > { %v2568_v28 = vmax.f32 %v7132_v37, %v2522_v18 }
 0x698   : > { %v6168_v10 = vpop.eup %6167  ;;  %v2181_v3 = vadd.f32 %v2180_v47, %v2116_v4  ;;  %v2467_v32 = vmul.f32 1.442695, %v2437_v61 }
 0x699   : > { %5301 = vmatmul.msk.f32.gmra.mxu0 %vm2588_vm12, %v2568_v28  ;;  %v5296_v23 = vadd.f32 -1.0, %v6168_v10 }
 0x69a   : > { %v2294_v14 = vmul.f32 %v2277_v24, %v2181_v3  ;;  %6169 = vpow2.f32 %v2467_v32 }
 0x69b   : > { %v2500_v17 = vsel %vm2420_vm14, %v2404_v27, %v5296_v23  ;;  %vm4950_vm14 = vcmask 56320  }
 0x69c   : > { %v2406_v5 = vadd.f32 %v2389_v30, %v2294_v14  ;;  %2545 = vrot.lane.b32.xlu2 %v2500_v17, %s8569_s1  ;;  %v3154_v14 = vld [vmem:[#allocation4] sm:$0xff]  ;;  %v3164_v30 = vld [vmem:[#allocation4 + $0x50] sm:$0xff] }
 0x69e   : > { %v2438_v29 = vmin.f32 %v2406_v5, 0.0  ;;  %v2524_v35 = vpop.permute.xlu2 %2523  ;;  %vm2422_vm0 = vcmp.gt.f32.partialorder %v2406_v5, 0.0 }
 0x69f   : > { %v2569_v40 = vmax.f32 %v7137_v52, %v2524_v35  ;;  %v3204_v35 = vld [vmem:[#allocation4 + $0x190] sm:$0xff] }
 0x6a0   : > { %v6170_v37 = vpop.eup %6169  ;;  %v2469_v34 = vmul.f32 1.442695, %v2438_v29  ;;  %v3194_v29 = vld [vmem:[#allocation4 + $0x140] sm:$0xff] }
 0x6a1   : > { %5302 = vmatmul.msk.f32.gmra.mxu0 %vm2588_vm12, %v2569_v40  ;;  %v5297_v31 = vadd.f32 -1.0, %v6170_v37  ;;  %v3214_v40 = vld [vmem:[#allocation4 + $0x1e0] sm:$0xff] }
 0x6a2   : > { %6171 = vpow2.f32 %v2469_v34  ;;  %v3224_v34 = vld [vmem:[#allocation4 + $0x230] sm:$0xff] }
 0x6a3   : > { %v2501_v42 = vsel %vm2421_vm15, %v2405_v15, %v5297_v31 }
 0x6a4   : > { %2547 = vrot.lane.b32.xlu0 %v2501_v42, %s8569_s1 }
 0x6a6   : > { %v2526_v44 = vpop.permute.xlu2 %2525 }
 0x6a7   : > { %v2570_v43 = vmax.f32 %v7142_v53, %v2526_v44  ;;  %v3234_v44 = vld [vmem:[#allocation4 + $0x280] sm:$0xff] }
 0x6a8   : > { %v6172_v45 = vpop.eup %6171 }
 0x6a9   : > { %5303 = vmatmul.msk.f32.gmra.mxu0 %vm2588_vm12, %v2570_v43  ;;  %v5298_v39 = vadd.f32 -1.0, %v6172_v45 }
 0x6ab   : > { %v2502_v20 = vsel %vm2422_vm0, %v2406_v5, %v5298_v39  ;;  %v3184_v5 = vld [vmem:[#allocation4 + $0xf0] sm:$0xff] }
 0x6ac   : > { %2549 = vrot.lane.b32.xlu1 %v2502_v20, %s8569_s1 }
 0x6ae   : > { %v2528_v52 = vpop.permute.xlu2 %2527 }
 0x6af   : > { %v2571_v49 = vmax.f32 %v7147_v36, %v2528_v52 }
 0x6b1   : > { %5304 = vmatmul.msk.f32.gmra.mxu0 %vm2588_vm12, %v2571_v49 }
 0x6b6   : > { %v2530_v46 = vpop.permute.xlu2 %2529 }
 0x6b7   : > { %v2572_v48 = vmax.f32 %v7152_v59, %v2530_v46  ;;  %v3244_v46 = vld [vmem:[#allocation4 + $0x2d0] sm:$0xff] }
 0x6b9   : > { %5305 = vmatmul.msk.f32.gmra.mxu0 %vm2588_vm12, %v2572_v48 }
 0x6be   : > { %v2532_v50 = vpop.permute.xlu2 %2531 }
 0x6bf   : > { %v2573_v53 = vmax.f32 %v7157_v22, %v2532_v50 }
 0x6c1   : > { %5306 = vmatmul.msk.f32.gmra.mxu0 %vm2588_vm12, %v2573_v53 }
 0x6c6   : > { %v2534_v12 = vpop.permute.xlu2 %2533 }
 0x6c7   : > { %v2574_v25 = vmax.f32 %v7168_v1, %v2534_v12 }
 0x6c9   : > { %5307 = vmatmul.msk.f32.gmra.mxu0 %vm2588_vm12, %v2574_v25 }
 0x6ce   : > { %v2536_v54 = vpop.permute.xlu2 %2535 }
 0x6cf   : > { %v2575_v36 = vmax.f32 %v7182_v62, %v2536_v54 }
 0x6d1   : > { %5308 = vmatmul.msk.f32.gmra.mxu0 %vm2588_vm12, %v2575_v36  ;;  %v3254_v36 = vld [vmem:[#allocation4 + $0x320] sm:$0xff] }
 0x6de   : > { %v2540_v27 = vpop.permute.xlu2 %2539 }
 0x6df   : > { %v2577_v22 = vmax.f32 %v7192_v41, %v2540_v27 }
 0x6ee   : > { %v2538_v55 = vpop.permute.xlu1 %2537 }
 0x6ef   : > { %v2576_v59 = vmax.f32 %v7187_v21, %v2538_v55 }
 0x6f1   : > { %5309 = vmatmul.msk.f32.gmra.mxu0 %vm2588_vm12, %v2576_v59 }
 0x6f6   : > { %v2546_v60 = vpop.permute.xlu2 %2545 }
 0x6f7   : > { %v2580_v56 = vmax.f32 %v2500_v17, %v2546_v60  ;;  %v3174_v17 = vld [vmem:[#allocation4 + $0xa0] sm:$0xff] }
 0x6f9   : > { %5310 = vmatmul.msk.f32.gmra.mxu0 %vm2588_vm12, %v2577_v22 }
 0x6fe   : > { %v2542_v9 = vpop.permute.xlu0 %2541 }
 0x6ff   : > { %v2578_v1 = vmax.f32 %v7197_v51, %v2542_v9 }
 0x701   : > { %5311 = vmatmul.msk.f32.gmra.mxu0 %vm2588_vm12, %v2578_v1 }
 0x706   : > { %v2544_v38 = vpop.permute.xlu1 %2543 }
 0x707   : > { %v2579_v62 = vmax.f32 %v7204_v13, %v2544_v38 }
 0x709   : > { %5312 = vmatmul.msk.f32.gmra.mxu0 %vm2588_vm12, %v2579_v62  ;;  %v3264_v62 = vld [vmem:[#allocation4 + $0x370] sm:$0xff] }
 0x70e   : > { %v7236_v21 = vpop.f32.mrf.mxu0 }
 0x711   : > { %5313 = vmatmul.msk.f32.gmra.mxu0 %vm2588_vm12, %v2580_v56 }
 0x716   : > { %v2548_v63 = vpop.permute.xlu0 %2547  ;;  %v2661_v51 = vpop.f32.mrf.mxu0 }
 0x717   : > { %v2581_v41 = vmax.f32 %v2501_v42, %v2548_v63  ;;  %v7261_v3 = vpack.i.bf16 %v7236_v21, %v2661_v51 }
 0x719   : > { %5314 = vmatmul.msk.f32.gmra.mxu0 %vm2588_vm12, %v2581_v41 }
 0x71e   : > { %v2550_v0 = vpop.permute.xlu1 %2549  ;;  %v2664_v2 = vpop.f32.mrf.mxu0 }
 0x71f   : > { %v2582_v57 = vmax.f32 %v2502_v20, %v2550_v0 }
 0x721   : > { %5315 = vmatmul.msk.f32.gmra.mxu0 %vm2588_vm12, %v2582_v57 }
 0x726   : > { %v2667_v19 = vpop.f32.mrf.mxu0 }
 0x727   : > { %v7279_v23 = vpack.i.bf16 %v2664_v2, %v2667_v19 }
 0x72e   : > { %v2670_v7 = vpop.f32.mrf.mxu0 }
 0x736   : > { %v2673_v58 = vpop.f32.mrf.mxu0 }
 0x737   : > { %v7244_v47 = vpack.i.bf16 %v2670_v7, %v2673_v58 }
 0x73e   : > { %v2676_v8 = vpop.f32.mrf.mxu0 }
 0x746   : > { %v2679_v6 = vpop.f32.mrf.mxu0 }
 0x747   : > { %v7254_v28 = vpack.i.bf16 %v2676_v8, %v2679_v6 }
 0x74e   : > { %v2682_v26 = vpop.f32.mrf.mxu0 }
 0x76e   : > { %v2685_v11 = vpop.f32.mrf.mxu0 }
 0x76f   : > { %v7271_v24 = vpack.i.bf16 %v2682_v26, %v2685_v11 }
 0x776   : > { %v2688_v13 = vpop.f32.mrf.mxu0 }
 0x77e   : > { %v2691_v33 = vpop.f32.mrf.mxu0 }
 0x77f   : > { %v7240_v15 = vpack.i.bf16 %v2688_v13, %v2691_v33 }
 0x781   : > { %5760 = vrot.lane.b32.xlu1 %v7240_v15, %s8569_s1 }
 0x786   : > { %v2694_v16 = vpop.f32.mrf.mxu0 }
 0x789   : > { %5775 = vrot.lane.b32.xlu1 %v7244_v47, %s8569_s1 }
 0x78e   : > { %v2697_v61 = vpop.f32.mrf.mxu0 }
 0x78f   : > { %v7248_v4 = vpack.i.bf16 %v2694_v16, %v2697_v61 }
 0x791   : > { %5795 = vrot.lane.b32.xlu1 %v7240_v15, %s8576_s25  ;;  %5755 = vrot.lane.b32.xlu0 %v7248_v4, %s8569_s1 }
 0x796   : > { %v2700_v18 = vpop.f32.mrf.mxu0 }
 0x799   : > { %5800 = vrot.lane.b32.xlu1 %v7248_v4, %s8570_s0  ;;  %5770 = vrot.lane.b32.xlu0 %v7254_v28, %s8569_s1 }
 0x79e   : > { %v2703_v10 = vpop.f32.mrf.mxu0 }
 0x79f   : > { %3404 = vmatpush.msrb.mxu1 %v2703_v10  ;;  %v7263_v32 = vpack.i.bf16 %v2700_v18, %v2703_v10 }
 0x7a1   : > { %5815 = vrot.lane.b32.xlu1 %v7248_v4, %s8573_s21  ;;  %5785 = vrot.lane.b32.xlu0 %v7261_v3, %s8569_s1 }
 0x7a2   : > { %5750 = vrot.lane.b32.xlu2 %v7263_v32, %s8569_s1  ;;  %3405 = vmatpush.msrb.mxu1 %v2700_v18  ;;  %v3175_v18 = vld [vmem:[#allocation4 + $0xa8] sm:$0xff] }
 0x7a4   : > { %3406 = vmatpush.msrb.mxu1 %v2697_v61  ;;  %v3294_v61 = vld [vmem:[#allocation4 + $0x460] sm:$0xff] }
 0x7a6   : > { %3407 = vmatpush.msrb.mxu1 %v2694_v16 }
 0x7a8   : > { %3408 = vmatpush.msrb.mxu1 %v2691_v33 }
 0x7a9   : > { %5830 = vrot.lane.b32.xlu1 %v7240_v15, %s8575_s2  ;;  %5810 = vrot.lane.b32.xlu0 %v7248_v4, %s8575_s2 }
 0x7aa   : > { %5765 = vrot.lane.b32.xlu2 %v7271_v24, %s8569_s1  ;;  %3409 = vmatpush.msrb.mxu1 %v2688_v13 }
 0x7ac   : > { %3410 = vmatpush.msrb.mxu1 %v2685_v11  ;;  %v3165_v11 = vld [vmem:[#allocation4 + $0x58] sm:$0xff] }
 0x7ae   : > { %3411 = vmatpush.msrb.mxu1 %v2682_v26  ;;  %v3284_v26 = vld [vmem:[#allocation4 + $0x410] sm:$0xff] }
 0x7b0   : > { %3412 = vmatpush.msrb.mxu1 %v2679_v6 }
 0x7b1   : > { %5845 = vrot.lane.b32.xlu1 %v7244_v47, %s8576_s25  ;;  %5825 = vrot.lane.b32.xlu0 %v7254_v28, %s8576_s25 }
 0x7b2   : > { %5780 = vrot.lane.b32.xlu2 %v7279_v23, %s8569_s1  ;;  %3413 = vmatpush.msrb.mxu1 %v2676_v8 }
 0x7b4   : > { %3414 = vmatpush.msrb.mxu1 %v2673_v58 }
 0x7b6   : > { %3415 = vmatpush.msrb.mxu1 %v2670_v7  ;;  %v3155_v7 = vld [vmem:[#allocation4 + $0x8] sm:$0xff] }
 0x7b8   : > { %3416 = vmatpush.msrb.mxu1 %v2667_v19 }
 0x7b9   : > { %5840 = vrot.lane.b32.xlu0 %v7271_v24, %s8570_s0  ;;  %5860 = vrot.lane.b32.xlu1 %v7263_v32, %s8576_s25 }
 0x7ba   : > { %5790 = vrot.lane.b32.xlu2 %v7248_v4, %s8576_s25  ;;  %3417 = vmatpush.msrb.mxu1 %v2664_v2 }
 0x7bc   : > { %3418 = vmatpush.msrb.mxu1 %v2661_v51  ;;  %v3274_v51 = vld [vmem:[#allocation4 + $0x3c0] sm:$0xff] }
 0x7be   : > { %3419 = vmatpush.msrb.mxu1 %v7236_v21 }
 0x7bf   : > { %3420 = vmatmul.f32.vlgmr.msrb.gmra.mxu1 %v3154_v14 }
 0x7c1   : > { %5855 = vrot.lane.b32.xlu0 %v7271_v24, %s8573_s21  ;;  %5865 = vrot.lane.b32.xlu1 %v7254_v28, %s8570_s0 }
 0x7c2   : > { %5805 = vrot.lane.b32.xlu2 %v7271_v24, %s8576_s25 }
 0x7c7   : > { %3423 = vmatmul.f32.gmra.mxu1 %v3164_v30 }
 0x7c9   : > { %5875 = vrot.lane.b32.xlu0 %v7254_v28, %s8575_s2  ;;  %5880 = vrot.lane.b32.xlu1 %v7254_v28, %s8573_s21 }
 0x7ca   : > { %5820 = vrot.lane.b32.xlu2 %v7240_v15, %s8570_s0 }
 0x7cf   : > { %3426 = vmatmul.f32.gmra.mxu1 %v3174_v17 }
 0x7d1   : > { %5885 = vrot.lane.b32.xlu0 %v7263_v32, %s8570_s0  ;;  %5910 = vrot.lane.b32.xlu1 %v7244_v47, %s8575_s2 }
 0x7d2   : > { %5835 = vrot.lane.b32.xlu2 %v7240_v15, %s8573_s21 }
 0x7d7   : > { %3429 = vmatmul.f32.gmra.mxu1 %v3184_v5  ;;  %v3304_v5 = vld [vmem:[#allocation4 + $0x4b0] sm:$0xff] }
 0x7d9   : > { %5900 = vrot.lane.b32.xlu0 %v7263_v32, %s8573_s21  ;;  %5925 = vrot.lane.b32.xlu1 %v7279_v23, %s8575_s2 }
 0x7da   : > { %5850 = vrot.lane.b32.xlu2 %v7271_v24, %s8575_s2 }
 0x7df   : > { %3432 = vmatmul.f32.gmra.mxu1 %v3194_v29 }
 0x7e1   : > { %5905 = vrot.lane.b32.xlu0 %v7261_v3, %s8576_s25  ;;  %5940 = vrot.lane.b32.xlu1 %v7261_v3, %s8575_s2 }
 0x7e2   : > { %5870 = vrot.lane.b32.xlu2 %v7279_v23, %s8576_s25  ;;  %s5387_s25 = smul.u32 200, %s8616_s28 }
 0x7e4   : > { %s8444_s4 = scalar_lea.vmem %s8533_s17, %s5387_s25 }
 0x7e7   : > { %3435 = vmatmul.f32.gmra.mxu1 %v3204_v35 }
 0x7e9   : > { %5920 = vrot.lane.b32.xlu0 %v7279_v23, %s8570_s0  ;;  %5950 = vrot.lane.b32.xlu1 %v7248_v4, %s8571_s29 }
 0x7ea   : > { %5890 = vrot.lane.b32.xlu2 %v7263_v32, %s8575_s2 }
 0x7ef   : > { %3438 = vmatmul.f32.gmra.mxu1 %v3214_v40  ;;  %v3185_v40 = vld [vmem:[#allocation4 + $0xf8] sm:$0xff] }
 0x7f1   : > { %5935 = vrot.lane.b32.xlu0 %v7261_v3, %s8570_s0  ;;  %5965 = vrot.lane.b32.xlu1 %v7271_v24, %s8571_s29 }
 0x7f2   : > { %5895 = vrot.lane.b32.xlu2 %v7244_v47, %s8570_s0 }
 0x7f3   : > { %v5761_v37 = vpop.permute.xlu1 %5760 }
 0x7f4   : > { %v5762_v50 = vunpack.i.l.bf16 %v5761_v37  ;;  %v5763_v53 = vunpack.i.h.bf16 %v5761_v37 }
 0x7f7   : > { %3441 = vmatmul.f32.gmra.mxu1 %v3224_v34 }
 0x7f9   : > { %5955 = vrot.lane.b32.xlu0 %v7240_v15, %s8571_s29  ;;  %5980 = vrot.lane.b32.xlu1 %v7240_v15, %s8572_s19 }
 0x7fa   : > { %5915 = vrot.lane.b32.xlu2 %v7244_v47, %s8573_s21 }
 0x7fb   : > { %v5776_v31 = vpop.permute.xlu1 %5775 }
 0x7fc   : > { %v5751_v42 = vpop.permute.xlu2 %5750  ;;  %v5777_v60 = vunpack.i.l.bf16 %v5776_v31  ;;  %v5778_v56 = vunpack.i.h.bf16 %v5776_v31 }
 0x7fd   : > { %v5752_v43 = vunpack.i.l.bf16 %v5751_v42  ;;  %v5753_v45 = vunpack.i.h.bf16 %v5751_v42 }
 0x7ff   : > { %3444 = vmatmul.f32.gmra.mxu1 %v3234_v44  ;;  %3496 = vmatpush.msrb.mxu2 %v5752_v43  ;;  %v3314_v43 = vld [vmem:[#allocation4 + $0x500] sm:$0xff] }
 0x801   : > { %3497 = vmatpush.msrb.mxu2 %v5753_v45  ;;  %5960 = vrot.lane.b32.xlu0 %v7248_v4, %s8572_s19 }
 0x802   : > { %5995 = vrot.lane.b32.xlu1 %v7240_v15, %s8574_s27  ;;  %5930 = vrot.lane.b32.xlu2 %v7279_v23, %s8573_s21 }
 0x803   : > { %v7348_v39 = vpop.permute.xlu1 %5795  ;;  %v5756_v20 = vpop.permute.xlu0 %5755 }
 0x804   : > { %v5757_v52 = vunpack.i.l.bf16 %v5756_v20  ;;  %v5766_v49 = vpop.permute.xlu2 %5765  ;;  %v5758_v48 = vunpack.i.h.bf16 %v5756_v20  ;;  %v5797_v29 = vunpack.i.l.bf16 %v7348_v39  ;;  %v5798_v35 = vunpack.i.h.bf16 %v7348_v39  ;;  %v4326_v39 = vld [vmem:[%s8530_s14 + $0x10] sm:$0xff]  ;;  %v3195_v20 = vld [vmem:[#allocation4 + $0x148] sm:$0xff] }
 0x805   : > { %v5767_v55 = vunpack.i.l.bf16 %v5766_v49  ;;  %v5768_v59 = vunpack.i.h.bf16 %v5766_v49 }
 0x806   : > { %3498 = vmatpush.msrb.mxu2 %v5757_v52 }
 0x807   : > { %3447 = vmatmul.f32.gmra.mxu1 %v3244_v46 }
 0x808   : > { %3499 = vmatpush.msrb.mxu2 %v5758_v48 }
 0x809   : > { %5975 = vrot.lane.b32.xlu0 %v7248_v4, %s8574_s27 }
 0x80a   : > { %6010 = vrot.lane.b32.xlu1 %v7271_v24, %s8568_s30  ;;  %5945 = vrot.lane.b32.xlu2 %v7261_v3, %s8573_s21 }
 0x80b   : > { %3500 = vmatpush.msrb.mxu2 %v5762_v50  ;;  %v7356_v12 = vpop.permute.xlu1 %5800  ;;  %v5771_v25 = vpop.permute.xlu0 %5770 }
 0x80c   : > { %v5781_v54 = vpop.permute.xlu2 %5780  ;;  %v5772_v27 = vunpack.i.l.bf16 %v5771_v25  ;;  %v5773_v22 = vunpack.i.h.bf16 %v5771_v25 }
 0x80d   : > { %3501 = vmatpush.msrb.mxu2 %v5763_v53  ;;  %v5782_v21 = vunpack.i.l.bf16 %v5781_v54  ;;  %v5783_v63 = vunpack.i.h.bf16 %v5781_v54  ;;  %v3324_v54 = vld [vmem:[#allocation4 + $0x550] sm:$0xff] }
 0x80f   : > { %3450 = vmatmul.f32.gmra.mxu1 %v3254_v36  ;;  %3502 = vmatpush.msrb.mxu2 %v5767_v55 }
 0x811   : > { %3503 = vmatpush.msrb.mxu2 %v5768_v59  ;;  %5990 = vrot.lane.b32.xlu0 %v7240_v15, %s8568_s30 }
 0x812   : > { %6030 = vrot.lane.b32.xlu1 %v7279_v23, %s8571_s29  ;;  %5970 = vrot.lane.b32.xlu2 %v7248_v4, %s8568_s30 }
 0x813   : > { %3504 = vmatpush.msrb.mxu2 %v5772_v27  ;;  %v7364_v9 = vpop.permute.xlu1 %5815  ;;  %v5786_v1 = vpop.permute.xlu0 %5785 }
 0x814   : > { %v5791_v38 = vpop.permute.xlu2 %5790  ;;  %v5787_v2 = vunpack.i.l.bf16 %v5786_v1  ;;  %v5788_v19 = vunpack.i.h.bf16 %v5786_v1  ;;  %v3205_v1 = vld [vmem:[#allocation4 + $0x198] sm:$0xff] }
 0x815   : > { %3505 = vmatpush.msrb.mxu2 %v5773_v22  ;;  %v5792_v10 = vunpack.i.l.bf16 %v5791_v38 }
 0x817   : > { %3453 = vmatmul.f32.gmra.mxu1 %v3264_v62  ;;  %3506 = vmatpush.msrb.mxu2 %v5777_v60 }
 0x819   : > { %3507 = vmatpush.msrb.mxu2 %v5778_v56  ;;  %6005 = vrot.lane.b32.xlu0 %v7244_v47, %s8571_s29 }
 0x81a   : > { %6050 = vrot.lane.b32.xlu1 %v7263_v32, %s8568_s30  ;;  %5985 = vrot.lane.b32.xlu2 %v7254_v28, %s8571_s29 }
 0x81b   : > { %3508 = vmatpush.msrb.mxu2 %v5782_v21  ;;  %v7372_v41 = vpop.permute.xlu1 %5830  ;;  %v7374_v0 = vpop.permute.xlu0 %5810  ;;  %v5803_v21 = vunpack.i.h.bf16 %v7356_v12 }
 0x81c   : > { %v7376_v57 = vpop.permute.xlu2 %5805  ;;  %v5812_v62 = vunpack.i.l.bf16 %v7374_v0 }
 0x81d   : > { %3509 = vmatpush.msrb.mxu2 %v5783_v63  ;;  %v5808_v37 = vunpack.i.h.bf16 %v7376_v57  ;;  %v5813_v63 = vunpack.i.h.bf16 %v7374_v0  ;;  %v5833_v0 = vunpack.i.h.bf16 %v7372_v41 }
 0x81f   : > { %3456 = vmatmul.f32.gmra.mxu1 %v3274_v51  ;;  %3510 = vmatpush.msrb.mxu2 %v5787_v2 }
 0x821   : > { %3511 = vmatpush.msrb.mxu2 %v5788_v19  ;;  %6020 = vrot.lane.b32.xlu0 %v7263_v32, %s8571_s29  ;;  %v3334_v19 = vld [vmem:[#allocation4 + $0x5a0] sm:$0xff] }
 0x822   : > { %6055 = vrot.lane.b32.xlu1 %v7244_v47, %s8572_s19  ;;  %6000 = vrot.lane.b32.xlu2 %v7271_v24, %s8572_s19 }
 0x823   : > { %3512 = vmatmul.f32.vlgmr.msrb.gmra.mxu2 %v3155_v7  ;;  %v7384_v58 = vpop.permute.xlu1 %5845  ;;  %v5826_v8 = vpop.permute.xlu0 %5825  ;;  %v5832_v7 = vunpack.i.l.bf16 %v7372_v41 }
 0x824   : > { %v7386_v6 = vpop.permute.xlu2 %5820  ;;  %v5827_v45 = vunpack.i.l.bf16 %v5826_v8  ;;  %v5847_v52 = vunpack.i.l.bf16 %v7384_v58  ;;  %v5848_v49 = vunpack.i.h.bf16 %v7384_v58  ;;  %v4500_v58 = vld [vmem:[%s8531_s15 + $0x8] sm:$0xff] }
 0x827   : > { %3459 = vmatmul.f32.gmra.mxu1 %v3284_v26  ;;  %v4329_v26 = vld [vmem:[%s8530_s14 + $0x28] sm:$0xff] }
 0x829   : > { %6025 = vrot.lane.b32.xlu0 %v7254_v28, %s8572_s19 }
 0x82a   : > { %6075 = vrot.lane.b32.xlu1 %v7244_v47, %s8574_s27  ;;  %6015 = vrot.lane.b32.xlu2 %v7271_v24, %s8574_s27  ;;  %v5793_v24 = vunpack.i.h.bf16 %v5791_v38  ;;  %v5802_v38 = vunpack.i.l.bf16 %v7356_v12  ;;  %v5822_v12 = vunpack.i.l.bf16 %v7386_v6 }
 0x82b   : > { %3515 = vmatmul.f32.gmra.mxu2 %v3165_v11  ;;  %v7394_v13 = vpop.permute.xlu0 %5840  ;;  %v5861_v33 = vpop.permute.xlu1 %5860  ;;  %v5823_v11 = vunpack.i.h.bf16 %v7386_v6 }
 0x82c   : > { %v5862_v15 = vunpack.i.l.bf16 %v5861_v33  ;;  %v7396_v16 = vpop.permute.xlu2 %5835  ;;  %v5863_v4 = vunpack.i.h.bf16 %v5861_v33  ;;  %v3215_v33 = vld [vmem:[#allocation4 + $0x1e8] sm:$0xff] }
 0x82e   : > { %3588 = vmatpush.msra.mxu3 %v5862_v15  ;;  %v5817_v15 = vunpack.i.l.bf16 %v7364_v9 }
 0x82f   : > { %3462 = vmatmul.f32.gmra.mxu1 %v3294_v61 }
 0x830   : > { %3589 = vmatpush.msra.mxu3 %v5863_v4 }
 0x831   : > { %6040 = vrot.lane.b32.xlu0 %v7254_v28, %s8574_s27 }
 0x832   : > { %6090 = vrot.lane.b32.xlu1 %v7279_v23, %s8574_s27  ;;  %6035 = vrot.lane.b32.xlu2 %v7254_v28, %s8568_s30  ;;  %v5807_v28 = vunpack.i.l.bf16 %v7376_v57 }
 0x833   : > { %3518 = vmatmul.f32.gmra.mxu2 %v3175_v18  ;;  %3590 = vmatpush.msra.mxu3 %v5792_v10  ;;  %v7404_v14 = vpop.permute.xlu0 %5855  ;;  %v7406_v30 = vpop.permute.xlu1 %5865  ;;  %v5842_v18 = vunpack.i.l.bf16 %v7394_v13 }
 0x834   : > { %v7408_v17 = vpop.permute.xlu2 %5850 }
 0x835   : > { %3591 = vmatpush.msra.mxu3 %v5793_v24  ;;  %v5852_v61 = vunpack.i.l.bf16 %v7408_v17 }
 0x837   : > { %3465 = vmatmul.f32.gmra.mxu1 %v3304_v5  ;;  %3592 = vmatpush.msra.mxu3 %v5797_v29  ;;  %v5818_v5 = vunpack.i.h.bf16 %v7364_v9  ;;  %v5853_v29 = vunpack.i.h.bf16 %v7408_v17  ;;  %v5838_v9 = vunpack.i.h.bf16 %v7396_v16 }
 0x839   : > { %3593 = vmatpush.msra.mxu3 %v5798_v35  ;;  %6070 = vrot.lane.b32.xlu0 %v7244_v47, %s8568_s30  ;;  %v5828_v47 = vunpack.i.h.bf16 %v5826_v8  ;;  %v3344_v35 = vld [vmem:[#allocation4 + $0x5f0] sm:$0xff] }
 0x83a   : > { %6105 = vrot.lane.b32.xlu1 %v7261_v3, %s8574_s27  ;;  %6045 = vrot.lane.b32.xlu2 %v7263_v32, %s8572_s19 }
 0x83b   : > { %3521 = vmatmul.f32.gmra.mxu2 %v3185_v40  ;;  %3594 = vmatpush.msra.mxu3 %v5807_v28  ;;  %v7420_v34 = vpop.permute.xlu0 %5875  ;;  %v7422_v31 = vpop.permute.xlu1 %5880  ;;  %v5843_v40 = vunpack.i.h.bf16 %v7394_v13  ;;  %v5837_v28 = vunpack.i.l.bf16 %v7396_v16  ;;  %v4327_v13 = vld [vmem:[%s8530_s14 + $0x18] sm:$0xff]  ;;  %v3156_v16 = vld [vmem:[#allocation4 + $0x10] sm:$0xff] }
 0x83c   : > { %v5871_v42 = vpop.permute.xlu2 %5870  ;;  %v7424_v44 = vpop.f32.mrf.mxu1  ;;  %v5878_v17 = vunpack.i.h.bf16 %v7420_v34 }
 0x83d   : > { %3595 = vmatpush.msra.mxu3 %v5808_v37  ;;  %v5872_v36 = vunpack.i.l.bf16 %v5871_v42  ;;  %v5873_v27 = vunpack.i.h.bf16 %v5871_v42  ;;  %v5867_v37 = vunpack.i.l.bf16 %v7406_v30 }
 0x83f   : > { %3468 = vmatmul.f32.gmra.mxu1 %v3314_v43  ;;  %3596 = vmatpush.msra.mxu3 %v5827_v45  ;;  %v5868_v43 = vunpack.i.h.bf16 %v7406_v30  ;;  %v4505_v45 = vld [vmem:[%s8531_s15 + $0x30] sm:$0xff]  ;;  %v5857_v30 = vunpack.i.l.bf16 %v7404_v14 }
 0x841   : > { %3597 = vmatpush.msra.mxu3 %v5828_v47  ;;  %6085 = vrot.lane.b32.xlu0 %v7279_v23, %s8568_s30  ;;  %v3225_v47 = vld [vmem:[#allocation4 + $0x238] sm:$0xff] }
 0x842   : > { %4361 = vperm.xlu1 %5477, %v4326_v39   ;;  %6060 = vrot.lane.b32.xlu2 %v7263_v32, %s8574_s27  ;;  %v4502_v32 = vld [vmem:[%s8531_s15 + $0x18] sm:$0xff] }
 0x843   : > { %3524 = vmatmul.f32.gmra.mxu2 %v3195_v20  ;;  %3598 = vmatpush.msra.mxu3 %v5847_v52  ;;  %v5886_v46 = vpop.permute.xlu0 %5885  ;;  %v7435_v48 = vpop.permute.xlu1 %5910 }
 0x844   : > { %v5887_v50 = vunpack.i.l.bf16 %v5886_v46  ;;  %v5891_v53 = vpop.permute.xlu2 %5890  ;;  %v7437_v25 = vpop.f32.mrf.mxu1  ;;  %v5888_v59 = vunpack.i.h.bf16 %v5886_v46  ;;  %v3354_v46 = vld [vmem:[#allocation4 + $0x640] sm:$0xff] }
 0x845   : > { %v5892_v55 = vunpack.i.l.bf16 %v5891_v53  ;;  %3599 = vmatpush.msra.mxu3 %v5848_v49  ;;  %v5893_v22 = vunpack.i.h.bf16 %v5891_v53  ;;  %v5912_v49 = vunpack.i.l.bf16 %v7435_v48  ;;  %v5858_v53 = vunpack.i.h.bf16 %v7404_v14 }
 0x846   : > { %3864 = vmatpush.msra.mxu2 %v5887_v50  ;;  %v5883_v14 = vunpack.i.h.bf16 %v7422_v31 }
 0x847   : > { %3471 = vmatmul.f32.gmra.mxu1 %v3324_v54  ;;  %3600 = vmatpush.msra.mxu3 %v5872_v36  ;;  %v5913_v54 = vunpack.i.h.bf16 %v7435_v48 }
 0x848   : > { %3680 = vmatpush.msrb.mxu0 %v5892_v55  ;;  %3865 = vmatpush.msra.mxu2 %v5888_v59  ;;  %v5882_v59 = vunpack.i.l.bf16 %v7422_v31 }
 0x849   : > { %3601 = vmatpush.msra.mxu3 %v5873_v27  ;;  %6100 = vrot.lane.b32.xlu0 %v7261_v3, %s8568_s30  ;;  %v4503_v27 = vld [vmem:[%s8531_s15 + $0x20] sm:$0xff] }
 0x84a   : > { %3681 = vmatpush.msrb.mxu0 %v5893_v22  ;;  %4541 = vperm.xlu1 %5477, %v4502_v32   ;;  %v4332_v32 = vld [vmem:[%s8530_s14 + $0x40] sm:$0xff] }
 0x84b   : > { %6065 = vrot.lane.b32.xlu2 %v7261_v3, %s8571_s29  ;;  %3527 = vmatmul.f32.gmra.mxu2 %v3205_v1  ;;  %v5901_v60 = vpop.permute.xlu0 %5900  ;;  %v7448_v56 = vpop.permute.xlu1 %5925 }
 0x84c   : > { %3682 = vmatpush.msrb.mxu0 %v5812_v62  ;;  %3866 = vmatpush.msra.mxu2 %v5802_v38  ;;  %v5902_v57 = vunpack.i.l.bf16 %v5901_v60  ;;  %v7452_v51 = vpop.permute.xlu2 %5895  ;;  %v7454_v2 = vpop.f32.mrf.mxu1  ;;  %v5903_v8 = vunpack.i.h.bf16 %v5901_v60  ;;  %v5928_v48 = vunpack.i.h.bf16 %v7448_v56  ;;  %v4325_v62 = vld [vmem:[%s8530_s14 + $0x8] sm:$0xff] }
 0x84d   : > { %v5897_v50 = vunpack.i.l.bf16 %v7452_v51  ;;  %v5898_v36 = vunpack.i.h.bf16 %v7452_v51  ;;  %v3235_v60 = vld [vmem:[#allocation4 + $0x288] sm:$0xff] }
 0x84e   : > { %3683 = vmatpush.msrb.mxu0 %v5813_v63  ;;  %3867 = vmatpush.msra.mxu2 %v5803_v21 }
 0x84f   : > { %3474 = vmatmul.f32.gmra.mxu1 %v3334_v19  ;;  %v3364_v19 = vld [vmem:[#allocation4 + $0x690] sm:$0xff] }
 0x850   : > { %3684 = vmatpush.msrb.mxu0 %v5832_v7  ;;  %3772 = vmatpush.msra.mxu1 %v5902_v57 }
 0x851   : > { %3868 = vmatpush.msra.mxu2 %v5822_v12  ;;  %4531 = vperm.xlu0 %5476, %v4500_v58   ;;  %v3157_v58 = vld [vmem:[#allocation4 + $0x18] sm:$0xff] }
 0x852   : > { %3685 = vmatpush.msrb.mxu0 %v5833_v0  ;;  %3773 = vmatpush.msra.mxu1 %v5903_v8  ;;  %v4330_v0 = vld [vmem:[%s8530_s14 + $0x30] sm:$0xff] }
 0x853   : > { %3869 = vmatpush.msra.mxu2 %v5823_v11  ;;  %4376 = vperm.xlu1 %5477, %v4329_v26   ;;  %v5906_v41 = vpop.permute.xlu0 %5905  ;;  %v7468_v4 = vpop.permute.xlu1 %5940  ;;  %v4333_v11 = vld [vmem:[%s8530_s14 + $0x48] sm:$0xff] }
 0x854   : > { %6080 = vrot.lane.b32.xlu2 %v7279_v23, %s8572_s19  ;;  %3530 = vmatmul.f32.gmra.mxu2 %v3215_v33  ;;  %v5907_v6 = vunpack.i.l.bf16 %v5906_v41  ;;  %v7473_v10 = vpop.permute.xlu2 %5915  ;;  %v7475_v24 = vpop.f32.mrf.mxu1  ;;  %v5877_v23 = vunpack.i.l.bf16 %v7420_v34  ;;  %v5908_v42 = vunpack.i.h.bf16 %v5906_v41  ;;  %v5942_v57 = vunpack.i.l.bf16 %v7468_v4 }
 0x855   : > { %3686 = vmatpush.msrb.mxu0 %v5852_v61  ;;  %3774 = vmatpush.msra.mxu1 %v5817_v15  ;;  %v5917_v51 = vunpack.i.l.bf16 %v7473_v10  ;;  %v5943_v7 = vunpack.i.h.bf16 %v7468_v4  ;;  %v5918_v12 = vunpack.i.h.bf16 %v7473_v10  ;;  %v4501_v61 = vld [vmem:[%s8531_s15 + $0x10] sm:$0xff] }
 0x856   : > { %3870 = vmatpush.msra.mxu2 %v5842_v18  ;;  %3602 = vmatpush.msra.mxu3 %v5907_v6  ;;  %v3245_v6 = vld [vmem:[#allocation4 + $0x2d8] sm:$0xff]  ;;  %v3176_v10 = vld [vmem:[#allocation4 + $0xb0] sm:$0xff] }
 0x857   : > { %3687 = vmatpush.msrb.mxu0 %v5853_v29  ;;  %3775 = vmatpush.msra.mxu1 %v5818_v5  ;;  %v3374_v29 = vld [vmem:[#allocation4 + $0x6e0] sm:$0xff] }
 0x858   : > { %3871 = vmatpush.msra.mxu2 %v5843_v40  ;;  %3477 = vmatmul.f32.gmra.mxu1 %v3344_v35  ;;  %v3167_v35 = vld [vmem:[#allocation4 + $0x68] sm:$0xff] }
 0x859   : > { %3688 = vmatpush.msrb.mxu0 %v5877_v23  ;;  %3776 = vmatpush.msra.mxu1 %v5837_v28  ;;  %v4506_v28 = vld [vmem:[%s8531_s15 + $0x38] sm:$0xff]  ;;  %v4334_v23 = vld [vmem:[%s8530_s14 + $0x50] sm:$0xff] }
 0x85a   : > { %3872 = vmatpush.msra.mxu2 %v5867_v37  ;;  %3603 = vmatpush.msra.mxu3 %v5908_v42  ;;  %v4328_v42 = vld [vmem:[%s8530_s14 + $0x20] sm:$0xff] }
 0x85b   : > { %3689 = vmatpush.msrb.mxu0 %v5878_v17  ;;  %3777 = vmatpush.msra.mxu1 %v5838_v9  ;;  %v5921_v39 = vpop.permute.xlu0 %5920  ;;  %v7492_v34 = vpop.permute.xlu1 %5950 }
 0x85c   : > { %3873 = vmatpush.msra.mxu2 %v5868_v43  ;;  %4366 = vperm.xlu0 %5476, %v4327_v13   ;;  %v7494_v20 = vpop.permute.xlu2 %5930  ;;  %v7496_v52 = vpop.f32.mrf.mxu1  ;;  %v5922_v55 = vunpack.i.l.bf16 %v5921_v39  ;;  %v5923_v38 = vunpack.i.h.bf16 %v5921_v39  ;;  %v3255_v13 = vld [vmem:[#allocation4 + $0x328] sm:$0xff]  ;;  %v3186_v43 = vld [vmem:[#allocation4 + $0x100] sm:$0xff] }
 0x85d   : > { %4556 = vperm.xlu1 %5477, %v4505_v45   ;;  %6095 = vrot.lane.b32.xlu2 %v7261_v3, %s8572_s19  ;;  %v5927_v3 = vunpack.i.l.bf16 %v7448_v56  ;;  %v3166_v56 = vld [vmem:[#allocation4 + $0x60] sm:$0xff]  ;;  %v5932_v26 = vunpack.i.l.bf16 %v7494_v20  ;;  %v5933_v18 = vunpack.i.h.bf16 %v7494_v20  ;;  %v4335_v20 = vld [vmem:[%s8530_s14 + $0x58] sm:$0xff] }
 0x85e   : > { %3533 = vmatmul.f32.gmra.mxu2 %v3225_v47  ;;  %3604 = vmatmul.f32.vlgmr.msra.gmra.mxu3 %v3156_v16  ;;  %v3384_v47 = vld [vmem:[#allocation4 + $0x730] sm:$0xff]  ;;  %v3177_v16 = vld [vmem:[#allocation4 + $0xb8] sm:$0xff]  ;;  %v4507_v39 = vld [vmem:[%s8531_s15 + $0x40] sm:$0xff] }
 0x85f   : > { %3690 = vmatpush.msrb.mxu0 %v5912_v49  ;;  %3778 = vmatpush.msra.mxu1 %v5857_v30  ;;  %v4504_v49 = vld [vmem:[%s8531_s15 + $0x28] sm:$0xff] }
 0x860   : > { %3874 = vmatpush.msra.mxu2 %v5897_v50  ;;  %3480 = vmatmul.f32.gmra.mxu1 %v3354_v46 }
 0x861   : > { %3691 = vmatpush.msrb.mxu0 %v5913_v54  ;;  %3779 = vmatpush.msra.mxu1 %v5858_v53  ;;  %v3265_v53 = vld [vmem:[#allocation4 + $0x378] sm:$0xff]  ;;  %v3196_v54 = vld [vmem:[#allocation4 + $0x150] sm:$0xff] }
 0x862   : > { %3875 = vmatpush.msra.mxu2 %v5898_v36 }
 0x863   : > { %3692 = vmatpush.msrb.mxu0 %v5927_v3  ;;  %3780 = vmatpush.msra.mxu1 %v5882_v59  ;;  %v5936_v22 = vpop.permute.xlu0 %5935  ;;  %v7516_v1 = vpop.permute.xlu1 %5965  ;;  %v3187_v59 = vld [vmem:[#allocation4 + $0x108] sm:$0xff] }
 0x864   : > { %3876 = vmatpush.msra.mxu2 %v5922_v55  ;;  %4546 = vperm.xlu0 %5476, %v4503_v27   ;;  %v5946_v31 = vpop.permute.xlu2 %5945  ;;  %v7521_v21 = vpop.f32.mrf.mxu1  ;;  %v5937_v63 = vunpack.i.l.bf16 %v5936_v22  ;;  %v5938_v8 = vunpack.i.h.bf16 %v5936_v22  ;;  %v3394_v55 = vld [vmem:[#allocation4 + $0x780] sm:$0xff]  ;;  %v4508_v3 = vld [vmem:[%s8531_s15 + $0x48] sm:$0xff] }
 0x865   : > { %3693 = vmatpush.msrb.mxu0 %v5928_v48  ;;  %3781 = vmatpush.msra.mxu1 %v5883_v14  ;;  %v5947_v5 = vunpack.i.l.bf16 %v5946_v31  ;;  %v5948_v40 = vunpack.i.h.bf16 %v5946_v31  ;;  %v4336_v27 = vld [vmem:[%s8530_s14 + $0x60] sm:$0xff]  ;;  %v4331_v48 = vld [vmem:[%s8530_s14 + $0x38] sm:$0xff] }
 0x866   : > { %3877 = vmatpush.msra.mxu2 %v5923_v38  ;;  %4391 = vperm.xlu1 %5477, %v4332_v32   ;;  %v3275_v38 = vld [vmem:[#allocation4 + $0x3c8] sm:$0xff]  ;;  %v3158_v31 = vld [vmem:[#allocation4 + $0x20] sm:$0xff] }
 0x867   : > { %4356 = vperm.xlu2 %5478, %v4325_v62   ;;  %3536 = vmatmul.f32.gmra.mxu2 %v3235_v60  ;;  %v3206_v62 = vld [vmem:[#allocation4 + $0x1a0] sm:$0xff] }
 0x868   : > { %3607 = vmatmul.f32.gmra.mxu3 %v3166_v56  ;;  %3694 = vmatpush.msrb.mxu0 %v5942_v57  ;;  %v3197_v56 = vld [vmem:[#allocation4 + $0x158] sm:$0xff]  ;;  %v4337_v57 = vld [vmem:[%s8530_s14 + $0x68] sm:$0xff] }
 0x869   : > { %3782 = vmatpush.msra.mxu1 %v5917_v51  ;;  %3878 = vmatpush.msra.mxu2 %v5937_v63  ;;  %v4509_v63 = vld [vmem:[%s8531_s15 + $0x50] sm:$0xff] }
 0x86a   : > { %3695 = vmatpush.msrb.mxu0 %v5943_v7  ;;  %3483 = vmatmul.f32.gmra.mxu1 %v3364_v19 }
 0x86b   : > { %3783 = vmatpush.msra.mxu1 %v5918_v12  ;;  %3696 = vmatmul.f32.vlgmr.msrb.gmra.mxu0 %v3157_v58  ;;  %v7534_v33 = vpop.permute.xlu0 %5955  ;;  %v7536_v15 = vpop.permute.xlu1 %5980  ;;  %v3285_v58 = vld [vmem:[#allocation4 + $0x418] sm:$0xff]  ;;  %v3216_v12 = vld [vmem:[#allocation4 + $0x1f0] sm:$0xff] }
 0x86c   : > { %3879 = vmatpush.msra.mxu2 %v5938_v8  ;;  %4381 = vperm.xlu0 %5476, %v4330_v0   ;;  %v7541_v41 = vpop.permute.xlu2 %5970  ;;  %v7543_v4 = vpop.f32.mrf.mxu1 }
 0x86d   : > { %3784 = vmatpush.msra.mxu1 %v5932_v26 }
 0x86e   : > { %4396 = vperm.xlu1 %5477, %v4333_v11   ;;  %v3168_v11 = vld [vmem:[#allocation4 + $0x70] sm:$0xff] }
 0x86f   : > { %3785 = vmatpush.msra.mxu1 %v5933_v18  ;;  %4536 = vperm.xlu2 %5478, %v4501_v61   ;;  %v3207_v61 = vld [vmem:[#allocation4 + $0x1a8] sm:$0xff]  ;;  %v4510_v18 = vld [vmem:[%s8531_s15 + $0x58] sm:$0xff] }
 0x870   : > { %3539 = vmatmul.f32.gmra.mxu2 %v3245_v6  ;;  %3610 = vmatmul.f32.gmra.mxu3 %v3176_v10  ;;  %v5972_v6 = vunpack.i.l.bf16 %v7541_v41  ;;  %v4338_v10 = vld [vmem:[%s8530_s14 + $0x70] sm:$0xff] }
 0x871   : > { %3786 = vmatpush.msra.mxu1 %v5947_v5 }
 0x872   : > { %3486 = vmatmul.f32.gmra.mxu1 %v3374_v29  ;;  %v5973_v29 = vunpack.i.h.bf16 %v7541_v41 }
 0x873   : > { %3787 = vmatpush.msra.mxu1 %v5948_v40  ;;  %3699 = vmatmul.f32.gmra.mxu0 %v3167_v35  ;;  %v7552_v37 = vpop.permute.xlu0 %5960 }
 0x874   : > { %4561 = vperm.xlu0 %5476, %v4506_v28   ;;  %v7557_v9 = vpop.permute.xlu1 %5995  ;;  %v7559_v17 = vpop.permute.xlu2 %5985  ;;  %v3295_v28 = vld [vmem:[#allocation4 + $0x468] sm:$0xff] }
 0x875   : > { %v7561_v45 = vpop.f32.mrf.mxu1 }
 0x876   : > { %8577 = vst [vmem:[#allocation8_spill] sm:$0xff] %v7561_v45  ;;  %4401 = vperm.xlu1 %5477, %v4334_v23   ;;  %v3226_v23 = vld [vmem:[#allocation4 + $0x240] sm:$0xff]  ;;  %v3397_v45 = vld [vmem:[#allocation4 + $0x798] sm:$0xff] }
 0x877   : > { %4371 = vperm.xlu2 %5478, %v4328_v42  }
 0x878   : > { %3542 = vmatmul.f32.gmra.mxu2 %v3255_v13  ;;  %3613 = vmatmul.f32.gmra.mxu3 %v3186_v43 }
 0x87a   : > { %3489 = vmatmul.f32.gmra.mxu1 %v3384_v47 }
 0x87b   : > { %3702 = vmatmul.f32.gmra.mxu0 %v3177_v16  ;;  %v7569_v30 = vpop.permute.xlu0 %5975  ;;  %v3178_v16 = vld [vmem:[#allocation4 + $0xc0] sm:$0xff] }
 0x87c   : > { %4566 = vperm.xlu0 %5476, %v4507_v39   ;;  %v7574_v46 = vpop.permute.xlu1 %6010  ;;  %v7576_v50 = vpop.permute.xlu2 %6000  ;;  %v3217_v39 = vld [vmem:[#allocation4 + $0x1f8] sm:$0xff] }
 0x87d   : > { %v7578_v36 = vpop.f32.mrf.mxu1 }
 0x87e   : > { %4406 = vperm.xlu1 %5477, %v4335_v20   ;;  %v5952_v20 = vunpack.i.l.bf16 %v7492_v34 }
 0x87f   : > { %4551 = vperm.xlu2 %5478, %v4504_v49   ;;  %v4511_v49 = vld [vmem:[%s8531_s15 + $0x60] sm:$0xff] }
 0x880   : > { %3545 = vmatmul.f32.gmra.mxu2 %v3265_v53  ;;  %3616 = vmatmul.f32.gmra.mxu3 %v3196_v54  ;;  %v5953_v54 = vunpack.i.h.bf16 %v7492_v34  ;;  %v3305_v34 = vld [vmem:[#allocation4 + $0x4b8] sm:$0xff] }
 0x882   : > { %3492 = vmatmul.f32.gmra.mxu1 %v3394_v55  ;;  %v5962_v55 = vunpack.i.l.bf16 %v7552_v37 }
 0x883   : > { %3705 = vmatmul.f32.gmra.mxu0 %v3187_v59  ;;  %v7586_v14 = vpop.permute.xlu0 %5990  ;;  %v4339_v59 = vld [vmem:[%s8530_s14 + $0x78] sm:$0xff] }
 0x884   : > { %4571 = vperm.xlu0 %5476, %v4508_v3   ;;  %v7591_v32 = vpop.permute.xlu1 %6030  ;;  %v7593_v22 = vpop.permute.xlu2 %6015  ;;  %v5992_v43 = vunpack.i.l.bf16 %v7586_v14  ;;  %v5993_v53 = vunpack.i.h.bf16 %v7586_v14  ;;  %v5957_v14 = vunpack.i.l.bf16 %v7534_v33 }
 0x885   : > { %v7595_v60 = vpop.f32.mrf.mxu1 }
 0x886   : > { %4411 = vperm.xlu1 %5477, %v4336_v27   ;;  %v6012_v27 = vunpack.i.l.bf16 %v7574_v46 }
 0x887   : > { %4386 = vperm.xlu2 %5478, %v4331_v48  }
 0x888   : > { %3548 = vmatmul.f32.gmra.mxu2 %v3275_v38  ;;  %3619 = vmatmul.f32.gmra.mxu3 %v3206_v62  ;;  %v5963_v38 = vunpack.i.h.bf16 %v7552_v37  ;;  %v3236_v62 = vld [vmem:[#allocation4 + $0x290] sm:$0xff]  ;;  %v5958_v37 = vunpack.i.h.bf16 %v7534_v33  ;;  %v4340_v33 = vld [vmem:[%s8530_s14 + $0x80] sm:$0xff] }
 0x88a   : > { %3788 = vmatmul.f32.vlgmr.msra.gmra.mxu1 %v3158_v31 }
 0x88b   : > { %3708 = vmatmul.f32.gmra.mxu0 %v3197_v56  ;;  %v7603_v51 = vpop.permute.xlu0 %6005 }
 0x88c   : > { %4576 = vperm.xlu0 %5476, %v4509_v63   ;;  %v6051_v19 = vpop.permute.xlu1 %6050  ;;  %v7605_v7 = vpop.permute.xlu2 %6035  ;;  %v6013_v63 = vunpack.i.h.bf16 %v7574_v46  ;;  %v4512_v46 = vld [vmem:[%s8531_s15 + $0x68] sm:$0xff] }
 0x88d   : > { %v6052_v0 = vunpack.i.l.bf16 %v6051_v19  ;;  %v7607_v8 = vpop.f32.mrf.mxu1  ;;  %v6053_v26 = vunpack.i.h.bf16 %v6051_v19  ;;  %v5982_v19 = vunpack.i.l.bf16 %v7536_v15 }
 0x88e   : > { %4416 = vperm.xlu1 %5477, %v4337_v57   ;;  %v3188_v57 = vld [vmem:[#allocation4 + $0x110] sm:$0xff] }
 0x88f   : > { %4048 = vmatpush.msra.mxu0 %v6052_v0  ;;  %v6037_v0 = vunpack.i.l.bf16 %v7605_v7 }
 0x890   : > { %3551 = vmatmul.f32.gmra.mxu2 %v3285_v58  ;;  %3622 = vmatmul.f32.gmra.mxu3 %v3216_v12  ;;  %v3227_v58 = vld [vmem:[#allocation4 + $0x248] sm:$0xff] }
 0x891   : > { %4049 = vmatpush.msra.mxu0 %v6053_v26 }
 0x892   : > { %3791 = vmatmul.f32.gmra.mxu1 %v3168_v11  ;;  %v5983_v11 = vunpack.i.h.bf16 %v7536_v15  ;;  %v3246_v15 = vld [vmem:[#allocation4 + $0x2e0] sm:$0xff] }
 0x893   : > { %3711 = vmatmul.f32.gmra.mxu0 %v3207_v61  ;;  %v6021_v5 = vpop.permute.xlu0 %6020 }
 0x894   : > { %4581 = vperm.xlu0 %5476, %v4510_v18   ;;  %4050 = vmatpush.msra.mxu0 %v5972_v6  ;;  %v6022_v35 = vunpack.i.l.bf16 %v6021_v5  ;;  %v6046_v40 = vpop.permute.xlu2 %6045  ;;  %v6023_v47 = vunpack.i.h.bf16 %v6021_v5  ;;  %v7640_v12 = vpop.permute.xlu1 %6055  ;;  %v6038_v18 = vunpack.i.h.bf16 %v7605_v7  ;;  %v5967_v6 = vunpack.i.l.bf16 %v7516_v1  ;;  %v3315_v5 = vld [vmem:[#allocation4 + $0x508] sm:$0xff] }
 0x895   : > { %v6047_v42 = vunpack.i.l.bf16 %v6046_v40  ;;  %v7617_v13 = vpop.f32.mrf.mxu1  ;;  %v6048_v41 = vunpack.i.h.bf16 %v6046_v40  ;;  %v5968_v7 = vunpack.i.h.bf16 %v7516_v1 }
 0x896   : > { %4421 = vperm.xlu1 %5477, %v4338_v10   ;;  %4051 = vmatpush.msra.mxu0 %v5973_v29  ;;  %v5977_v10 = vunpack.i.l.bf16 %v7569_v30 }
 0x897   : > { %3956 = vmatpush.msrb.mxu3 %v6022_v35  ;;  %4232 = vmatpush.msrb.mxu2 %v6047_v42  ;;  %v3237_v42 = vld [vmem:[#allocation4 + $0x298] sm:$0xff] }
 0x898   : > { %3554 = vmatmul.f32.gmra.mxu2 %v3295_v28  ;;  %3625 = vmatmul.f32.gmra.mxu3 %v3226_v23  ;;  %v6002_v28 = vunpack.i.l.bf16 %v7576_v50  ;;  %v5978_v23 = vunpack.i.h.bf16 %v7569_v30  ;;  %v4513_v30 = vld [vmem:[%s8531_s15 + $0x70] sm:$0xff] }
 0x899   : > { %4052 = vmatpush.msra.mxu0 %v5992_v43  ;;  %3957 = vmatpush.msrb.mxu3 %v6023_v47  ;;  %v6003_v43 = vunpack.i.h.bf16 %v7576_v50  ;;  %v3198_v47 = vld [vmem:[#allocation4 + $0x160] sm:$0xff]  ;;  %v5988_v50 = vunpack.i.h.bf16 %v7559_v17 }
 0x89a   : > { %3794 = vmatmul.f32.gmra.mxu1 %v3178_v16  ;;  %4233 = vmatpush.msrb.mxu2 %v6048_v41  ;;  %v5987_v16 = vunpack.i.l.bf16 %v7559_v17  ;;  %v5997_v41 = vunpack.i.l.bf16 %v7557_v9 }
 0x89b   : > { %3714 = vmatmul.f32.gmra.mxu0 %v3217_v39  ;;  %3958 = vmatpush.msrb.mxu3 %v5952_v20  ;;  %v7630_v3 = vpop.permute.xlu0 %6025 }
 0x89c   : > { %4053 = vmatpush.msra.mxu0 %v5993_v53  ;;  %4586 = vperm.xlu0 %5476, %v4511_v49   ;;  %v6061_v48 = vpop.permute.xlu2 %6060  ;;  %v6027_v1 = vunpack.i.l.bf16 %v7630_v3  ;;  %v7668_v39 = vpop.permute.xlu1 %6075  ;;  %v5998_v49 = vunpack.i.h.bf16 %v7557_v9  ;;  %v6028_v53 = vunpack.i.h.bf16 %v7630_v3  ;;  %v6007_v9 = vunpack.i.l.bf16 %v7603_v51 }
 0x89d   : > { %4234 = vmatpush.msrb.mxu2 %v5962_v55  ;;  %v6062_v31 = vunpack.i.l.bf16 %v6061_v48  ;;  %v7635_v56 = vpop.f32.mrf.mxu1  ;;  %3959 = vmatpush.msrb.mxu3 %v5953_v54  ;;  %v6063_v26 = vunpack.i.h.bf16 %v6061_v48  ;;  %v4341_v54 = vld [vmem:[%s8530_s14 + $0x88] sm:$0xff]  ;;  %v3325_v55 = vld [vmem:[#allocation4 + $0x558] sm:$0xff]  ;;  %v6057_v3 = vunpack.i.l.bf16 %v7640_v12 }
 0x89e   : > { %4426 = vperm.xlu1 %5477, %v4339_v59   ;;  %4054 = vmatpush.msra.mxu0 %v6012_v27  ;;  %v3256_v27 = vld [vmem:[#allocation4 + $0x330] sm:$0xff] }
 0x89f   : > { %4235 = vmatpush.msrb.mxu2 %v5963_v38  ;;  %3960 = vmatpush.msrb.mxu3 %v5957_v14  ;;  %v6017_v14 = vunpack.i.l.bf16 %v7593_v22  ;;  %v3247_v38 = vld [vmem:[#allocation4 + $0x2e8] sm:$0xff] }
 0x8a0   : > { %3557 = vmatmul.f32.gmra.mxu2 %v3305_v34  ;;  %3628 = vmatmul.f32.gmra.mxu3 %v3236_v62  ;;  %v6018_v34 = vunpack.i.h.bf16 %v7593_v22 }
 0x8a1   : > { %4055 = vmatpush.msra.mxu0 %v6013_v63  ;;  %4140 = vmatpush.msrb.mxu1 %v6062_v31  ;;  %v6008_v31 = vunpack.i.h.bf16 %v7603_v51  ;;  %v6058_v63 = vunpack.i.h.bf16 %v7640_v12  ;;  %v6033_v12 = vunpack.i.h.bf16 %v7591_v32 }
 0x8a2   : > { %3797 = vmatmul.f32.gmra.mxu1 %v3188_v57  ;;  %4236 = vmatpush.msrb.mxu2 %v5982_v19  ;;  %v3208_v57 = vld [vmem:[#allocation4 + $0x1b0] sm:$0xff] }
 0x8a3   : > { %3717 = vmatmul.f32.gmra.mxu0 %v3227_v58  ;;  %3961 = vmatpush.msrb.mxu3 %v5958_v37  ;;  %v7650_v61 = vpop.permute.xlu0 %6040  ;;  %v6032_v58 = vunpack.i.l.bf16 %v7591_v32  ;;  %v3266_v32 = vld [vmem:[#allocation4 + $0x380] sm:$0xff] }
 0x8a4   : > { %4056 = vmatpush.msra.mxu0 %v6037_v0  ;;  %4141 = vmatpush.msrb.mxu1 %v6063_v26  ;;  %v6042_v37 = vunpack.i.l.bf16 %v7650_v61  ;;  %v6091_v0 = vpop.permute.xlu1 %6090 }
 0x8a5   : > { %4237 = vmatpush.msrb.mxu2 %v5983_v11  ;;  %4591 = vperm.xlu0 %5476, %v4512_v46   ;;  %v7655_v29 = vpop.permute.xlu2 %6065  ;;  %v7657_v35 = vpop.f32.mrf.mxu1  ;;  %v6043_v46 = vunpack.i.h.bf16 %v7650_v61  ;;  %v4514_v11 = vld [vmem:[%s8531_s15 + $0x78] sm:$0xff] }
 0x8a6   : > { %4057 = vmatpush.msra.mxu0 %v6038_v18  ;;  %4431 = vperm.xlu1 %5477, %v4340_v33   ;;  %v7659_v40 = vpop.f32.mrf.mxu2 }
 0x8a7   : > { %3962 = vmatpush.msrb.mxu3 %v5967_v6  ;;  %4142 = vmatpush.msrb.mxu1 %v5977_v10  ;;  %v4342_v6 = vld [vmem:[%s8530_s14 + $0x90] sm:$0xff]  ;;  %v3335_v10 = vld [vmem:[#allocation4 + $0x5a8] sm:$0xff] }
 0x8a8   : > { %3560 = vmatmul.f32.gmra.mxu2 %v3315_v5  ;;  %3631 = vmatmul.f32.gmra.mxu3 %v3246_v15  ;;  %v6077_v5 = vunpack.i.l.bf16 %v7668_v39 }
 0x8a9   : > { %4238 = vmatpush.msrb.mxu2 %v6002_v28  ;;  %3963 = vmatpush.msrb.mxu3 %v5968_v7  ;;  %v3257_v7 = vld [vmem:[#allocation4 + $0x338] sm:$0xff]  ;;  %v6067_v28 = vunpack.i.l.bf16 %v7655_v29 }
 0x8aa   : > { %4143 = vmatpush.msrb.mxu1 %v5978_v23  ;;  %v6078_v23 = vunpack.i.h.bf16 %v7668_v39  ;;  %v6093_v39 = vunpack.i.h.bf16 %v6091_v0 }
 0x8ab   : > { %4239 = vmatpush.msrb.mxu2 %v6003_v43  ;;  %3720 = vmatmul.f32.gmra.mxu0 %v3237_v42  ;;  %v6071_v20 = vpop.permute.xlu0 %6070  ;;  %v3218_v43 = vld [vmem:[#allocation4 + $0x200] sm:$0xff] }
 0x8ac   : > { %3800 = vmatmul.f32.gmra.mxu1 %v3198_v47  ;;  %3964 = vmatpush.msrb.mxu3 %v5987_v16  ;;  %v6072_v62 = vunpack.i.l.bf16 %v6071_v20  ;;  %v6073_v26 = vunpack.i.h.bf16 %v6071_v20  ;;  %v6068_v47 = vunpack.i.h.bf16 %v7655_v29  ;;  %v6092_v16 = vunpack.i.l.bf16 %v6091_v0  ;;  %v4515_v29 = vld [vmem:[%s8531_s15 + $0x80] sm:$0xff] }
 0x8ad   : > { %4144 = vmatpush.msrb.mxu1 %v5997_v41  ;;  %4240 = vmatpush.msrb.mxu2 %v6027_v1  ;;  %v7679_v59 = vpop.f32.mrf.mxu1 }
 0x8ae   : > { %3965 = vmatpush.msrb.mxu3 %v5988_v50  ;;  %4596 = vperm.xlu0 %5476, %v4513_v30   ;;  %v6081_v48 = vpop.permute.xlu2 %6080  ;;  %v7681_v17 = vpop.f32.mrf.mxu2 }
 0x8af   : > { %4145 = vmatpush.msrb.mxu1 %v5998_v49  ;;  %4241 = vmatpush.msrb.mxu2 %v6028_v53  ;;  %v6082_v19 = vunpack.i.l.bf16 %v6081_v48  ;;  %v6083_v18 = vunpack.i.h.bf16 %v6081_v48  ;;  %v6106_v50 = vpop.permute.xlu1 %6105  ;;  %v4343_v53 = vld [vmem:[%s8530_s14 + $0x98] sm:$0xff]  ;;  %v3267_v48 = vld [vmem:[#allocation4 + $0x388] sm:$0xff] }
 0x8b0   : > { %4436 = vperm.xlu1 %5477, %v4341_v54   ;;  %3563 = vmatmul.f32.gmra.mxu2 %v3325_v55  ;;  %v3345_v54 = vld [vmem:[#allocation4 + $0x5f8] sm:$0xff]  ;;  %v3276_v55 = vld [vmem:[#allocation4 + $0x3d0] sm:$0xff] }
 0x8b1   : > { %3634 = vmatmul.f32.gmra.mxu3 %v3256_v27  ;;  %4146 = vmatpush.msrb.mxu1 %v6017_v14  ;;  %v6107_v14 = vunpack.i.l.bf16 %v6106_v50 }
 0x8b2   : > { %3966 = vmatpush.msrb.mxu3 %v6007_v9  ;;  %4242 = vmatpush.msrb.mxu2 %v6057_v3  ;;  %v6108_v9 = vunpack.i.h.bf16 %v6106_v50  ;;  %v3228_v3 = vld [vmem:[#allocation4 + $0x250] sm:$0xff] }
 0x8b3   : > { %4147 = vmatpush.msrb.mxu1 %v6018_v34  ;;  %3723 = vmatmul.f32.gmra.mxu0 %v3247_v38  ;;  %v6086_v22 = vpop.permute.xlu0 %6085 }
 0x8b4   : > { %3967 = vmatpush.msrb.mxu3 %v6008_v31  ;;  %4243 = vmatpush.msrb.mxu2 %v6058_v63  ;;  %v6087_v15 = vunpack.i.l.bf16 %v6086_v22  ;;  %v6088_v1 = vunpack.i.h.bf16 %v6086_v22  ;;  %v4516_v31 = vld [vmem:[%s8531_s15 + $0x88] sm:$0xff]  ;;  %v4344_v63 = vld [vmem:[%s8530_s14 + $0xa0] sm:$0xff] }
 0x8b5   : > { %3803 = vmatmul.f32.gmra.mxu1 %v3208_v57  ;;  %4058 = vmatpush.msra.mxu0 %v6072_v62  ;;  %v7691_v51 = vpop.f32.mrf.mxu1  ;;  %v3355_v57 = vld [vmem:[#allocation4 + $0x648] sm:$0xff] }
 0x8b6   : > { %3968 = vmatpush.msrb.mxu3 %v6032_v58  ;;  %4148 = vmatpush.msrb.mxu1 %v6042_v37  ;;  %v7698_v33 = vpop.f32.mrf.mxu2  ;;  %v3277_v58 = vld [vmem:[#allocation4 + $0x3d8] sm:$0xff]  ;;  %v3238_v37 = vld [vmem:[#allocation4 + $0x2a0] sm:$0xff] }
 0x8b7   : > { %4244 = vmatpush.msrb.mxu2 %v6082_v19  ;;  %4059 = vmatpush.msra.mxu0 %v6073_v26  ;;  %v6096_v61 = vpop.permute.xlu2 %6095  ;;  %v3286_v19 = vld [vmem:[#allocation4 + $0x420] sm:$0xff]  ;;  %v4517_v26 = vld [vmem:[%s8531_s15 + $0x90] sm:$0xff] }
 0x8b8   : > { %3969 = vmatpush.msrb.mxu3 %v6033_v12  ;;  %4149 = vmatpush.msrb.mxu1 %v6043_v46  ;;  %v6097_v42 = vunpack.i.l.bf16 %v6096_v61  ;;  %v6098_v49 = vunpack.i.h.bf16 %v6096_v61  ;;  %v4345_v12 = vld [vmem:[%s8530_s14 + $0xa8] sm:$0xff]  ;;  %v3365_v46 = vld [vmem:[#allocation4 + $0x698] sm:$0xff]  ;;  %v4346_v61 = vld [vmem:[%s8530_s14 + $0xb0] sm:$0xff] }
 0x8b9   : > { %4245 = vmatpush.msrb.mxu2 %v6083_v18  ;;  %4601 = vperm.xlu0 %5476, %v4514_v11   ;;  %v3296_v11 = vld [vmem:[#allocation4 + $0x470] sm:$0xff]  ;;  %v3287_v18 = vld [vmem:[#allocation4 + $0x428] sm:$0xff] }
 0x8ba   : > { %4441 = vperm.xlu1 %5477, %v4342_v6   ;;  %3566 = vmatmul.f32.gmra.mxu2 %v3335_v10  ;;  %v3248_v6 = vld [vmem:[#allocation4 + $0x2f0] sm:$0xff] }
 0x8bb   : > { %3637 = vmatmul.f32.gmra.mxu3 %v3266_v32  ;;  %4150 = vmatpush.msrb.mxu1 %v6077_v5  ;;  %v6101_v30 = vpop.permute.xlu0 %6100  ;;  %v4518_v32 = vld [vmem:[%s8531_s15 + $0x98] sm:$0xff] }
 0x8bc   : > { %3970 = vmatpush.msrb.mxu3 %v6067_v28  ;;  %3726 = vmatmul.f32.gmra.mxu0 %v3257_v7  ;;  %v6102_v27 = vunpack.i.l.bf16 %v6101_v30  ;;  %v6103_v38 = vunpack.i.h.bf16 %v6101_v30  ;;  %v3306_v7 = vld [vmem:[#allocation4 + $0x4c0] sm:$0xff]  ;;  %v3297_v28 = vld [vmem:[#allocation4 + $0x478] sm:$0xff] }
 0x8bd   : > { %4151 = vmatpush.msrb.mxu1 %v6078_v23  ;;  %4060 = vmatpush.msra.mxu0 %v6087_v15  ;;  %v7707_v41 = vpop.f32.mrf.mxu1  ;;  %v3375_v15 = vld [vmem:[#allocation4 + $0x6e8] sm:$0xff]  ;;  %v3258_v23 = vld [vmem:[#allocation4 + $0x340] sm:$0xff] }
 0x8be   : > { %3971 = vmatpush.msrb.mxu3 %v6068_v47  ;;  %3806 = vmatmul.f32.gmra.mxu1 %v3218_v43  ;;  %v7709_v20 = vpop.f32.mrf.mxu2  ;;  %v4519_v43 = vld [vmem:[%s8531_s15 + $0xa0] sm:$0xff]  ;;  %v4347_v47 = vld [vmem:[%s8530_s14 + $0xb8] sm:$0xff] }
 0x8bf   : > { %4152 = vmatpush.msrb.mxu1 %v6092_v16  ;;  %4246 = vmatpush.msrb.mxu2 %v6097_v42  ;;  %v3385_v16 = vld [vmem:[#allocation4 + $0x738] sm:$0xff] }
 0x8c0   : > { %4061 = vmatpush.msra.mxu0 %v6088_v1  ;;  %v3316_v1 = vld [vmem:[#allocation4 + $0x510] sm:$0xff] }
 0x8c1   : > { %4153 = vmatpush.msrb.mxu1 %v6093_v39  ;;  %4247 = vmatpush.msrb.mxu2 %v6098_v49  ;;  %v3307_v39 = vld [vmem:[#allocation4 + $0x4c8] sm:$0xff]  ;;  %v3268_v49 = vld [vmem:[#allocation4 + $0x390] sm:$0xff] }
 0x8c2   : > { %4606 = vperm.xlu0 %5476, %v4515_v29   ;;  %4446 = vperm.xlu1 %5477, %v4343_v53   ;;  %v4520_v29 = vld [vmem:[%s8531_s15 + $0xa8] sm:$0xff]  ;;  %v4348_v53 = vld [vmem:[%s8530_s14 + $0xc0] sm:$0xff] }
 0x8c3   : > { %3569 = vmatmul.f32.gmra.mxu2 %v3345_v54  ;;  %3640 = vmatmul.f32.gmra.mxu3 %v3276_v55  ;;  %v3395_v55 = vld [vmem:[#allocation4 + $0x788] sm:$0xff] }
 0x8c4   : > { %4154 = vmatpush.msrb.mxu1 %v6107_v14  ;;  %3729 = vmatmul.f32.gmra.mxu0 %v3267_v48  ;;  %v3317_v48 = vld [vmem:[#allocation4 + $0x518] sm:$0xff] }
 0x8c5   : > { %4062 = vmatpush.msra.mxu0 %v6102_v27  ;;  %v7717_v34 = vpop.f32.mrf.mxu1  ;;  %v3326_v27 = vld [vmem:[#allocation4 + $0x560] sm:$0xff] }
 0x8c6   : > { %4155 = vmatpush.msrb.mxu1 %v6108_v9  ;;  %v7719_v62 = vpop.f32.mrf.mxu2 }
 0x8c7   : > { %3809 = vmatmul.f32.gmra.mxu1 %v3228_v3  ;;  %4063 = vmatpush.msra.mxu0 %v6103_v38  ;;  %v3278_v3 = vld [vmem:[#allocation4 + $0x3e0] sm:$0xff]  ;;  %v4521_v38 = vld [vmem:[%s8531_s15 + $0xb0] sm:$0xff] }
 0x8ca   : > { %4611 = vperm.xlu0 %5476, %v4516_v31   ;;  %4451 = vperm.xlu1 %5477, %v4344_v63   ;;  %v4324_v31 = vld [vmem:[%s8530_s14] sm:$0xff]  ;;  %v3336_v63 = vld [vmem:[#allocation4 + $0x5b0] sm:$0xff] }
 0x8cb   : > { %3572 = vmatmul.f32.gmra.mxu2 %v3355_v57  ;;  %3643 = vmatmul.f32.gmra.mxu3 %v3286_v19  ;;  %v3159_v57 = vld [vmem:[#allocation4 + $0x28] sm:$0xff] }
 0x8cc   : > { %3732 = vmatmul.f32.gmra.mxu0 %v3277_v58  ;;  %v3327_v58 = vld [vmem:[#allocation4 + $0x568] sm:$0xff] }
 0x8cd   : > { %v7727_v22 = vpop.f32.mrf.mxu1 }
 0x8ce   : > { %v7729_v0 = vpop.f32.mrf.mxu2 }
 0x8cf   : > { %3812 = vmatmul.f32.gmra.mxu1 %v3238_v37 }
 0x8d2   : > { %4616 = vperm.xlu0 %5476, %v4517_v26   ;;  %4456 = vperm.xlu1 %5477, %v4345_v12   ;;  %v3288_v12 = vld [vmem:[#allocation4 + $0x430] sm:$0xff] }
 0x8d3   : > { %3575 = vmatmul.f32.gmra.mxu2 %v3365_v46  ;;  %3646 = vmatmul.f32.gmra.mxu3 %v3296_v11  ;;  %v4522_v46 = vld [vmem:[%s8531_s15 + $0xb8] sm:$0xff] }
 0x8d4   : > { %3735 = vmatmul.f32.gmra.mxu0 %v3287_v18  ;;  %v3346_v18 = vld [vmem:[#allocation4 + $0x600] sm:$0xff] }
 0x8d5   : > { %v7737_v10 = vpop.f32.mrf.mxu1 }
 0x8d7   : > { %3815 = vmatmul.f32.gmra.mxu1 %v3248_v6  ;;  %v7745_v5 = vpop.f32.mrf.mxu2  ;;  %v3169_v6 = vld [vmem:[#allocation4 + $0x78] sm:$0xff] }
 0x8da   : > { %4621 = vperm.xlu0 %5476, %v4518_v32   ;;  %4461 = vperm.xlu1 %5477, %v4346_v61   ;;  %v3337_v32 = vld [vmem:[#allocation4 + $0x5b8] sm:$0xff] }
 0x8db   : > { %3578 = vmatmul.f32.gmra.mxu2 %v3375_v15  ;;  %3649 = vmatmul.f32.gmra.mxu3 %v3306_v7 }
 0x8dc   : > { %3738 = vmatmul.f32.gmra.mxu0 %v3297_v28  ;;  %v3298_v28 = vld [vmem:[#allocation4 + $0x480] sm:$0xff] }
 0x8dd   : > { %v7747_v42 = vpop.f32.mrf.mxu1 }
 0x8df   : > { %3818 = vmatmul.f32.gmra.mxu1 %v3258_v23  ;;  %v4523_v23 = vld [vmem:[%s8531_s15 + $0xc0] sm:$0xff] }
 0x8e1   : > { %v7755_v30 = vpop.f32.mrf.mxu2  ;;  %v7757_v50 = vpop.f32.mrf.mxu3 }
 0x8e2   : > { %8578 = vst [vmem:[#allocation9_spill] sm:$0xff] %v7755_v30  ;;  %4626 = vperm.xlu0 %5476, %v4519_v43   ;;  %4466 = vperm.xlu1 %5477, %v4347_v47   ;;  %v3356_v43 = vld [vmem:[#allocation4 + $0x650] sm:$0xff]  ;;  %v3179_v47 = vld [vmem:[#allocation4 + $0xc8] sm:$0xff] }
 0x8e3   : > { %3581 = vmatmul.f32.gmra.mxu2 %v3385_v16  ;;  %3652 = vmatmul.f32.gmra.mxu3 %v3316_v1  ;;  %v3347_v16 = vld [vmem:[#allocation4 + $0x608] sm:$0xff] }
 0x8e4   : > { %3741 = vmatmul.f32.gmra.mxu0 %v3307_v39 }
 0x8e7   : > { %3821 = vmatmul.f32.gmra.mxu1 %v3268_v49  ;;  %v7765_v54 = vpop.f32.mrf.mxu1 }
 0x8e8   : > { %v7786_v11 = vpop.f32.mrf.mxu0 }
 0x8ea   : > { %4631 = vperm.xlu0 %5476, %v4520_v29   ;;  %4471 = vperm.xlu1 %5477, %v4348_v53   ;;  %v7767_v14 = vpop.f32.mrf.mxu2  ;;  %v3308_v53 = vld [vmem:[#allocation4 + $0x4d0] sm:$0xff] }
 0x8eb   : > { %3584 = vmatmul.f32.gmra.mxu2 %v3395_v55  ;;  %3655 = vmatmul.f32.gmra.mxu3 %v3326_v27  ;;  %v7769_v9 = vpop.f32.mrf.mxu3  ;;  %v3366_v55 = vld [vmem:[#allocation4 + $0x6a0] sm:$0xff]  ;;  %v3189_v27 = vld [vmem:[#allocation4 + $0x118] sm:$0xff] }
 0x8ec   : > { %3744 = vmatmul.f32.gmra.mxu0 %v3317_v48  ;;  %v3357_v48 = vld [vmem:[#allocation4 + $0x658] sm:$0xff] }
 0x8ef   : > { %3824 = vmatmul.f32.gmra.mxu1 %v3278_v3  ;;  %v7777_v19 = vpop.f32.mrf.mxu1 }
 0x8f0   : > { %v7797_v1 = vpop.f32.mrf.mxu0 }
 0x8f2   : > { %4636 = vperm.xlu0 %5476, %v4521_v38   ;;  %4351 = vperm.xlu1 %5477, %v4324_v31   ;;  %v3318_v31 = vld [vmem:[#allocation4 + $0x520] sm:$0xff] }
 0x8f3   : > { %3658 = vmatmul.f32.gmra.mxu3 %v3336_v63  ;;  %3880 = vmatmul.f32.vlgmr.msra.gmra.mxu2 %v3159_v57  ;;  %v7779_v37 = vpop.f32.mrf.mxu2  ;;  %v7781_v26 = vpop.f32.mrf.mxu3 }
 0x8f4   : > { %3747 = vmatmul.f32.gmra.mxu0 %v3327_v58  ;;  %v3376_v58 = vld [vmem:[#allocation4 + $0x6f0] sm:$0xff] }
 0x8f7   : > { %3827 = vmatmul.f32.gmra.mxu1 %v3288_v12  ;;  %v7788_v61 = vpop.f32.mrf.mxu1  ;;  %v3199_v12 = vld [vmem:[#allocation4 + $0x168] sm:$0xff] }
 0x8f8   : > { %v7809_v63 = vpop.f32.mrf.mxu0 }
 0x8fa   : > { %4641 = vperm.xlu0 %5476, %v4522_v46   ;;  %v3367_v46 = vld [vmem:[#allocation4 + $0x6a8] sm:$0xff] }
 0x8fb   : > { %3661 = vmatmul.f32.gmra.mxu3 %v3346_v18  ;;  %3883 = vmatmul.f32.gmra.mxu2 %v3169_v6  ;;  %v7790_v15 = vpop.f32.mrf.mxu2  ;;  %v7792_v7 = vpop.f32.mrf.mxu3 }
 0x8fc   : > { %3750 = vmatmul.f32.gmra.mxu0 %v3337_v32  ;;  %v3328_v32 = vld [vmem:[#allocation4 + $0x570] sm:$0xff] }
 0x8ff   : > { %3830 = vmatmul.f32.gmra.mxu1 %v3298_v28  ;;  %v7803_v29 = vpop.f32.mrf.mxu1 }
 0x900   : > { %8579 = vst [vmem:[#allocation10_spill] sm:$0xff] %v7803_v29  ;;  %v7817_v28 = vpop.f32.mrf.mxu0  ;;  %v3541_v29 = vadd.f32 %v7779_v37, %v7595_v60  ;;  %v3544_v37 = vadd.f32 %v7790_v15, %v7607_v8 }
 0x902   : > { %4646 = vperm.xlu0 %5476, %v4523_v23  }
 0x903   : > { %3664 = vmatmul.f32.gmra.mxu3 %v3356_v43  ;;  %3886 = vmatmul.f32.gmra.mxu2 %v3179_v47  ;;  %v7799_v39 = vpop.f32.mrf.mxu2  ;;  %v7801_v49 = vpop.f32.mrf.mxu3  ;;  %v3386_v43 = vld [vmem:[#allocation4 + $0x740] sm:$0xff]  ;;  %v3209_v47 = vld [vmem:[#allocation4 + $0x1b8] sm:$0xff] }
 0x904   : > { %3753 = vmatmul.f32.gmra.mxu0 %v3347_v16  ;;  %v3377_v16 = vld [vmem:[#allocation4 + $0x6f8] sm:$0xff]  ;;  %v3547_v8 = vadd.f32 %v7799_v39, %v7617_v13 }
 0x907   : > { %3833 = vmatmul.f32.gmra.mxu1 %v3308_v53  ;;  %v7811_v57 = vpop.f32.mrf.mxu1 }
 0x90b   : > { %3667 = vmatmul.f32.gmra.mxu3 %v3366_v55  ;;  %3889 = vmatmul.f32.gmra.mxu2 %v3189_v27  ;;  %v7805_v3 = vpop.f32.mrf.mxu2  ;;  %v7807_v38 = vpop.f32.mrf.mxu3  ;;  %v3338_v27 = vld [vmem:[#allocation4 + $0x5c0] sm:$0xff] }
 0x90c   : > { %3756 = vmatmul.f32.gmra.mxu0 %v3357_v48  ;;  %v3396_v48 = vld [vmem:[#allocation4 + $0x790] sm:$0xff]  ;;  %v3550_v13 = vadd.f32 %v7805_v3, %v7635_v56 }
 0x90f   : > { %3836 = vmatmul.f32.gmra.mxu1 %v3318_v31  ;;  %v7819_v23 = vpop.f32.mrf.mxu1  ;;  %v3219_v31 = vld [vmem:[#allocation4 + $0x208] sm:$0xff] }
 0x913   : > { %3670 = vmatmul.f32.gmra.mxu3 %v3376_v58  ;;  %3892 = vmatmul.f32.gmra.mxu2 %v3199_v12  ;;  %v7813_v18 = vpop.f32.mrf.mxu2  ;;  %v7815_v6 = vpop.f32.mrf.mxu3  ;;  %v3387_v12 = vld [vmem:[#allocation4 + $0x748] sm:$0xff] }
 0x914   : > { %8580 = vst [vmem:[#allocation11_spill] sm:$0xff] %v7815_v6  ;;  %3759 = vmatmul.f32.gmra.mxu0 %v3367_v46  ;;  %v7825_v58 = vpop.f32.mrf.mxu0  ;;  %v3538_v46 = vadd.f32 %v7767_v14, %v7578_v36  ;;  %v3553_v56 = vadd.f32 %v7813_v18, %v7657_v35 }
 0x917   : > { %3839 = vmatmul.f32.gmra.mxu1 %v3328_v32  ;;  %v7829_v32 = vpop.f32.mrf.mxu1 }
 0x91b   : > { %3673 = vmatmul.f32.gmra.mxu3 %v3386_v43  ;;  %3895 = vmatmul.f32.gmra.mxu2 %v3209_v47  ;;  %v7821_v53 = vpop.f32.mrf.mxu2  ;;  %v7823_v55 = vpop.f32.mrf.mxu3 }
 0x91c   : > { %8581 = vst [vmem:[#allocation12_spill] sm:$0xff] %v7823_v55  ;;  %3762 = vmatmul.f32.gmra.mxu0 %v3377_v16  ;;  %v3348_v16 = vld [vmem:[#allocation4 + $0x610] sm:$0xff]  ;;  %v7837_v6 = vpop.f32.mrf.mxu0 }
 0x91d   : > { %v3160_v55 = vld [vmem:[#allocation4 + $0x30] sm:$0xff] }
 0x91f   : > { %3842 = vmatmul.f32.gmra.mxu1 %v3338_v27  ;;  %v3229_v27 = vld [vmem:[#allocation4 + $0x258] sm:$0xff] }
 0x923   : > { %3676 = vmatmul.f32.gmra.mxu3 %v3396_v48  ;;  %3898 = vmatmul.f32.gmra.mxu2 %v3219_v31  ;;  %v7831_v43 = vpop.f32.mrf.mxu2  ;;  %v3629_v47 = vpop.f32.mrf.mxu3  ;;  %v3358_v48 = vld [vmem:[#allocation4 + $0x660] sm:$0xff] }
 0x924   : > { %v7833_v30 = vadd.f32 %v3629_v47, %v3538_v46  ;;  %3765 = vmatmul.f32.gmra.mxu0 %v3387_v12  ;;  %v7841_v31 = vpop.f32.mrf.mxu1  ;;  %v3239_v46 = vld [vmem:[#allocation4 + $0x2a8] sm:$0xff]  ;;  %v3170_v47 = vld [vmem:[#allocation4 + $0x80] sm:$0xff] }
 0x926   : > { %8582 = vst [vmem:[#allocation13_spill] sm:$0xff] %v7833_v30 }
 0x927   : > { %3845 = vmatmul.f32.gmra.mxu1 %v3348_v16  ;;  %v3161_v16 = vld [vmem:[#allocation4 + $0x38] sm:$0xff] }
 0x92b   : > { %3901 = vmatmul.f32.gmra.mxu2 %v3229_v27  ;;  %3972 = vmatmul.f32.vlgmr.msrb.gmra.mxu3 %v3160_v55  ;;  %v7839_v36 = vpop.f32.mrf.mxu2  ;;  %v3632_v14 = vpop.f32.mrf.mxu3  ;;  %v3368_v55 = vld [vmem:[#allocation4 + $0x6b0] sm:$0xff] }
 0x92c   : > { %3768 = vmatmul.f32.gmra.mxu0 %v3397_v45  ;;  %v7843_v12 = vadd.f32 %v3632_v14, %v3541_v29  ;;  %v7849_v27 = vpop.f32.mrf.mxu0  ;;  %v7853_v29 = vpop.f32.mrf.mxu1  ;;  %v3249_v14 = vld [vmem:[#allocation4 + $0x2f8] sm:$0xff] }
 0x92d   : > { %8584 = vst [vmem:[#allocation15_spill] sm:$0xff] %v7849_v27  ;;  %v3181_v27 = vld [vmem:[#allocation4 + $0xd8] sm:$0xff] }
 0x92e   : > { %8583 = vst [vmem:[#allocation14_spill] sm:$0xff] %v7843_v12  ;;  %v3171_v12 = vld [vmem:[#allocation4 + $0x88] sm:$0xff] }
 0x92f   : > { %3848 = vmatmul.f32.gmra.mxu1 %v3358_v48  ;;  %v3180_v48 = vld [vmem:[#allocation4 + $0xd0] sm:$0xff] }
 0x933   : > { %3904 = vmatmul.f32.gmra.mxu2 %v3239_v46  ;;  %3975 = vmatmul.f32.gmra.mxu3 %v3170_v47  ;;  %v7845_v60 = vpop.f32.mrf.mxu2  ;;  %v3378_v46 = vld [vmem:[#allocation4 + $0x700] sm:$0xff] }
 0x934   : > { %4064 = vmatmul.f32.vlgmr.msra.gmra.mxu0 %v3161_v16  ;;  %v3635_v45 = vpop.f32.mrf.mxu3  ;;  %v7859_v16 = vpop.f32.mrf.mxu0 }
 0x935   : > { %v7851_v30 = vadd.f32 %v3635_v45, %v3544_v37  ;;  %8586 = vst [vmem:[#allocation17_spill] sm:$0xff] %v7859_v16  ;;  %v3259_v45 = vld [vmem:[#allocation4 + $0x348] sm:$0xff] }
 0x937   : > { %8585 = vst [vmem:[#allocation16_spill] sm:$0xff] %v7851_v30  ;;  %3851 = vmatmul.f32.gmra.mxu1 %v3368_v55  ;;  %v3190_v55 = vld [vmem:[#allocation4 + $0x120] sm:$0xff]  ;;  %v7863_v30 = vpop.f32.mrf.mxu1 }
 0x93b   : > { %3907 = vmatmul.f32.gmra.mxu2 %v3249_v14  ;;  %3978 = vmatmul.f32.gmra.mxu3 %v3180_v48 }
 0x93c   : > { %4067 = vmatmul.f32.gmra.mxu0 %v3171_v12  ;;  %v3388_v12 = vld [vmem:[#allocation4 + $0x750] sm:$0xff] }
 0x93d   : > { %v7857_v15 = vpop.f32.mrf.mxu2 }
 0x93e   : > { %v3638_v47 = vpop.f32.mrf.mxu3 }
 0x93f   : > { %v7861_v37 = vadd.f32 %v3638_v47, %v3547_v8  ;;  %3854 = vmatmul.f32.gmra.mxu1 %v3378_v46  ;;  %v3269_v8 = vld [vmem:[#allocation4 + $0x398] sm:$0xff]  ;;  %v3200_v46 = vld [vmem:[#allocation4 + $0x170] sm:$0xff]  ;;  %v7871_v47 = vpop.f32.mrf.mxu0  ;;  %v7873_v16 = vpop.f32.mrf.mxu1 }
 0x941   : > { %8587 = vst [vmem:[#allocation18_spill] sm:$0xff] %v7861_v37  ;;  %v3191_v37 = vld [vmem:[#allocation4 + $0x128] sm:$0xff] }
 0x943   : > { %3910 = vmatmul.f32.gmra.mxu2 %v3259_v45  ;;  %3981 = vmatmul.f32.gmra.mxu3 %v3190_v55 }
 0x944   : > { %4070 = vmatmul.f32.gmra.mxu0 %v3181_v27  ;;  %v3398_v27 = vld [vmem:[#allocation4 + $0x7a0] sm:$0xff] }
 0x946   : > { %v7867_v39 = vpop.f32.mrf.mxu2  ;;  %v3641_v14 = vpop.f32.mrf.mxu3 }
 0x947   : > { %v7869_v48 = vadd.f32 %v3641_v14, %v3550_v13  ;;  %3857 = vmatmul.f32.gmra.mxu1 %v3388_v12  ;;  %v3279_v12 = vld [vmem:[#allocation4 + $0x3e8] sm:$0xff]  ;;  %v3210_v13 = vld [vmem:[#allocation4 + $0x1c0] sm:$0xff]  ;;  %v3201_v14 = vld [vmem:[#allocation4 + $0x178] sm:$0xff] }
 0x949   : > { %8588 = vst [vmem:[#allocation19_spill] sm:$0xff] %v7869_v48  ;;  %v7881_v48 = vpop.f32.mrf.mxu0 }
 0x94a   : > { %8590 = vst [vmem:[#allocation21_spill] sm:$0xff] %v7881_v48 }
 0x94b   : > { %3913 = vmatmul.f32.gmra.mxu2 %v3269_v8  ;;  %3984 = vmatmul.f32.gmra.mxu3 %v3200_v46  ;;  %v3162_v8 = vld [vmem:[#allocation4 + $0x40] sm:$0xff]  ;;  %v7885_v46 = vpop.f32.mrf.mxu1 }
 0x94c   : > { %4073 = vmatmul.f32.gmra.mxu0 %v3191_v37  ;;  %v3556_v37 = vadd.f32 %v7821_v53, %v7679_v59 }
 0x94e   : > { %v7877_v3 = vpop.f32.mrf.mxu2  ;;  %v3644_v45 = vpop.f32.mrf.mxu3 }
 0x94f   : > { %v7879_v55 = vadd.f32 %v3644_v45, %v3553_v56  ;;  %3860 = vmatmul.f32.gmra.mxu1 %v3398_v27  ;;  %v3289_v27 = vld [vmem:[#allocation4 + $0x438] sm:$0xff]  ;;  %v3220_v45 = vld [vmem:[#allocation4 + $0x210] sm:$0xff] }
 0x951   : > { %8589 = vst [vmem:[#allocation20_spill] sm:$0xff] %v7879_v55  ;;  %v3211_v55 = vld [vmem:[#allocation4 + $0x1c8] sm:$0xff] }
 0x953   : > { %3916 = vmatmul.f32.gmra.mxu2 %v3279_v12  ;;  %3987 = vmatmul.f32.gmra.mxu3 %v3210_v13  ;;  %v3172_v12 = vld [vmem:[#allocation4 + $0x90] sm:$0xff]  ;;  %v3559_v13 = vadd.f32 %v7831_v43, %v7691_v51  ;;  %v7897_v48 = vpop.f32.mrf.mxu1  ;;  %v3562_v51 = vadd.f32 %v7839_v36, %v7707_v41  ;;  %v3565_v41 = vadd.f32 %v7845_v60, %v7717_v34  ;;  %v3202_v34 = vld [vmem:[#allocation4 + $0x180] sm:$0xff] }
 0x954   : > { %4076 = vmatmul.f32.gmra.mxu0 %v3201_v14  ;;  %v7893_v14 = vpop.f32.mrf.mxu0 }
 0x955   : > { %8592 = vst [vmem:[#allocation23_spill] sm:$0xff] %v7893_v14 }
 0x956   : > { %v7887_v35 = vpop.f32.mrf.mxu2  ;;  %v3647_v18 = vpop.f32.mrf.mxu3 }
 0x957   : > { %v7889_v56 = vadd.f32 %v3647_v18, %v3556_v37  ;;  %4156 = vmatmul.f32.vlgmr.msrb.gmra.mxu1 %v3162_v8  ;;  %v3299_v8 = vld [vmem:[#allocation4 + $0x488] sm:$0xff]  ;;  %v3230_v18 = vld [vmem:[#allocation4 + $0x260] sm:$0xff] }
 0x959   : > { %8591 = vst [vmem:[#allocation22_spill] sm:$0xff] %v7889_v56  ;;  %v3221_v56 = vld [vmem:[#allocation4 + $0x218] sm:$0xff] }
 0x95b   : > { %3919 = vmatmul.f32.gmra.mxu2 %v3289_v27  ;;  %3990 = vmatmul.f32.gmra.mxu3 %v3220_v45 }
 0x95c   : > { %4079 = vmatmul.f32.gmra.mxu0 %v3211_v55  ;;  %v3182_v55 = vld [vmem:[#allocation4 + $0xe0] sm:$0xff]  ;;  %v7905_v45 = vpop.f32.mrf.mxu0 }
 0x95d   : > { %8594 = vst [vmem:[#allocation25_spill] sm:$0xff] %v7905_v45 }
 0x95e   : > { %v7895_v59 = vpop.f32.mrf.mxu2  ;;  %v3650_v53 = vpop.f32.mrf.mxu3 }
 0x95f   : > { %v7899_v37 = vadd.f32 %v3650_v53, %v3559_v13  ;;  %4159 = vmatmul.f32.gmra.mxu1 %v3172_v12  ;;  %v3309_v13 = vld [vmem:[#allocation4 + $0x4d8] sm:$0xff]  ;;  %v3240_v12 = vld [vmem:[#allocation4 + $0x2b0] sm:$0xff]  ;;  %v7909_v53 = vpop.f32.mrf.mxu1 }
 0x961   : > { %8593 = vst [vmem:[#allocation24_spill] sm:$0xff] %v7899_v37  ;;  %v3231_v37 = vld [vmem:[#allocation4 + $0x268] sm:$0xff] }
 0x963   : > { %3922 = vmatmul.f32.gmra.mxu2 %v3299_v8  ;;  %3993 = vmatmul.f32.gmra.mxu3 %v3230_v18  ;;  %v3514_v18 = vadd.f32 %v7659_v40, %v7424_v44  ;;  %v3568_v40 = vadd.f32 %v7857_v15, %v7727_v22  ;;  %v3212_v22 = vld [vmem:[#allocation4 + $0x1d0] sm:$0xff] }
 0x964   : > { %4082 = vmatmul.f32.gmra.mxu0 %v3221_v56  ;;  %v3192_v56 = vld [vmem:[#allocation4 + $0x130] sm:$0xff] }
 0x966   : > { %v7903_v43 = vpop.f32.mrf.mxu2  ;;  %v3653_v27 = vpop.f32.mrf.mxu3 }
 0x967   : > { %v7907_v14 = vadd.f32 %v3653_v27, %v3562_v51  ;;  %4162 = vmatmul.f32.gmra.mxu1 %v3182_v55  ;;  %v3319_v55 = vld [vmem:[#allocation4 + $0x528] sm:$0xff]  ;;  %v3250_v27 = vld [vmem:[#allocation4 + $0x300] sm:$0xff]  ;;  %v7923_v45 = vpop.f32.mrf.mxu1 }
 0x969   : > { %8595 = vst [vmem:[#allocation26_spill] sm:$0xff] %v7907_v14  ;;  %v3606_v14 = vadd.f32 %v7757_v50, %v3514_v18  ;;  %v3517_v50 = vadd.f32 %v7681_v17, %v7437_v25  ;;  %v3571_v17 = vadd.f32 %v7867_v39, %v7737_v10  ;;  %v3222_v10 = vld [vmem:[#allocation4 + $0x220] sm:$0xff] }
 0x96b   : > { %3925 = vmatmul.f32.gmra.mxu2 %v3309_v13  ;;  %3996 = vmatmul.f32.gmra.mxu3 %v3240_v12  ;;  %v7920_v13 = vpop.f32.mrf.mxu0  ;;  %v3698_v12 = vadd.f32 %v7786_v11, %v3606_v14  ;;  %v3329_v11 = vld [vmem:[#allocation4 + $0x578] sm:$0xff]  ;;  %v3260_v14 = vld [vmem:[#allocation4 + $0x350] sm:$0xff]  ;;  %v3609_v18 = vadd.f32 %v7769_v9, %v3517_v50  ;;  %v3520_v9 = vadd.f32 %v7698_v33, %v7454_v2 }
 0x96c   : > { %4085 = vmatmul.f32.gmra.mxu0 %v3231_v37  ;;  %v3241_v37 = vld [vmem:[#allocation4 + $0x2b8] sm:$0xff]  ;;  %v3574_v2 = vadd.f32 %v7877_v3, %v7747_v42  ;;  %v3232_v3 = vld [vmem:[#allocation4 + $0x270] sm:$0xff] }
 0x96d   : > { %v3790_v44 = vadd.f32 %v7811_v57, %v3698_v12  ;;  %v3701_v57 = vadd.f32 %v7797_v1, %v3609_v18 }
 0x96e   : > { %v7913_v36 = vpop.f32.mrf.mxu2  ;;  %v3656_v8 = vpop.f32.mrf.mxu3 }
 0x96f   : > { %v7917_v51 = vadd.f32 %v3656_v8, %v3565_v41  ;;  %4165 = vmatmul.f32.gmra.mxu1 %v3192_v56  ;;  %v3793_v25 = vadd.f32 %v7819_v23, %v3701_v57  ;;  %v7941_v15 = vpop.f32.mrf.mxu1  ;;  %v3261_v23 = vld [vmem:[#allocation4 + $0x358] sm:$0xff]  ;;  %v3280_v57 = vld [vmem:[#allocation4 + $0x3f0] sm:$0xff] }
 0x973   : > { %3928 = vmatmul.f32.gmra.mxu2 %v3319_v55  ;;  %3999 = vmatmul.f32.gmra.mxu3 %v3250_v27  ;;  %v3251_v55 = vld [vmem:[#allocation4 + $0x308] sm:$0xff]  ;;  %v7936_v27 = vpop.f32.mrf.mxu0 }
 0x974   : > { %4088 = vmatmul.f32.gmra.mxu0 %v3241_v37 }
 0x976   : > { %v3659_v60 = vpop.f32.mrf.mxu3  ;;  %v3881_v56 = vpop.f32.mrf.mxu2 }
 0x977   : > { %v7930_v41 = vadd.f32 %v3659_v60, %v3568_v40  ;;  %v7932_v8 = vadd.f32 %v3881_v56, %v3790_v44  ;;  %4168 = vmatmul.f32.gmra.mxu1 %v3202_v34  ;;  %v3339_v44 = vld [vmem:[#allocation4 + $0x5c8] sm:$0xff]  ;;  %v3270_v40 = vld [vmem:[#allocation4 + $0x3a0] sm:$0xff]  ;;  %v3612_v60 = vadd.f32 %v7781_v26, %v3520_v9  ;;  %v7958_v26 = vpop.f32.mrf.mxu1 }
 0x979   : > { %v3704_v56 = vadd.f32 %v7809_v63, %v3612_v60  ;;  %v3281_v60 = vld [vmem:[#allocation4 + $0x3f8] sm:$0xff] }
 0x97b   : > { %3931 = vmatmul.f32.gmra.mxu2 %v3329_v11  ;;  %4002 = vmatmul.f32.gmra.mxu3 %v3260_v14  ;;  %v3796_v39 = vadd.f32 %v7829_v32, %v3704_v56  ;;  %v7954_v33 = vpop.f32.mrf.mxu0  ;;  %v3523_v14 = vadd.f32 %v7709_v20, %v7475_v24  ;;  %v3577_v20 = vadd.f32 %v7887_v35, %v7765_v54 }
 0x97c   : > { %4091 = vmatmul.f32.gmra.mxu0 %v3251_v55  ;;  %v3349_v55 = vld [vmem:[#allocation4 + $0x618] sm:$0xff]  ;;  %v3580_v35 = vadd.f32 %v7895_v59, %v7777_v19  ;;  %v3583_v59 = vadd.f32 %v7903_v43, %v7788_v61  ;;  %v3262_v61 = vld [vmem:[#allocation4 + $0x360] sm:$0xff] }
 0x97d   : > { %v3615_v32 = vadd.f32 %v7792_v7, %v3523_v14 }
 0x97e   : > { %v3662_v37 = vpop.f32.mrf.mxu3  ;;  %v3884_v12 = vpop.f32.mrf.mxu2 }
 0x97f   : > { %v7945_v34 = vadd.f32 %v3662_v37, %v3571_v17  ;;  %v7947_v1 = vadd.f32 %v3884_v12, %v3793_v25  ;;  %4171 = vmatmul.f32.gmra.mxu1 %v3212_v22  ;;  %v3271_v22 = vld [vmem:[#allocation4 + $0x3a8] sm:$0xff]  ;;  %v3707_v42 = vadd.f32 %v7817_v28, %v3615_v32  ;;  %v3526_v37 = vadd.f32 %v7719_v62, %v7496_v52  ;;  %v3242_v52 = vld [vmem:[#allocation4 + $0x2c0] sm:$0xff] }
 0x980   : > { %v3359_v28 = vld [vmem:[#allocation4 + $0x668] sm:$0xff] }
 0x981   : > { %v3799_v24 = vadd.f32 %v7841_v31, %v3707_v42  ;;  %v7978_v31 = vpop.f32.mrf.mxu1  ;;  %v3310_v42 = vld [vmem:[#allocation4 + $0x4e0] sm:$0xff] }
 0x983   : > { %3934 = vmatmul.f32.gmra.mxu2 %v3339_v44  ;;  %4005 = vmatmul.f32.gmra.mxu3 %v3270_v40  ;;  %v7971_v12 = vpop.f32.mrf.mxu0  ;;  %v3290_v44 = vld [vmem:[#allocation4 + $0x440] sm:$0xff]  ;;  %v3618_v40 = vadd.f32 %v7801_v49, %v3526_v37 }
 0x984   : > { %4094 = vmatmul.f32.gmra.mxu0 %v3261_v23 }
 0x985   : > { %v3710_v54 = vadd.f32 %v7825_v58, %v3618_v40  ;;  %v3369_v58 = vld [vmem:[#allocation4 + $0x6b8] sm:$0xff]  ;;  %v8599_v40 = vld [vmem:[#allocation8_spill] sm:$0xff] }
 0x986   : > { %v3665_v50 = vpop.f32.mrf.mxu3  ;;  %v3887_v11 = vpop.f32.mrf.mxu2 }
 0x987   : > { %v7960_v18 = vadd.f32 %v3665_v50, %v3574_v2  ;;  %v7962_v63 = vadd.f32 %v3887_v11, %v3796_v39  ;;  %4174 = vmatmul.f32.gmra.mxu1 %v3222_v10  ;;  %v3802_v62 = vadd.f32 %v7853_v29, %v3710_v54  ;;  %v3529_v10 = vadd.f32 %v7729_v0, %v7521_v21  ;;  %v3300_v2 = vld [vmem:[#allocation4 + $0x490] sm:$0xff]  ;;  %v3291_v29 = vld [vmem:[#allocation4 + $0x448] sm:$0xff] }
 0x988   : > { %v3252_v21 = vld [vmem:[#allocation4 + $0x310] sm:$0xff] }
 0x989   : > { %v3621_v50 = vadd.f32 %v7807_v38, %v3529_v10  ;;  %v7994_v19 = vpop.f32.mrf.mxu1  ;;  %v3532_v38 = vadd.f32 %v7745_v5, %v7543_v4  ;;  %v8598_v5 = vld [vmem:[#allocation10_spill] sm:$0xff] }
 0x98a   : > { %v3586_v43 = vadd.f32 %v7913_v36, %v8598_v5  ;;  %v3272_v36 = vld [vmem:[#allocation4 + $0x3b0] sm:$0xff] }
 0x98b   : > { %3937 = vmatmul.f32.gmra.mxu2 %v3349_v55  ;;  %4008 = vmatmul.f32.gmra.mxu3 %v3280_v57  ;;  %v7991_v11 = vpop.f32.mrf.mxu0  ;;  %v3713_v14 = vadd.f32 %v7837_v6, %v3621_v50  ;;  %v3379_v6 = vld [vmem:[#allocation4 + $0x708] sm:$0xff] }
 0x98c   : > { %4097 = vmatmul.f32.gmra.mxu0 %v3271_v22 }
 0x98d   : > { %v3805_v0 = vadd.f32 %v7863_v30, %v3713_v14 }
 0x98e   : > { %v3668_v25 = vpop.f32.mrf.mxu3  ;;  %v3890_v17 = vpop.f32.mrf.mxu2 }
 0x98f   : > { %v7973_v7 = vadd.f32 %v3668_v25, %v3577_v20  ;;  %v7975_v9 = vadd.f32 %v3890_v17, %v3799_v24  ;;  %4177 = vmatmul.f32.gmra.mxu1 %v3232_v3  ;;  %v8596_v3 = vld [vmem:[#allocation11_spill] sm:$0xff]  ;;  %v3301_v20 = vld [vmem:[#allocation4 + $0x498] sm:$0xff] }
 0x990   : > { %v3624_v24 = vadd.f32 %v8596_v3, %v3532_v38  ;;  %v8597_v25 = vld [vmem:[#allocation15_spill] sm:$0xff]  ;;  %v3330_v38 = vld [vmem:[#allocation4 + $0x580] sm:$0xff] }
 0x991   : > { %v8012_v37 = vpop.f32.mrf.mxu1 }
 0x992   : > { %v3716_v30 = vadd.f32 %v8597_v25, %v3624_v24 }
 0x993   : > { %3940 = vmatmul.f32.gmra.mxu2 %v3359_v28  ;;  %4011 = vmatmul.f32.gmra.mxu3 %v3290_v44  ;;  %v8007_v17 = vpop.f32.mrf.mxu0 }
 0x994   : > { %4100 = vmatmul.f32.gmra.mxu0 %v3281_v60  ;;  %v3808_v4 = vadd.f32 %v7873_v16, %v3716_v30  ;;  %v8600_v60 = vld [vmem:[#allocation9_spill] sm:$0xff]  ;;  %v3311_v16 = vld [vmem:[#allocation4 + $0x4e8] sm:$0xff]  ;;  %v3340_v30 = vld [vmem:[#allocation4 + $0x5d0] sm:$0xff] }
 0x995   : > { %v3535_v54 = vadd.f32 %v8600_v60, %v8599_v40 }
 0x996   : > { %v3671_v23 = vpop.f32.mrf.mxu3  ;;  %v3893_v56 = vpop.f32.mrf.mxu2 }
 0x997   : > { %v7986_v49 = vadd.f32 %v3671_v23, %v3580_v35  ;;  %v7988_v39 = vadd.f32 %v3893_v56, %v3802_v62  ;;  %4180 = vmatmul.f32.gmra.mxu1 %v3242_v52  ;;  %v3389_v35 = vld [vmem:[#allocation4 + $0x758] sm:$0xff]  ;;  %v3320_v23 = vld [vmem:[#allocation4 + $0x530] sm:$0xff] }
 0x998   : > { %v8601_v56 = vld [vmem:[#allocation12_spill] sm:$0xff] }
 0x999   : > { %v3627_v10 = vadd.f32 %v8601_v56, %v3535_v54  ;;  %v3350_v54 = vld [vmem:[#allocation4 + $0x620] sm:$0xff] }
 0x99b   : > { %3943 = vmatmul.f32.gmra.mxu2 %v3369_v58  ;;  %4014 = vmatmul.f32.gmra.mxu3 %v3300_v2  ;;  %v8602_v58 = vld [vmem:[#allocation17_spill] sm:$0xff] }
 0x99c   : > { %4103 = vmatmul.f32.gmra.mxu0 %v3291_v29  ;;  %v3719_v2 = vadd.f32 %v8602_v58, %v3627_v10  ;;  %v8023_v29 = vpop.f32.mrf.mxu0  ;;  %v8606_v10 = vld [vmem:[#allocation16_spill] sm:$0xff] }
 0x99e   : > { %v3674_v55 = vpop.f32.mrf.mxu3  ;;  %v3896_v57 = vpop.f32.mrf.mxu2  ;;  %v3811_v50 = vadd.f32 %v7885_v46, %v3719_v2  ;;  %v3282_v46 = vld [vmem:[#allocation4 + $0x400] sm:$0xff] }
 0x99f   : > { %v8001_v32 = vadd.f32 %v3674_v55, %v3583_v59  ;;  %v8003_v22 = vadd.f32 %v3896_v57, %v3805_v0  ;;  %4183 = vmatmul.f32.gmra.mxu1 %v3252_v21  ;;  %v8030_v55 = vpop.f32.mrf.mxu1  ;;  %v3399_v57 = vld [vmem:[#allocation4 + $0x7a8] sm:$0xff] }
 0x9a3   : > { %3946 = vmatmul.f32.gmra.mxu2 %v3379_v6  ;;  %4017 = vmatmul.f32.gmra.mxu3 %v3310_v42  ;;  %v3321_v6 = vld [vmem:[#allocation4 + $0x538] sm:$0xff] }
 0x9a4   : > { %4106 = vmatmul.f32.gmra.mxu0 %v3301_v20  ;;  %v8603_v42 = vld [vmem:[#allocation13_spill] sm:$0xff] }
 0x9a5   : > { %v3722_v3 = vadd.f32 %v7871_v47, %v8603_v42  ;;  %v8609_v42 = vld [vmem:[#allocation25_spill] sm:$0xff] }
 0x9a6   : > { %v3677_v28 = vpop.f32.mrf.mxu3  ;;  %v3899_v44 = vpop.f32.mrf.mxu2 }
 0x9a7   : > { %v8016_v52 = vadd.f32 %v3677_v28, %v3586_v43  ;;  %v8018_v62 = vadd.f32 %v3899_v44, %v3808_v4  ;;  %4186 = vmatmul.f32.gmra.mxu1 %v3262_v61  ;;  %v3814_v24 = vadd.f32 %v7897_v48, %v3722_v3  ;;  %v3163_v61 = vld [vmem:[#allocation4 + $0x48] sm:$0xff]  ;;  %v8039_v5 = vpop.f32.mrf.mxu1  ;;  %v8604_v43 = vld [vmem:[#allocation14_spill] sm:$0xff]  ;;  %v8605_v28 = vld [vmem:[#allocation21_spill] sm:$0xff] }
 0x9a8   : > { %v3331_v4 = vld [vmem:[#allocation4 + $0x588] sm:$0xff]  ;;  %v3725_v47 = vadd.f32 %v8605_v28, %v8604_v43  ;;  %v3292_v44 = vld [vmem:[#allocation4 + $0x450] sm:$0xff]  ;;  %v3193_v43 = vld [vmem:[#allocation4 + $0x138] sm:$0xff] }
 0x9a9   : > { %v3361_v28 = vld [vmem:[#allocation4 + $0x678] sm:$0xff] }
 0x9aa   : > { %v3817_v48 = vadd.f32 %v7909_v53, %v3725_v47  ;;  %v8610_v47 = vld [vmem:[#allocation19_spill] sm:$0xff] }
 0x9ab   : > { %3949 = vmatmul.f32.gmra.mxu2 %v3389_v35  ;;  %4020 = vmatmul.f32.gmra.mxu3 %v3320_v23  ;;  %v3173_v35 = vld [vmem:[#allocation4 + $0x98] sm:$0xff] }
 0x9ac   : > { %4109 = vmatmul.f32.gmra.mxu0 %v3311_v16  ;;  %v3341_v23 = vld [vmem:[#allocation4 + $0x5d8] sm:$0xff]  ;;  %v8607_v16 = vld [vmem:[#allocation23_spill] sm:$0xff] }
 0x9ad   : > { %v3728_v58 = vadd.f32 %v8607_v16, %v8606_v10  ;;  %v3380_v10 = vld [vmem:[#allocation4 + $0x710] sm:$0xff]  ;;  %v3203_v16 = vld [vmem:[#allocation4 + $0x188] sm:$0xff] }
 0x9ae   : > { %v3902_v14 = vpop.f32.mrf.mxu2  ;;  %v3973_v21 = vpop.f32.mrf.mxu3 }
 0x9af   : > { %v8025_v0 = vadd.f32 %v3902_v14, %v3811_v50  ;;  %v8028_v59 = vadd.f32 %v3973_v21, %v7932_v8  ;;  %4189 = vmatmul.f32.gmra.mxu1 %v3272_v36  ;;  %v8037_v8 = vpop.f32.mrf.mxu0  ;;  %v8050_v2 = vpop.f32.mrf.mxu1  ;;  %v3302_v36 = vld [vmem:[#allocation4 + $0x4a0] sm:$0xff]  ;;  %v3820_v53 = vadd.f32 %v7923_v45, %v3728_v58  ;;  %v3360_v21 = vld [vmem:[#allocation4 + $0x670] sm:$0xff]  ;;  %v3371_v58 = vld [vmem:[#allocation4 + $0x6c8] sm:$0xff] }
 0x9b3   : > { %3952 = vmatmul.f32.gmra.mxu2 %v3399_v57  ;;  %4023 = vmatmul.f32.gmra.mxu3 %v3330_v38  ;;  %v3183_v57 = vld [vmem:[#allocation4 + $0xe8] sm:$0xff] }
 0x9b4   : > { %4112 = vmatmul.f32.gmra.mxu0 %v3321_v6  ;;  %v3351_v38 = vld [vmem:[#allocation4 + $0x628] sm:$0xff]  ;;  %v8608_v6 = vld [vmem:[#allocation18_spill] sm:$0xff] }
 0x9b5   : > { %v3731_v3 = vadd.f32 %v8609_v42, %v8608_v6  ;;  %v3213_v6 = vld [vmem:[#allocation4 + $0x1d8] sm:$0xff] }
 0x9b6   : > { %v3905_v20 = vpop.f32.mrf.mxu2  ;;  %v3381_v42 = vld [vmem:[#allocation4 + $0x718] sm:$0xff] }
 0x9b7   : > { %v8035_v25 = vadd.f32 %v3905_v20, %v3814_v24  ;;  %4192 = vmatmul.f32.gmra.mxu1 %v3282_v46  ;;  %v8046_v56 = vpop.f32.mrf.mxu0  ;;  %v3312_v24 = vld [vmem:[#allocation4 + $0x4f0] sm:$0xff]  ;;  %v3823_v20 = vadd.f32 %v7941_v15, %v3731_v3 }
 0x9bb   : > { %4026 = vmatmul.f32.gmra.mxu3 %v3340_v30  ;;  %4248 = vmatmul.f32.vlgmr.msrb.gmra.mxu2 %v3163_v61  ;;  %v8060_v30 = vpop.f32.mrf.mxu1 }
 0x9bc   : > { %4115 = vmatmul.f32.gmra.mxu0 %v3331_v4  ;;  %v3370_v4 = vld [vmem:[#allocation4 + $0x6c0] sm:$0xff] }
 0x9be   : > { %v3908_v40 = vpop.f32.mrf.mxu2 }
 0x9bf   : > { %v8044_v60 = vadd.f32 %v3908_v40, %v3817_v48  ;;  %4195 = vmatmul.f32.gmra.mxu1 %v3292_v44  ;;  %v8057_v46 = vpop.f32.mrf.mxu0  ;;  %v3734_v44 = vadd.f32 %v7920_v13, %v8610_v47  ;;  %v3322_v48 = vld [vmem:[#allocation4 + $0x540] sm:$0xff]  ;;  %v3391_v47 = vld [vmem:[#allocation4 + $0x768] sm:$0xff] }
 0x9c1   : > { %v3826_v40 = vadd.f32 %v7958_v26, %v3734_v44 }
 0x9c3   : > { %4029 = vmatmul.f32.gmra.mxu3 %v3350_v54  ;;  %4251 = vmatmul.f32.gmra.mxu2 %v3173_v35 }
 0x9c4   : > { %4118 = vmatmul.f32.gmra.mxu0 %v3341_v23  ;;  %v8071_v23 = vpop.f32.mrf.mxu1 }
 0x9c6   : > { %v3911_v50 = vpop.f32.mrf.mxu2 }
 0x9c7   : > { %v8053_v14 = vadd.f32 %v3911_v50, %v3820_v53  ;;  %4198 = vmatmul.f32.gmra.mxu1 %v3302_v36  ;;  %v8067_v54 = vpop.f32.mrf.mxu0  ;;  %v8611_v36 = vld [vmem:[#allocation20_spill] sm:$0xff] }
 0x9c8   : > { %v3737_v13 = vadd.f32 %v7936_v27, %v8611_v36  ;;  %v3332_v53 = vld [vmem:[#allocation4 + $0x590] sm:$0xff]  ;;  %v3401_v36 = vld [vmem:[#allocation4 + $0x7b8] sm:$0xff] }
 0x9ca   : > { %v3829_v26 = vadd.f32 %v7978_v31, %v3737_v13  ;;  %v8614_v13 = vld [vmem:[#allocation26_spill] sm:$0xff] }
 0x9cb   : > { %4032 = vmatmul.f32.gmra.mxu3 %v3360_v21  ;;  %4254 = vmatmul.f32.gmra.mxu2 %v3183_v57 }
 0x9cc   : > { %4121 = vmatmul.f32.gmra.mxu0 %v3351_v38  ;;  %v3390_v38 = vld [vmem:[#allocation4 + $0x760] sm:$0xff]  ;;  %v8080_v3 = vpop.f32.mrf.mxu1 }
 0x9ce   : > { %v3914_v45 = vpop.f32.mrf.mxu2 }
 0x9cf   : > { %v8062_v61 = vadd.f32 %v3914_v45, %v3823_v20  ;;  %4201 = vmatmul.f32.gmra.mxu1 %v3312_v24  ;;  %v8078_v57 = vpop.f32.mrf.mxu0  ;;  %v8612_v24 = vld [vmem:[#allocation22_spill] sm:$0xff] }
 0x9d0   : > { %v3740_v27 = vadd.f32 %v7954_v33, %v8612_v24  ;;  %v3342_v20 = vld [vmem:[#allocation4 + $0x5e0] sm:$0xff]  ;;  %v3749_v24 = vadd.f32 %v8007_v17, %v7917_v51  ;;  %v3263_v51 = vld [vmem:[#allocation4 + $0x368] sm:$0xff] }
 0x9d2   : > { %v3832_v31 = vadd.f32 %v7994_v19, %v3740_v27  ;;  %v3372_v27 = vld [vmem:[#allocation4 + $0x6d0] sm:$0xff] }
 0x9d3   : > { %4035 = vmatmul.f32.gmra.mxu3 %v3370_v4  ;;  %4257 = vmatmul.f32.gmra.mxu2 %v3193_v43  ;;  %v3400_v43 = vld [vmem:[#allocation4 + $0x7b0] sm:$0xff] }
 0x9d4   : > { %4124 = vmatmul.f32.gmra.mxu0 %v3361_v28  ;;  %v3223_v28 = vld [vmem:[#allocation4 + $0x228] sm:$0xff]  ;;  %v8091_v33 = vpop.f32.mrf.mxu1 }
 0x9d6   : > { %v3917_v15 = vpop.f32.mrf.mxu2 }
 0x9d7   : > { %v8069_v35 = vadd.f32 %v3917_v15, %v3826_v40  ;;  %4204 = vmatmul.f32.gmra.mxu1 %v3322_v48  ;;  %v8087_v44 = vpop.f32.mrf.mxu0  ;;  %v8613_v48 = vld [vmem:[#allocation24_spill] sm:$0xff] }
 0x9d8   : > { %v3743_v40 = vadd.f32 %v7971_v12, %v8613_v48  ;;  %v3352_v15 = vld [vmem:[#allocation4 + $0x630] sm:$0xff]  ;;  %v3362_v12 = vld [vmem:[#allocation4 + $0x680] sm:$0xff] }
 0x9da   : > { %v3835_v19 = vadd.f32 %v8012_v37, %v3743_v40  ;;  %v3243_v37 = vld [vmem:[#allocation4 + $0x2c8] sm:$0xff] }
 0x9db   : > { %4038 = vmatmul.f32.gmra.mxu3 %v3380_v10  ;;  %4260 = vmatmul.f32.gmra.mxu2 %v3203_v16 }
 0x9dc   : > { %4127 = vmatmul.f32.gmra.mxu0 %v3371_v58  ;;  %v3233_v58 = vld [vmem:[#allocation4 + $0x278] sm:$0xff] }
 0x9de   : > { %v3920_v50 = vpop.f32.mrf.mxu2 }
 0x9df   : > { %v8076_v21 = vadd.f32 %v3920_v50, %v3829_v26  ;;  %4207 = vmatmul.f32.gmra.mxu1 %v3332_v53  ;;  %v3746_v53 = vadd.f32 %v7991_v11, %v8614_v13  ;;  %v8098_v26 = vpop.f32.mrf.mxu0  ;;  %v3841_v11 = vadd.f32 %v8039_v5, %v3749_v24  ;;  %v3755_v5 = vadd.f32 %v8037_v8, %v7945_v34 }
 0x9e1   : > { %v3838_v50 = vadd.f32 %v8030_v55, %v3746_v53  ;;  %v3752_v55 = vadd.f32 %v8023_v29, %v7930_v41  ;;  %v3976_v41 = vpop.f32.mrf.mxu3  ;;  %v3273_v29 = vld [vmem:[#allocation4 + $0x3b8] sm:$0xff]  ;;  %v3402_v53 = vld [vmem:[#allocation4 + $0x7c0] sm:$0xff] }
 0x9e3   : > { %4041 = vmatmul.f32.gmra.mxu3 %v3390_v38  ;;  %4263 = vmatmul.f32.gmra.mxu2 %v3213_v6  ;;  %v3858_v38 = vpop.f32.mrf.mxu1 }
 0x9e4   : > { %4130 = vmatmul.f32.gmra.mxu0 %v3381_v42 }
 0x9e6   : > { %v3923_v45 = vpop.f32.mrf.mxu2 }
 0x9e7   : > { %v8085_v4 = vadd.f32 %v3923_v45, %v3832_v31  ;;  %4210 = vmatmul.f32.gmra.mxu1 %v3342_v20 }
 0x9eb   : > { %4044 = vmatmul.f32.gmra.mxu3 %v3400_v43  ;;  %4266 = vmatmul.f32.gmra.mxu2 %v3223_v28  ;;  %v3861_v45 = vpop.f32.mrf.mxu1  ;;  %v3253_v43 = vld [vmem:[#allocation4 + $0x318] sm:$0xff]  ;;  %v3382_v28 = vld [vmem:[#allocation4 + $0x720] sm:$0xff] }
 0x9ec   : > { %4133 = vmatmul.f32.gmra.mxu0 %v3391_v47  ;;  %v3844_v47 = vadd.f32 %v8050_v2, %v3752_v55  ;;  %v4068_v2 = vpop.f32.mrf.mxu0 }
 0x9ee   : > { %v3926_v10 = vpop.f32.mrf.mxu2 }
 0x9ef   : > { %v8094_v16 = vadd.f32 %v3926_v10, %v3835_v19  ;;  %4213 = vmatmul.f32.gmra.mxu1 %v3352_v15  ;;  %v3392_v15 = vld [vmem:[#allocation4 + $0x770] sm:$0xff]  ;;  %v3847_v19 = vadd.f32 %v8060_v30, %v3755_v5  ;;  %v3283_v30 = vld [vmem:[#allocation4 + $0x408] sm:$0xff] }
 0x9f3   : > { %4269 = vmatmul.f32.gmra.mxu2 %v3233_v58  ;;  %v4157_v17 = vpop.f32.mrf.mxu1 }
 0x9f4   : > { %4136 = vmatmul.f32.gmra.mxu0 %v3401_v36  ;;  %v3758_v36 = vadd.f32 %v8046_v56, %v7960_v18 }
 0x9f6   : > { %v3929_v6 = vpop.f32.mrf.mxu2 }
 0x9f7   : > { %v8101_v42 = vadd.f32 %v3929_v6, %v3838_v50  ;;  %4216 = vmatmul.f32.gmra.mxu1 %v3362_v12  ;;  %v3850_v12 = vadd.f32 %v8071_v23, %v3758_v36  ;;  %v3979_v50 = vpop.f32.mrf.mxu3  ;;  %v3761_v6 = vadd.f32 %v8057_v46, %v7973_v7  ;;  %v3764_v23 = vadd.f32 %v8067_v54, %v7986_v49  ;;  %v4532_v54 = vpop.permute.xlu0 %4531 }
 0x9f9   : > { %v3853_v24 = vadd.f32 %v8080_v3, %v3761_v6  ;;  %v3303_v3 = vld [vmem:[#allocation4 + $0x4a8] sm:$0xff] }
 0x9fb   : > { %4272 = vmatmul.f32.gmra.mxu2 %v3243_v37  ;;  %v4160_v13 = vpop.f32.mrf.mxu1  ;;  %v4071_v37 = vpop.f32.mrf.mxu0 }
 0x9fe   : > { %v3932_v20 = vpop.f32.mrf.mxu2 }
 0x9ff   : > { %v8106_v31 = vadd.f32 %v3932_v20, %v3841_v11  ;;  %4219 = vmatmul.f32.gmra.mxu1 %v3372_v27  ;;  %v3293_v11 = vld [vmem:[#allocation4 + $0x458] sm:$0xff]  ;;  %v8130_v20 = vpop.f32.mrf.mxu3 }
 0xa03   : > { %4275 = vmatmul.f32.gmra.mxu2 %v3253_v43  ;;  %v4163_v27 = vpop.f32.mrf.mxu1  ;;  %v3856_v43 = vadd.f32 %v8091_v33, %v3764_v23  ;;  %v8133_v55 = vpop.f32.mrf.mxu0 }
 0xa06   : > { %v3935_v48 = vpop.f32.mrf.mxu2 }
 0xa07   : > { %v8111_v40 = vadd.f32 %v3935_v48, %v3844_v47  ;;  %4222 = vmatmul.f32.gmra.mxu1 %v3382_v28  ;;  %v3767_v47 = vadd.f32 %v8078_v57, %v8001_v32  ;;  %v4362_v32 = vpop.permute.xlu1 %4361 }
 0xa09   : > { %v3859_v48 = vadd.f32 %v3858_v38, %v3767_v47 }
 0xa0b   : > { %4278 = vmatmul.f32.gmra.mxu2 %v3263_v51  ;;  %v8137_v28 = vpop.f32.mrf.mxu1  ;;  %v8141_v51 = vpop.f32.mrf.mxu3 }
 0xa0c   : > { %v8145_v33 = vpop.f32.mrf.mxu0 }
 0xa0e   : > { %v3938_v10 = vpop.f32.mrf.mxu2 }
 0xa0f   : > { %v8116_v58 = vadd.f32 %v3938_v10, %v3847_v19  ;;  %4225 = vmatmul.f32.gmra.mxu1 %v3392_v15  ;;  %v3313_v15 = vld [vmem:[#allocation4 + $0x4f8] sm:$0xff]  ;;  %v3770_v10 = vadd.f32 %v8087_v44, %v8016_v52 }
 0xa13   : > { %4281 = vmatmul.f32.gmra.mxu2 %v3273_v29  ;;  %v8147_v19 = vpop.f32.mrf.mxu1  ;;  %v3862_v29 = vadd.f32 %v3861_v45, %v3770_v10  ;;  %v8153_v38 = vpop.f32.mrf.mxu3  ;;  %v3333_v45 = vld [vmem:[#allocation4 + $0x598] sm:$0xff] }
 0xa16   : > { %v3941_v34 = vpop.f32.mrf.mxu2 }
 0xa17   : > { %v8121_v8 = vadd.f32 %v3941_v34, %v3850_v12  ;;  %4228 = vmatmul.f32.gmra.mxu1 %v3402_v53  ;;  %v3323_v53 = vld [vmem:[#allocation4 + $0x548] sm:$0xff]  ;;  %v4367_v12 = vpop.permute.xlu0 %4366  ;;  %v8155_v34 = vpop.f32.mrf.mxu0 }
 0xa1b   : > { %4284 = vmatmul.f32.gmra.mxu2 %v3283_v30  ;;  %v4066_v30 = vadd.f32 %v8098_v26, %v8028_v59  ;;  %v8159_v6 = vpop.f32.mrf.mxu1  ;;  %v8164_v23 = vpop.f32.mrf.mxu3 }
 0xa1e   : > { %v3944_v18 = vpop.f32.mrf.mxu2 }
 0xa1f   : > { %v8126_v56 = vadd.f32 %v3944_v18, %v3853_v24  ;;  %v4158_v24 = vadd.f32 %v4157_v17, %v4066_v30  ;;  %v4542_v18 = vpop.permute.xlu1 %4541 }
 0xa23   : > { %4287 = vmatmul.f32.gmra.mxu2 %v3293_v11  ;;  %v3977_v11 = vadd.f32 %v3976_v41, %v7947_v1  ;;  %v8170_v26 = vpop.f32.mrf.mxu1 }
 0xa26   : > { %v3947_v7 = vpop.f32.mrf.mxu2 }
 0xa27   : > { %v8135_v46 = vadd.f32 %v3947_v7, %v3856_v43  ;;  %v8166_v43 = vpop.permute.xlu0 %4546  ;;  %v4069_v7 = vadd.f32 %v4068_v2, %v3977_v11 }
 0xa29   : > { %v4161_v59 = vadd.f32 %v4160_v13, %v4069_v7 }
 0xa2b   : > { %4290 = vmatmul.f32.gmra.mxu2 %v3303_v3  ;;  %v8168_v3 = vpop.f32.mrf.mxu0  ;;  %v8181_v11 = vpop.f32.mrf.mxu1 }
 0xa2e   : > { %v3950_v49 = vpop.f32.mrf.mxu2 }
 0xa2f   : > { %v8143_v5 = vadd.f32 %v3950_v49, %v3859_v48  ;;  %v4357_v48 = vpop.permute.xlu2 %4356  ;;  %v3343_v49 = vld [vmem:[#allocation4 + $0x5e8] sm:$0xff]  ;;  %v8177_v2 = vpop.permute.xlu0 %4381 }
 0xa33   : > { %4293 = vmatmul.f32.gmra.mxu2 %v3313_v15  ;;  %v3980_v15 = vadd.f32 %v3979_v50, %v7962_v63  ;;  %v8179_v30 = vpop.f32.mrf.mxu0  ;;  %v3353_v63 = vld [vmem:[#allocation4 + $0x638] sm:$0xff]  ;;  %v3983_v50 = vadd.f32 %v8130_v20, %v7975_v9 }
 0xa35   : > { %v4072_v1 = vadd.f32 %v4071_v37, %v3980_v15  ;;  %v4075_v7 = vadd.f32 %v8133_v55, %v3983_v50  ;;  %v3986_v55 = vadd.f32 %v8141_v51, %v7988_v39 }
 0xa36   : > { %v3953_v36 = vpop.f32.mrf.mxu2 }
 0xa37   : > { %v8151_v57 = vadd.f32 %v3953_v36, %v3862_v29  ;;  %v8173_v29 = vpop.permute.xlu1 %4376  ;;  %v8175_v36 = vpop.f32.mrf.mxu3 }
 0xa3b   : > { %4296 = vmatmul.f32.gmra.mxu2 %v3323_v53  ;;  %v4164_v53 = vadd.f32 %v4163_v27, %v4072_v1  ;;  %v8193_v20 = vpop.f32.mrf.mxu0 }
 0xa3e   : > { %v4249_v52 = vpop.f32.mrf.mxu2 }
 0xa3f   : > { %v8161_v44 = vadd.f32 %v4249_v52, %v4158_v24  ;;  %v8186_v27 = vpop.permute.xlu1 %4556 }
 0xa43   : > { %4299 = vmatmul.f32.gmra.mxu2 %v3333_v45 }
 0xa46   : > { %v4252_v47 = vpop.f32.mrf.mxu2 }
 0xa47   : > { %v4253_v17 = vadd.f32 %v4252_v47, %v4161_v59  ;;  %v4167_v47 = vadd.f32 %v8137_v28, %v4075_v7  ;;  %v8197_v28 = vpop.f32.mrf.mxu1  ;;  %v8205_v39 = vpop.permute.xlu1 %4391 }
 0xa49   : > { %v4475_v10 = vmul.f32 %v4357_v48, %v4253_v17  ;;  %v8189_v48 = vpop.f32.mrf.mxu3 }
 0xa4b   : > { %v4650_v41 = vadd.f32 %v4532_v54, %v4475_v10  ;;  %4302 = vmatmul.f32.gmra.mxu2 %v3343_v49  ;;  %v4537_v54 = vpop.permute.xlu2 %4536  ;;  %v8191_v10 = vpop.permute.xlu0 %4561 }
 0xa4d   : > { %v4700_v13 = vmin.f32 %v4650_v41, 0.0  ;;  %vm4675_vm1 = vcmp.gt.f32.partialorder %v4650_v41, 0.0 }
 0xa4e   : > { %v4255_v24 = vpop.f32.mrf.mxu2 }
 0xa4f   : > { %v4726_v52 = vmul.f32 1.442695, %v4700_v13  ;;  %v4256_v45 = vadd.f32 %v4255_v24, %v4164_v53 }
 0xa51   : > { %v4476_v37 = vmul.f32 %v4362_v32, %v4256_v45  ;;  %6173 = vpow2.f32 %v4726_v52  ;;  %v3363_v32 = vld [vmem:[#allocation4 + $0x688] sm:$0xff]  ;;  %v4078_v52 = vadd.f32 %v8145_v33, %v3986_v55 }
 0xa53   : > { %v4651_v59 = vadd.f32 %v4537_v54, %v4476_v37  ;;  %4305 = vmatmul.f32.gmra.mxu2 %v3353_v63  ;;  %v4170_v63 = vadd.f32 %v8147_v19, %v4078_v52  ;;  %v4372_v7 = vpop.permute.xlu2 %4371  ;;  %v8209_v33 = vpop.permute.xlu0 %4566 }
 0xa54   : > { %v8213_v19 = vpop.f32.mrf.mxu0 }
 0xa55   : > { %v4701_v17 = vmin.f32 %v4651_v59, 0.0  ;;  %vm4676_vm2 = vcmp.gt.f32.partialorder %v4651_v59, 0.0 }
 0xa56   : > { %v4258_v49 = vpop.f32.mrf.mxu2 }
 0xa57   : > { %v6174_v15 = vpop.eup %6173  ;;  %v4728_v1 = vmul.f32 1.442695, %v4701_v17  ;;  %v4259_v9 = vadd.f32 %v4258_v49, %v4167_v47  ;;  %v8207_v47 = vpop.f32.mrf.mxu3 }
 0xa58   : > { %v5317_v53 = vadd.f32 -1.0, %v6174_v15 }
 0xa59   : > { %v4477_v13 = vmul.f32 %v4367_v12, %v4259_v9  ;;  %6175 = vpow2.f32 %v4728_v1 }
 0xa5a   : > { %v8199_v24 = vsel %vm4675_vm1, %v4650_v41, %v5317_v53  ;;  %v3373_v41 = vld [vmem:[#allocation4 + $0x6d8] sm:$0xff] }
 0xa5b   : > { %v4652_v45 = vadd.f32 %v4542_v18, %v4477_v13  ;;  %4308 = vmatmul.f32.gmra.mxu2 %v3363_v32  ;;  %4851 = vrot.lane.b32.xlu2 %v8199_v24, %s8569_s1  ;;  %v3989_v18 = vadd.f32 %v8153_v38, %v8003_v22  ;;  %v8221_v32 = vpop.f32.mrf.mxu1 }
 0xa5d   : > { %v4702_v50 = vmin.f32 %v4652_v45, 0.0  ;;  %v4081_v1 = vadd.f32 %v8155_v34, %v3989_v18  ;;  %v3992_v34 = vadd.f32 %v8164_v23, %v8018_v62  ;;  %vm4677_vm3 = vcmp.gt.f32.partialorder %v4652_v45, 0.0 }
 0xa5e   : > { %v4261_v37 = vpop.f32.mrf.mxu2 }
 0xa5f   : > { %v6176_v54 = vpop.eup %6175  ;;  %v4730_v51 = vmul.f32 1.442695, %v4702_v50  ;;  %v4262_v12 = vadd.f32 %v4261_v37, %v4170_v63  ;;  %v4173_v53 = vadd.f32 %v8159_v6, %v4081_v1  ;;  %v3383_v63 = vld [vmem:[#allocation4 + $0x728] sm:$0xff]  ;;  %v8224_v50 = vpop.permute.xlu1 %4396  ;;  %v3393_v1 = vld [vmem:[#allocation4 + $0x778] sm:$0xff] }
 0xa60   : > { %v5318_v17 = vadd.f32 -1.0, %v6176_v54  ;;  %v4552_v37 = vpop.permute.xlu2 %4551  ;;  %v8229_v54 = vpop.f32.mrf.mxu3 }
 0xa61   : > { %v4478_v49 = vmul.f32 %v4372_v7, %v4262_v12  ;;  %6177 = vpow2.f32 %v4730_v51  ;;  %v8233_v51 = vpop.permute.xlu0 %4571  ;;  %v4084_v12 = vadd.f32 %v8168_v3, %v3992_v34  ;;  %v3995_v3 = vadd.f32 %v8175_v36, %v8025_v0 }
 0xa62   : > { %v8215_v15 = vsel %vm4676_vm2, %v4651_v59, %v5318_v17 }
 0xa63   : > { %v4653_v9 = vadd.f32 %v8166_v43, %v4478_v49  ;;  %4311 = vmatmul.f32.gmra.mxu2 %v3373_v41  ;;  %4853 = vrot.lane.b32.xlu2 %v8215_v15, %s8569_s1  ;;  %v8238_v41 = vpop.f32.mrf.mxu0  ;;  %v4176_v62 = vadd.f32 %v8170_v26, %v4084_v12  ;;  %v4087_v26 = vadd.f32 %v8179_v30, %v3995_v3 }
 0xa65   : > { %v4703_v22 = vmin.f32 %v4653_v9, 0.0  ;;  %vm4678_vm4 = vcmp.gt.f32.partialorder %v4653_v9, 0.0  ;;  %v4179_v0 = vadd.f32 %v8181_v11, %v4087_v26 }
 0xa66   : > { %v4264_v38 = vpop.f32.mrf.mxu2 }
 0xa67   : > { %v6178_v55 = vpop.eup %6177  ;;  %v4732_v13 = vmul.f32 1.442695, %v4703_v22  ;;  %v4265_v52 = vadd.f32 %v4264_v38, %v4173_v53 }
 0xa68   : > { %v5319_v59 = vadd.f32 -1.0, %v6178_v55  ;;  %v8248_v55 = vpop.permute.xlu1 %4401  ;;  %v4387_v30 = vpop.permute.xlu2 %4386 }
 0xa69   : > { %v4479_v43 = vmul.f32 %v8173_v29, %v4265_v52  ;;  %6179 = vpow2.f32 %v4732_v13  ;;  %v8241_v29 = vpop.f32.mrf.mxu1  ;;  %v8254_v52 = vpop.f32.mrf.mxu3 }
 0xa6a   : > { %v8231_v6 = vsel %vm4677_vm3, %v4652_v45, %v5319_v59 }
 0xa6b   : > { %v4654_v7 = vadd.f32 %v4552_v37, %v4479_v43  ;;  %4314 = vmatmul.f32.gmra.mxu2 %v3383_v63  ;;  %4855 = vrot.lane.b32.xlu2 %v8231_v6, %s8569_s1  ;;  %v8256_v63 = vpop.permute.xlu0 %4576 }
 0xa6d   : > { %v4704_v23 = vmin.f32 %v4654_v7, 0.0  ;;  %vm4679_vm5 = vcmp.gt.f32.partialorder %v4654_v7, 0.0 }
 0xa6e   : > { %v4267_v17 = vpop.f32.mrf.mxu2 }
 0xa6f   : > { %v6180_v18 = vpop.eup %6179  ;;  %v4734_v45 = vmul.f32 1.442695, %v4704_v23  ;;  %v4268_v49 = vadd.f32 %v4267_v17, %v4176_v62  ;;  %v3998_v62 = vadd.f32 %v8189_v48, %v8035_v25 }
 0xa70   : > { %v5320_v53 = vadd.f32 -1.0, %v6180_v18 }
 0xa71   : > { %v4480_v22 = vmul.f32 %v8177_v2, %v4268_v49  ;;  %6181 = vpow2.f32 %v4734_v45  ;;  %v8259_v2 = vpop.f32.mrf.mxu0  ;;  %v8261_v37 = vpop.f32.mrf.mxu1  ;;  %v4090_v11 = vadd.f32 %v8193_v20, %v3998_v62 }
 0xa72   : > { %v8246_v38 = vsel %vm4678_vm4, %v4653_v9, %v5320_v53  ;;  %v8271_v45 = vpop.permute.xlu1 %4406  ;;  %v8274_v53 = vpop.f32.mrf.mxu3 }
 0xa73   : > { %v4655_v13 = vadd.f32 %v8186_v27, %v4480_v22  ;;  %4317 = vmatmul.f32.gmra.mxu2 %v3393_v1  ;;  %4857 = vrot.lane.b32.xlu2 %v8246_v38, %s8569_s1  ;;  %v3403_v27 = vld [vmem:[#allocation4 + $0x7c8] sm:$0xff]  ;;  %v4182_v49 = vadd.f32 %v8197_v28, %v4090_v11  ;;  %v8276_v3 = vpop.permute.xlu0 %4581  ;;  %v4001_v28 = vadd.f32 %v8207_v47, %v8044_v60 }
 0xa75   : > { %v4705_v36 = vmin.f32 %v4655_v13, 0.0  ;;  %vm4680_vm7 = vcmp.gt.f32.partialorder %v4655_v13, 0.0 }
 0xa76   : > { %v4270_v9 = vpop.f32.mrf.mxu2 }
 0xa77   : > { %v6182_v59 = vpop.eup %6181  ;;  %v4736_v34 = vmul.f32 1.442695, %v4705_v36  ;;  %v4271_v43 = vadd.f32 %v4270_v9, %v4179_v0 }
 0xa78   : > { %v5321_v12 = vadd.f32 -1.0, %v6182_v59  ;;  %v4093_v59 = vadd.f32 %v8213_v19, %v4001_v28  ;;  %v4004_v19 = vadd.f32 %v8229_v54, %v8053_v14 }
 0xa79   : > { %v4481_v23 = vmul.f32 %v4387_v30, %v4271_v43  ;;  %6183 = vpow2.f32 %v4736_v34  ;;  %v8281_v20 = vpop.f32.mrf.mxu0  ;;  %v8286_v36 = vpop.f32.mrf.mxu1 }
 0xa7a   : > { %v8265_v17 = vsel %vm4679_vm5, %v4654_v7, %v5321_v12  ;;  %v4185_v43 = vadd.f32 %v8221_v32, %v4093_v59  ;;  %v8295_v47 = vpop.permute.xlu1 %4411  ;;  %v4012_v62 = vpop.f32.mrf.mxu3 }
 0xa7b   : > { %v4656_v18 = vadd.f32 %v8191_v10, %v4481_v23  ;;  %4320 = vmatmul.f32.gmra.mxu2 %v3403_v27  ;;  %4859 = vrot.lane.b32.xlu2 %v8265_v17, %s8569_s1  ;;  %v4949_v10 = vld [vmem:[%s8532_s16] sm:$0x7f] }
 0xa7c   : > { %5386 = vmatpush.msk.msra.mxu3 %vm5026_vm6, %v4949_v10  ;;  %5341 = vmatpush.msk.msra.mxu1 %vm5026_vm6, %v4949_v10 }
 0xa7d   : > { %v4706_v1 = vmin.f32 %v4656_v18, 0.0  ;;  %vm4681_vm8 = vcmp.gt.f32.partialorder %v4656_v18, 0.0 }
 0xa7e   : > { %v4273_v25 = vpop.f32.mrf.mxu2 }
 0xa7f   : > { %v6184_v48 = vpop.eup %6183  ;;  %v4738_v7 = vmul.f32 1.442695, %v4706_v1  ;;  %v4274_v22 = vadd.f32 %v4273_v25, %v4182_v49  ;;  %v4096_v49 = vadd.f32 %v8238_v41, %v4004_v19 }
 0xa80   : > { %v5322_v26 = vadd.f32 -1.0, %v6184_v48 }
 0xa81   : > { %v4482_v0 = vmul.f32 %v8205_v39, %v4274_v22  ;;  %6185 = vpow2.f32 %v4738_v7  ;;  %v4104_v11 = vpop.f32.mrf.mxu0  ;;  %v4196_v25 = vpop.f32.mrf.mxu1  ;;  %v4188_v48 = vadd.f32 %v8241_v29, %v4096_v49 }
 0xa82   : > { %v8288_v9 = vsel %vm4680_vm7, %v4655_v13, %v5322_v26  ;;  %v8297_v13 = vpop.permute.xlu0 %4586  ;;  %v4417_v26 = vpop.permute.xlu1 %4416 }
 0xa83   : > { %v4657_v34 = vadd.f32 %v8209_v33, %v4482_v0  ;;  %4861 = vrot.lane.b32.xlu2 %v8288_v9, %s8569_s1 }
 0xa85   : > { %v4707_v30 = vmin.f32 %v4657_v34, 0.0  ;;  %vm4682_vm9 = vcmp.gt.f32.partialorder %v4657_v34, 0.0 }
 0xa86   : > { %v4276_v27 = vpop.f32.mrf.mxu2 }
 0xa87   : > { %v6186_v60 = vpop.eup %6185  ;;  %v4740_v39 = vmul.f32 1.442695, %v4707_v30  ;;  %v4277_v12 = vadd.f32 %v4276_v27, %v4185_v43 }
 0xa88   : > { %v5323_v23 = vadd.f32 -1.0, %v6186_v60 }
 0xa89   : > { %v4483_v33 = vmul.f32 %v8224_v50, %v4277_v12  ;;  %6187 = vpow2.f32 %v4740_v39  ;;  %v4107_v43 = vpop.f32.mrf.mxu0 }
 0xa8a   : > { %v8302_v32 = vsel %vm4681_vm8, %v4656_v18, %v5323_v23  ;;  %v4007_v18 = vadd.f32 %v8254_v52, %v8062_v61  ;;  %v4592_v0 = vpop.permute.xlu0 %4591  ;;  %v4199_v61 = vpop.f32.mrf.mxu1 }
 0xa8b   : > { %v4658_v1 = vadd.f32 %v8233_v51, %v4483_v33  ;;  %4863 = vrot.lane.b32.xlu2 %v8302_v32, %s8569_s1  ;;  %v4015_v51 = vpop.f32.mrf.mxu3  ;;  %v4422_v23 = vpop.permute.xlu1 %4421 }
 0xa8c   : > { %v4099_v29 = vadd.f32 %v8259_v2, %v4007_v18 }
 0xa8d   : > { %v4708_v7 = vmin.f32 %v4658_v1, 0.0  ;;  %vm4683_vm10 = vcmp.gt.f32.partialorder %v4658_v1, 0.0 }
 0xa8e   : > { %v4279_v22 = vpop.f32.mrf.mxu2  ;;  %v4191_v30 = vadd.f32 %v8261_v37, %v4099_v29 }
 0xa8f   : > { %v6188_v14 = vpop.eup %6187  ;;  %v4742_v54 = vmul.f32 1.442695, %v4708_v7  ;;  %v4280_v50 = vadd.f32 %v4279_v22, %v4188_v48 }
 0xa90   : > { %v5324_v10 = vadd.f32 -1.0, %v6188_v14 }
 0xa91   : > { %v4484_v41 = vmul.f32 %v8248_v55, %v4280_v50  ;;  %6189 = vpow2.f32 %v4742_v54  ;;  %v4013_v50 = vadd.f32 %v4012_v62, %v8076_v21 }
 0xa92   : > { %v8312_v28 = vsel %vm4682_vm9, %v4657_v34, %v5324_v10  ;;  %v4010_v34 = vadd.f32 %v8274_v53, %v8069_v35  ;;  %v4597_v49 = vpop.permute.xlu0 %4596  ;;  %v4110_v35 = vpop.f32.mrf.mxu0 }
 0xa93   : > { %v4659_v59 = vadd.f32 %v8256_v63, %v4484_v41  ;;  %4865 = vrot.lane.b32.xlu2 %v8312_v28, %s8569_s1  ;;  %v4018_v33 = vpop.f32.mrf.mxu3  ;;  %v4105_v10 = vadd.f32 %v4104_v11, %v4013_v50 }
 0xa94   : > { %v4102_v19 = vadd.f32 %v8281_v20, %v4010_v34 }
 0xa95   : > { %v4709_v27 = vmin.f32 %v4659_v59, 0.0  ;;  %vm4684_vm11 = vcmp.gt.f32.partialorder %v4659_v59, 0.0  ;;  %v4197_v41 = vadd.f32 %v4196_v25, %v4105_v10 }
 0xa96   : > { %v4282_v52 = vpop.f32.mrf.mxu2  ;;  %v4194_v48 = vadd.f32 %v8286_v36, %v4102_v19  ;;  %v4427_v36 = vpop.permute.xlu1 %4426 }
 0xa97   : > { %v6190_v55 = vpop.eup %6189  ;;  %v4744_v60 = vmul.f32 1.442695, %v4709_v27  ;;  %v4283_v39 = vadd.f32 %v4282_v52, %v4191_v30 }
 0xa98   : > { %v5325_v12 = vadd.f32 -1.0, %v6190_v55 }
 0xa99   : > { %v4485_v2 = vmul.f32 %v8271_v45, %v4283_v39  ;;  %6191 = vpow2.f32 %v4744_v60 }
 0xa9a   : > { %v8322_v63 = vsel %vm4683_vm10, %v4658_v1, %v5325_v12  ;;  %v4202_v1 = vpop.f32.mrf.mxu1  ;;  %v4602_v55 = vpop.permute.xlu0 %4601 }
 0xa9b   : > { %v4660_v37 = vadd.f32 %v8276_v3, %v4485_v2  ;;  %4867 = vrot.lane.b32.xlu2 %v8322_v63, %s8569_s1  ;;  %v4021_v30 = vpop.f32.mrf.mxu3 }
 0xa9d   : > { %v4710_v7 = vmin.f32 %v4660_v37, 0.0  ;;  %vm4685_vm12 = vcmp.gt.f32.partialorder %v4660_v37, 0.0 }
 0xa9e   : > { %v4285_v53 = vpop.f32.mrf.mxu2 }
 0xa9f   : > { %v6192_v45 = vpop.eup %6191  ;;  %v4746_v22 = vmul.f32 1.442695, %v4710_v7  ;;  %v4286_v14 = vadd.f32 %v4285_v53, %v4194_v48  ;;  %v4432_v7 = vpop.permute.xlu1 %4431 }
 0xaa0   : > { %v5326_v54 = vadd.f32 -1.0, %v6192_v45 }
 0xaa1   : > { %v4486_v20 = vmul.f32 %v8295_v47, %v4286_v14  ;;  %6193 = vpow2.f32 %v4746_v22  ;;  %v4113_v47 = vpop.f32.mrf.mxu0 }
 0xaa2   : > { %v8331_v3 = vsel %vm4684_vm11, %v4659_v59, %v5326_v54  ;;  %v4016_v59 = vadd.f32 %v4015_v51, %v8085_v4  ;;  %v4019_v51 = vadd.f32 %v4018_v33, %v8094_v16  ;;  %vm5122_vm11 = vcmask 31744  }
 0xaa3   : > { %v4661_v18 = vadd.f32 %v8297_v13, %v4486_v20  ;;  %4869 = vrot.lane.b32.xlu2 %v8331_v3, %s8569_s1  ;;  %v4205_v13 = vpop.f32.mrf.mxu1  ;;  %v4024_v22 = vpop.f32.mrf.mxu3 }
 0xaa4   : > { %v4108_v12 = vadd.f32 %v4107_v43, %v4016_v59 }
 0xaa5   : > { %v4711_v29 = vmin.f32 %v4661_v18, 0.0  ;;  %vm4686_vm13 = vcmp.gt.f32.partialorder %v4661_v18, 0.0 }
 0xaa6   : > { %v4288_v27 = vpop.f32.mrf.mxu2  ;;  %v4200_v25 = vadd.f32 %v4199_v61, %v4108_v12 }
 0xaa7   : > { %v6194_v52 = vpop.eup %6193  ;;  %v4748_v21 = vmul.f32 1.442695, %v4711_v29  ;;  %v4289_v62 = vadd.f32 %v4288_v27, %v4197_v41  ;;  %v4437_v27 = vpop.permute.xlu1 %4436 }
 0xaa8   : > { %v5327_v60 = vadd.f32 -1.0, %v6194_v52 }
 0xaa9   : > { %v4487_v39 = vmul.f32 %v4417_v26, %v4289_v62  ;;  %6195 = vpow2.f32 %v4748_v21  ;;  %v4607_v26 = vpop.permute.xlu0 %4606  ;;  %v4116_v43 = vpop.f32.mrf.mxu0 }
 0xaaa   : > { %v8337_v11 = vsel %vm4685_vm12, %v4660_v37, %v5327_v60  ;;  %v4111_v37 = vadd.f32 %v4110_v35, %v4019_v51 }
 0xaab   : > { %v4662_v34 = vadd.f32 %v4592_v0, %v4487_v39  ;;  %4871 = vrot.lane.b32.xlu2 %v8337_v11, %s8569_s1  ;;  %v4208_v61 = vpop.f32.mrf.mxu1  ;;  %v4027_v52 = vpop.f32.mrf.mxu3 }
 0xaac   : > { %v4203_v50 = vadd.f32 %v4202_v1, %v4111_v37 }
 0xaad   : > { %v4712_v2 = vmin.f32 %v4662_v34, 0.0  ;;  %vm4687_vm15 = vcmp.gt.f32.partialorder %v4662_v34, 0.0 }
 0xaae   : > { %v4291_v19 = vpop.f32.mrf.mxu2 }
 0xaaf   : > { %v6196_v48 = vpop.eup %6195  ;;  %v4750_v53 = vmul.f32 1.442695, %v4712_v2  ;;  %v4292_v45 = vadd.f32 %v4291_v19, %v4200_v25 }
 0xab0   : > { %v5328_v4 = vadd.f32 -1.0, %v6196_v48 }
 0xab1   : > { %v4488_v14 = vmul.f32 %v4422_v23, %v4292_v45  ;;  %6197 = vpow2.f32 %v4750_v53  ;;  %v4612_v21 = vpop.permute.xlu0 %4611 }
 0xab2   : > { %v8342_v0 = vsel %vm4686_vm13, %v4661_v18, %v5328_v4 }
 0xab3   : > { %v4663_v54 = vadd.f32 %v4597_v49, %v4488_v14  ;;  %4873 = vrot.lane.b32.xlu2 %v8342_v0, %s8569_s1  ;;  %v4022_v49 = vadd.f32 %v4021_v30, %v8101_v42  ;;  %v4211_v25 = vpop.f32.mrf.mxu1 }
 0xab5   : > { %v4713_v20 = vmin.f32 %v4663_v54, 0.0  ;;  %v4852_v10 = vpop.permute.xlu2 %4851  ;;  %v4114_v62 = vadd.f32 %v4113_v47, %v4022_v49  ;;  %v4025_v47 = vadd.f32 %v4024_v22, %v8106_v31  ;;  %vm4688_vm0 = vcmp.gt.f32.partialorder %v4663_v54, 0.0 }
 0xab6   : > { %v4925_v41 = vmax.f32 %v8199_v24, %v4852_v10  ;;  %v4294_v29 = vpop.f32.mrf.mxu2  ;;  %v4119_v24 = vpop.f32.mrf.mxu0 }
 0xab7   : > { %v6198_v16 = vpop.eup %6197  ;;  %v4752_v23 = vmul.f32 1.442695, %v4713_v20  ;;  %v4295_v33 = vadd.f32 %v4294_v29, %v4203_v50  ;;  %v4206_v59 = vadd.f32 %v4205_v13, %v4114_v62  ;;  %v4442_v13 = vpop.permute.xlu1 %4441  ;;  %v4117_v53 = vadd.f32 %v4116_v43, %v4025_v47 }
 0xab8   : > { %5343 = vmatmul.msk.f32.vlgmr.msra.gmra.mxu3 %vm4950_vm14, %v4925_v41  ;;  %v5329_v18 = vadd.f32 -1.0, %v6198_v16 }
 0xab9   : > { %v4489_v35 = vmul.f32 %v4427_v36, %v4295_v33  ;;  %6199 = vpow2.f32 %v4752_v23  ;;  %v4617_v4 = vpop.permute.xlu0 %4616  ;;  %v4209_v51 = vadd.f32 %v4208_v61, %v4117_v53 }
 0xaba   : > { %v8349_v1 = vsel %vm4687_vm15, %v4662_v34, %v5329_v18 }
 0xabb   : > { %v4664_v60 = vadd.f32 %v4602_v55, %v4489_v35  ;;  %4875 = vrot.lane.b32.xlu2 %v8349_v1, %s8569_s1 }
 0xabd   : > { %v4714_v39 = vmin.f32 %v4664_v60, 0.0  ;;  %v4854_v12 = vpop.permute.xlu2 %4853  ;;  %vm4689_vm1 = vcmp.gt.f32.partialorder %v4664_v60, 0.0 }
 0xabe   : > { %v4926_v2 = vmax.f32 %v8215_v15, %v4854_v12  ;;  %v4297_v42 = vpop.f32.mrf.mxu2  ;;  %v4030_v15 = vpop.f32.mrf.mxu3 }
 0xabf   : > { %v6200_v36 = vpop.eup %6199  ;;  %v4754_v30 = vmul.f32 1.442695, %v4714_v39  ;;  %v4298_v19 = vadd.f32 %v4297_v42, %v4206_v59  ;;  %v4122_v50 = vpop.f32.mrf.mxu0 }
 0xac0   : > { %5344 = vmatmul.msk.f32.gmra.mxu3 %vm4950_vm14, %v4926_v2  ;;  %v5330_v34 = vadd.f32 -1.0, %v6200_v36 }
 0xac1   : > { %v4490_v55 = vmul.f32 %v4432_v7, %v4298_v19  ;;  %6201 = vpow2.f32 %v4754_v30 }
 0xac2   : > { %v8356_v48 = vsel %vm4688_vm0, %v4663_v54, %v5330_v34  ;;  %v4214_v54 = vpop.f32.mrf.mxu1 }
 0xac3   : > { %v4665_v45 = vadd.f32 %v4607_v26, %v4490_v55  ;;  %4877 = vrot.lane.b32.xlu2 %v8356_v48, %s8569_s1  ;;  %v4028_v26 = vadd.f32 %v4027_v52, %v8111_v40  ;;  %v4622_v40 = vpop.permute.xlu0 %4621 }
 0xac5   : > { %v4715_v14 = vmin.f32 %v4665_v45, 0.0  ;;  %v4856_v37 = vpop.permute.xlu2 %4855  ;;  %v4120_v61 = vadd.f32 %v4119_v24, %v4028_v26  ;;  %vm4690_vm2 = vcmp.gt.f32.partialorder %v4665_v45, 0.0 }
 0xac6   : > { %v4927_v20 = vmax.f32 %v8231_v6, %v4856_v37  ;;  %v4300_v31 = vpop.f32.mrf.mxu2  ;;  %v4447_v6 = vpop.permute.xlu1 %4446 }
 0xac7   : > { %v6202_v7 = vpop.eup %6201  ;;  %v4756_v22 = vmul.f32 1.442695, %v4715_v14  ;;  %v4301_v10 = vadd.f32 %v4300_v31, %v4209_v51  ;;  %v4212_v23 = vadd.f32 %v4211_v25, %v4120_v61  ;;  %v4033_v49 = vpop.f32.mrf.mxu3  ;;  %v4499_v61 = vld [vmem:[%s8531_s15] sm:$0xff] }
 0xac8   : > { %5345 = vmatmul.msk.f32.gmra.mxu3 %vm4950_vm14, %v4927_v20  ;;  %v5331_v43 = vadd.f32 -1.0, %v6202_v7  ;;  %v4125_v39 = vpop.f32.mrf.mxu0 }
 0xac9   : > { %v4491_v41 = vmul.f32 %v4437_v27, %v4301_v10  ;;  %6203 = vpow2.f32 %v4756_v22 }
 0xaca   : > { %v8363_v29 = vsel %vm4689_vm1, %v4664_v60, %v5331_v43  ;;  %v4217_v12 = vpop.f32.mrf.mxu1 }
 0xacb   : > { %v4666_v16 = vadd.f32 %v4612_v21, %v4491_v41  ;;  %4879 = vrot.lane.b32.xlu2 %v8363_v29, %s8569_s1  ;;  %v4031_v21 = vadd.f32 %v4030_v15, %v8116_v58  ;;  %v4627_v15 = vpop.permute.xlu0 %4626 }
 0xacd   : > { %v4716_v33 = vmin.f32 %v4666_v16, 0.0  ;;  %v4858_v18 = vpop.permute.xlu2 %4857  ;;  %v4123_v2 = vadd.f32 %v4122_v50, %v4031_v21  ;;  %vm4691_vm3 = vcmp.gt.f32.partialorder %v4666_v16, 0.0 }
 0xace   : > { %v4928_v35 = vmax.f32 %v8246_v38, %v4858_v18  ;;  %v4303_v62 = vpop.f32.mrf.mxu2  ;;  %v4452_v55 = vpop.permute.xlu1 %4451 }
 0xacf   : > { %v6204_v59 = vpop.eup %6203  ;;  %v4758_v27 = vmul.f32 1.442695, %v4716_v33  ;;  %v4304_v52 = vadd.f32 %v4303_v62, %v4212_v23  ;;  %v4215_v38 = vadd.f32 %v4214_v54, %v4123_v2  ;;  %v4036_v53 = vpop.f32.mrf.mxu3 }
 0xad0   : > { %5346 = vmatmul.msk.f32.gmra.mxu3 %vm4950_vm14, %v4928_v35  ;;  %v5332_v60 = vadd.f32 -1.0, %v6204_v59  ;;  %v4128_v14 = vpop.f32.mrf.mxu0 }
 0xad1   : > { %v4492_v24 = vmul.f32 %v4442_v13, %v4304_v52  ;;  %6205 = vpow2.f32 %v4758_v27 }
 0xad2   : > { %v8370_v25 = vsel %vm4690_vm2, %v4665_v45, %v5332_v60  ;;  %v4220_v20 = vpop.f32.mrf.mxu1 }
 0xad3   : > { %v4667_v42 = vadd.f32 %v4617_v4, %v4492_v24  ;;  %4881 = vrot.lane.b32.xlu2 %v8370_v25, %s8569_s1  ;;  %v4034_v4 = vadd.f32 %v4033_v49, %v8121_v8 }
 0xad5   : > { %v4717_v36 = vmin.f32 %v4667_v42, 0.0  ;;  %v4860_v30 = vpop.permute.xlu2 %4859  ;;  %v4126_v50 = vadd.f32 %v4125_v39, %v4034_v4  ;;  %vm4692_vm4 = vcmp.gt.f32.partialorder %v4667_v42, 0.0 }
 0xad6   : > { %v4929_v19 = vmax.f32 %v8265_v17, %v4860_v30  ;;  %v4306_v34 = vpop.f32.mrf.mxu2 }
 0xad7   : > { %v6206_v47 = vpop.eup %6205  ;;  %v4760_v58 = vmul.f32 1.442695, %v4717_v36  ;;  %v4307_v13 = vadd.f32 %v4306_v34, %v4215_v38  ;;  %v4218_v31 = vadd.f32 %v4217_v12, %v4126_v50  ;;  %v4039_v33 = vpop.f32.mrf.mxu3 }
 0xad8   : > { %5347 = vmatmul.msk.f32.gmra.mxu3 %vm4950_vm14, %v4929_v19  ;;  %v5333_v45 = vadd.f32 -1.0, %v6206_v47  ;;  %v4131_v62 = vpop.f32.mrf.mxu0  ;;  %v4040_v2 = vadd.f32 %v4039_v33, %v8135_v46 }
 0xad9   : > { %v4493_v51 = vmul.f32 %v4447_v6, %v4307_v13  ;;  %6207 = vpow2.f32 %v4760_v58  ;;  %v4037_v6 = vadd.f32 %v4036_v53, %v8126_v56 }
 0xada   : > { %v8377_v37 = vsel %vm4691_vm3, %v4666_v16, %v5333_v45  ;;  %v4457_v16 = vpop.permute.xlu1 %4456  ;;  %v4223_v52 = vpop.f32.mrf.mxu1  ;;  %v4132_v30 = vadd.f32 %v4131_v62, %v4040_v2 }
 0xadb   : > { %v4668_v17 = vadd.f32 %v4622_v40, %v4493_v51  ;;  %4883 = vrot.lane.b32.xlu2 %v8377_v37, %s8569_s1  ;;  %v4129_v49 = vadd.f32 %v4128_v14, %v4037_v6 }
 0xadc   : > { %v4224_v47 = vadd.f32 %v4223_v52, %v4132_v30 }
 0xadd   : > { %v4718_v7 = vmin.f32 %v4668_v17, 0.0  ;;  %v4862_v22 = vpop.permute.xlu2 %4861  ;;  %v4221_v59 = vadd.f32 %v4220_v20, %v4129_v49  ;;  %vm4693_vm5 = vcmp.gt.f32.partialorder %v4668_v17, 0.0 }
 0xade   : > { %v4930_v10 = vmax.f32 %v8288_v9, %v4862_v22  ;;  %v4309_v54 = vpop.f32.mrf.mxu2  ;;  %v4632_v9 = vpop.permute.xlu0 %4631 }
 0xadf   : > { %v6208_v43 = vpop.eup %6207  ;;  %v4762_v8 = vmul.f32 1.442695, %v4718_v7  ;;  %v4310_v26 = vadd.f32 %v4309_v54, %v4218_v31 }
 0xae0   : > { %5348 = vmatmul.msk.f32.gmra.mxu3 %vm4950_vm14, %v4930_v10  ;;  %v5334_v41 = vadd.f32 -1.0, %v6208_v43  ;;  %v4134_v13 = vpop.f32.mrf.mxu0 }
 0xae1   : > { %v4494_v23 = vmul.f32 %v4452_v55, %v4310_v26  ;;  %6209 = vpow2.f32 %v4762_v8 }
 0xae2   : > { %v8387_v18 = vsel %vm4692_vm4, %v4667_v42, %v5334_v41  ;;  %v4462_v36 = vpop.permute.xlu1 %4461  ;;  %v4226_v51 = vpop.f32.mrf.mxu1 }
 0xae3   : > { %v4669_v35 = vadd.f32 %v4627_v15, %v4494_v23  ;;  %4885 = vrot.lane.b32.xlu0 %v8387_v18, %s8569_s1  ;;  %4526 = vperm.xlu2 %5478, %v4499_v61  }
 0xae5   : > { %v4719_v40 = vmin.f32 %v4669_v35, 0.0  ;;  %v4864_v27 = vpop.permute.xlu2 %4863  ;;  %vm4694_vm6 = vcmp.gt.f32.partialorder %v4669_v35, 0.0 }
 0xae6   : > { %v4931_v56 = vmax.f32 %v8302_v32, %v4864_v27  ;;  %v4312_v39 = vpop.f32.mrf.mxu2  ;;  %v4042_v32 = vpop.f32.mrf.mxu3 }
 0xae7   : > { %v6210_v60 = vpop.eup %6209  ;;  %v4764_v21 = vmul.f32 1.442695, %v4719_v40  ;;  %v4313_v24 = vadd.f32 %v4312_v39, %v4221_v59  ;;  %v4637_v34 = vpop.permute.xlu0 %4636  ;;  %v4043_v50 = vadd.f32 %v4042_v32, %v8143_v5 }
 0xae8   : > { %5349 = vmatmul.msk.f32.gmra.mxu3 %vm4950_vm14, %v4931_v56  ;;  %v5335_v12 = vadd.f32 -1.0, %v6210_v60  ;;  %v4137_v6 = vpop.f32.mrf.mxu0 }
 0xae9   : > { %v4495_v42 = vmul.f32 %v4457_v16, %v4313_v24  ;;  %6211 = vpow2.f32 %v4764_v21  ;;  %v4135_v31 = vadd.f32 %v4134_v13, %v4043_v50 }
 0xaea   : > { %v8394_v38 = vsel %vm4693_vm5, %v4668_v17, %v5335_v12  ;;  %v4229_v49 = vpop.f32.mrf.mxu1 }
 0xaeb   : > { %v4670_v19 = vadd.f32 %v4632_v9, %v4495_v42  ;;  %4887 = vrot.lane.b32.xlu1 %v8394_v38, %s8569_s1  ;;  %v4227_v22 = vadd.f32 %v4226_v51, %v4135_v31 }
 0xaed   : > { %v4720_v55 = vmin.f32 %v4670_v19, 0.0  ;;  %v4866_v58 = vpop.permute.xlu2 %4865  ;;  %vm4695_vm7 = vcmp.gt.f32.partialorder %v4670_v19, 0.0 }
 0xaee   : > { %v4932_v53 = vmax.f32 %v8312_v28, %v4866_v58  ;;  %v4315_v46 = vpop.f32.mrf.mxu2  ;;  %v4467_v28 = vpop.permute.xlu1 %4466 }
 0xaef   : > { %v6212_v45 = vpop.eup %6211  ;;  %v4766_v15 = vmul.f32 1.442695, %v4720_v55  ;;  %v4316_v4 = vadd.f32 %v4315_v46, %v4224_v47  ;;  %v4045_v43 = vpop.f32.mrf.mxu3 }
 0xaf0   : > { %5350 = vmatmul.msk.f32.gmra.mxu3 %vm4950_vm14, %v4932_v53  ;;  %v5336_v14 = vadd.f32 -1.0, %v6212_v45  ;;  %v4642_v16 = vpop.permute.xlu0 %4641  ;;  %v4046_v33 = vadd.f32 %v4045_v43, %v8151_v57 }
 0xaf1   : > { %v4496_v17 = vmul.f32 %v4462_v36, %v4316_v4  ;;  %6213 = vpow2.f32 %v4766_v15 }
 0xaf2   : > { %v8401_v20 = vsel %vm4694_vm6, %v4669_v35, %v5336_v14  ;;  %v4138_v62 = vadd.f32 %v4137_v6, %v4046_v33 }
 0xaf3   : > { %v4671_v7 = vadd.f32 %v4637_v34, %v4496_v17  ;;  %4889 = vrot.lane.b32.xlu2 %v8401_v20, %s8569_s1 }
 0xaf5   : > { %v4721_v10 = vmin.f32 %v4671_v7, 0.0  ;;  %v4868_v54 = vpop.permute.xlu2 %4867  ;;  %vm4696_vm8 = vcmp.gt.f32.partialorder %v4671_v7, 0.0 }
 0xaf6   : > { %v4933_v8 = vmax.f32 %v8322_v63, %v4868_v54  ;;  %v4318_v26 = vpop.f32.mrf.mxu2  ;;  %v4230_v63 = vadd.f32 %v4229_v49, %v4138_v62  ;;  %v4472_v21 = vpop.permute.xlu1 %4471 }
 0xaf7   : > { %v6214_v41 = vpop.eup %6213  ;;  %v4768_v5 = vmul.f32 1.442695, %v4721_v10  ;;  %v4319_v61 = vadd.f32 %v4318_v26, %v4227_v22 }
 0xaf8   : > { %5351 = vmatmul.msk.f32.gmra.mxu3 %vm4950_vm14, %v4933_v8  ;;  %v5337_v23 = vadd.f32 -1.0, %v6214_v41  ;;  %v4647_v2 = vpop.permute.xlu0 %4646 }
 0xaf9   : > { %v4497_v9 = vmul.f32 %v4467_v28, %v4319_v61  ;;  %6215 = vpow2.f32 %v4768_v5 }
 0xafa   : > { %v8408_v35 = vsel %vm4695_vm7, %v4670_v19, %v5337_v23 }
 0xafb   : > { %v4672_v59 = vadd.f32 %v4642_v16, %v4497_v9  ;;  %4891 = vrot.lane.b32.xlu0 %v8408_v35, %s8569_s1 }
 0xafd   : > { %v4722_v40 = vmin.f32 %v4672_v59, 0.0  ;;  %v4870_v27 = vpop.permute.xlu2 %4869  ;;  %vm4697_vm9 = vcmp.gt.f32.partialorder %v4672_v59, 0.0 }
 0xafe   : > { %v4934_v52 = vmax.f32 %v8331_v3, %v4870_v27  ;;  %v4321_v56 = vpop.f32.mrf.mxu2 }
 0xaff   : > { %v6216_v39 = vpop.eup %6215  ;;  %v4770_v60 = vmul.f32 1.442695, %v4722_v40  ;;  %v4322_v57 = vadd.f32 %v4321_v56, %v4230_v63 }
 0xb00   : > { %5352 = vmatmul.msk.f32.gmra.mxu3 %vm4950_vm14, %v4934_v52  ;;  %v5338_v24 = vadd.f32 -1.0, %v6216_v39 }
 0xb01   : > { %v4498_v12 = vmul.f32 %v4472_v21, %v4322_v57  ;;  %6217 = vpow2.f32 %v4770_v60 }
 0xb02   : > { %v8414_v42 = vsel %vm4696_vm8, %v4671_v7, %v5338_v24 }
 0xb03   : > { %v4673_v36 = vadd.f32 %v4647_v2, %v4498_v12  ;;  %4893 = vrot.lane.b32.xlu1 %v8414_v42, %s8569_s1 }
 0xb05   : > { %v4723_v30 = vmin.f32 %v4673_v36, 0.0  ;;  %v4872_v3 = vpop.permute.xlu2 %4871  ;;  %vm4698_vm10 = vcmp.gt.f32.partialorder %v4673_v36, 0.0 }
 0xb06   : > { %v4935_v19 = vmax.f32 %v8337_v11, %v4872_v3 }
 0xb07   : > { %v6218_v32 = vpop.eup %6217  ;;  %v4772_v34 = vmul.f32 1.442695, %v4723_v30 }
 0xb08   : > { %5353 = vmatmul.msk.f32.gmra.mxu3 %vm4950_vm14, %v4935_v19  ;;  %v5339_v47 = vadd.f32 -1.0, %v6218_v32 }
 0xb09   : > { %6219 = vpow2.f32 %v4772_v34 }
 0xb0a   : > { %v8420_v55 = vsel %vm4697_vm9, %v4672_v59, %v5339_v47 }
 0xb0b   : > { %4895 = vrot.lane.b32.xlu2 %v8420_v55, %s8569_s1 }
 0xb0d   : > { %v4874_v58 = vpop.permute.xlu2 %4873 }
 0xb0e   : > { %v4936_v13 = vmax.f32 %v8342_v0, %v4874_v58 }
 0xb0f   : > { %v6220_v53 = vpop.eup %6219 }
 0xb10   : > { %5354 = vmatmul.msk.f32.gmra.mxu3 %vm4950_vm14, %v4936_v13  ;;  %v5340_v46 = vadd.f32 -1.0, %v6220_v53 }
 0xb12   : > { %v8426_v11 = vsel %vm4698_vm10, %v4673_v36, %v5340_v46 }
 0xb13   : > { %4897 = vrot.lane.b32.xlu0 %v8426_v11, %s8569_s1 }
 0xb15   : > { %v4876_v45 = vpop.permute.xlu2 %4875 }
 0xb16   : > { %v4937_v15 = vmax.f32 %v8349_v1, %v4876_v45 }
 0xb18   : > { %5355 = vmatmul.msk.f32.gmra.mxu3 %vm4950_vm14, %v4937_v15 }
 0xb1d   : > { %v4878_v4 = vpop.permute.xlu2 %4877 }
 0xb1e   : > { %v4938_v51 = vmax.f32 %v8356_v48, %v4878_v4  ;;  %v4352_v48 = vpop.permute.xlu1 %4351 }
 0xb20   : > { %5356 = vmatmul.msk.f32.gmra.mxu3 %vm4950_vm14, %v4938_v51 }
 0xb25   : > { %v4880_v0 = vpop.permute.xlu2 %4879 }
 0xb26   : > { %v4939_v14 = vmax.f32 %v8363_v29, %v4880_v0 }
 0xb28   : > { %5357 = vmatmul.msk.f32.gmra.mxu3 %vm4950_vm14, %v4939_v14 }
 0xb2d   : > { %v4882_v50 = vpop.permute.xlu2 %4881 }
 0xb2e   : > { %v4940_v17 = vmax.f32 %v8370_v25, %v4882_v50  ;;  %v4474_v25 = vmul.f32 %v4352_v48, %v8161_v44 }
 0xb30   : > { %5358 = vmatmul.msk.f32.gmra.mxu3 %vm4950_vm14, %v4940_v17 }
 0xb35   : > { %v4884_v31 = vpop.permute.xlu2 %4883 }
 0xb36   : > { %v4941_v1 = vmax.f32 %v8377_v37, %v4884_v31 }
 0xb38   : > { %5359 = vmatmul.msk.f32.gmra.mxu3 %vm4950_vm14, %v4941_v1 }
 0xb3b   : > { %v5050_v29 = vpop.f32.mrf.mxu3 }
 0xb3c   : > { %5124 = vst.msk [vmem:[%s8444_s4 + $0x8] sm:$0xff] %vm5122_vm11, %v5050_v29 }
 0xb3d   : > { %v4527_v7 = vpop.permute.xlu2 %4526 }
 0xb3e   : > { %v4649_v37 = vadd.f32 %v4527_v7, %v4474_v25 }
 0xb40   : > { %v4699_v28 = vmin.f32 %v4649_v37, 0.0  ;;  %vm4674_vm12 = vcmp.gt.f32.partialorder %v4649_v37, 0.0 }
 0xb42   : > { %v4724_v22 = vmul.f32 1.442695, %v4699_v28 }
 0xb43   : > { %v5053_v10 = vpop.f32.mrf.mxu3 }
 0xb44   : > { %6221 = vpow2.f32 %v4724_v22  ;;  %5125 = vst.msk [vmem:[%s8444_s4 + $0x10] sm:$0xff] %vm5122_vm11, %v5053_v10 }
 0xb4a   : > { %v6222_v54 = vpop.eup %6221 }
 0xb4b   : > { %v5316_v43 = vadd.f32 -1.0, %v6222_v54  ;;  %v5056_v8 = vpop.f32.mrf.mxu3 }
 0xb4c   : > { %5126 = vst.msk [vmem:[%s8444_s4 + $0x18] sm:$0xff] %vm5122_vm11, %v5056_v8 }
 0xb4d   : > { %v4799_v26 = vsel %vm4674_vm12, %v4649_v37, %v5316_v43  ;;  %v4890_v23 = vpop.permute.xlu2 %4889 }
 0xb4e   : > { %4849 = vrot.lane.b32.xlu1 %v4799_v26, %s8569_s1  ;;  %v4944_v9 = vmax.f32 %v8401_v20, %v4890_v23 }
 0xb53   : > { %v5059_v44 = vpop.f32.mrf.mxu3 }
 0xb54   : > { %5127 = vst.msk [vmem:[%s8444_s4 + $0x20] sm:$0xff] %vm5122_vm11, %v5059_v44 }
 0xb55   : > { %v4886_v41 = vpop.permute.xlu0 %4885 }
 0xb56   : > { %v4942_v5 = vmax.f32 %v8387_v18, %v4886_v41 }
 0xb58   : > { %5360 = vmatmul.msk.f32.gmra.mxu3 %vm4950_vm14, %v4942_v5 }
 0xb5b   : > { %v5062_v61 = vpop.f32.mrf.mxu3 }
 0xb5c   : > { %5128 = vst.msk [vmem:[%s8444_s4 + $0x28] sm:$0xff] %vm5122_vm11, %v5062_v61 }
 0xb5d   : > { %v4888_v16 = vpop.permute.xlu1 %4887 }
 0xb5e   : > { %v4943_v6 = vmax.f32 %v8394_v38, %v4888_v16 }
 0xb60   : > { %5361 = vmatmul.msk.f32.gmra.mxu3 %vm4950_vm14, %v4943_v6 }
 0xb63   : > { %v5065_v33 = vpop.f32.mrf.mxu3 }
 0xb64   : > { %5129 = vst.msk [vmem:[%s8444_s4 + $0x30] sm:$0xff] %vm5122_vm11, %v5065_v33 }
 0xb65   : > { %v4896_v20 = vpop.permute.xlu2 %4895 }
 0xb68   : > { %5362 = vmatmul.msk.f32.gmra.mxu3 %vm4950_vm14, %v4944_v9 }
 0xb6b   : > { %v5068_v18 = vpop.f32.mrf.mxu3 }
 0xb6c   : > { %5130 = vst.msk [vmem:[%s8444_s4 + $0x38] sm:$0xff] %vm5122_vm11, %v5068_v18 }
 0xb6d   : > { %v4892_v49 = vpop.permute.xlu0 %4891 }
 0xb6e   : > { %v4945_v62 = vmax.f32 %v8408_v35, %v4892_v49  ;;  %v4947_v35 = vmax.f32 %v8420_v55, %v4896_v20 }
 0xb70   : > { %5363 = vmatmul.msk.f32.gmra.mxu3 %vm4950_vm14, %v4945_v62 }
 0xb73   : > { %v5071_v38 = vpop.f32.mrf.mxu3 }
 0xb74   : > { %5131 = vst.msk [vmem:[%s8444_s4 + $0x40] sm:$0xff] %vm5122_vm11, %v5071_v38 }
 0xb75   : > { %v4894_v59 = vpop.permute.xlu1 %4893 }
 0xb76   : > { %v4946_v63 = vmax.f32 %v8414_v42, %v4894_v59 }
 0xb78   : > { %5364 = vmatmul.msk.f32.gmra.mxu3 %vm4950_vm14, %v4946_v63 }
 0xb7b   : > { %v5074_v40 = vpop.f32.mrf.mxu3 }
 0xb7c   : > { %5132 = vst.msk [vmem:[%s8444_s4 + $0x48] sm:$0xff] %vm5122_vm11, %v5074_v40 }
 0xb80   : > { %5365 = vmatmul.msk.f32.gmra.mxu3 %vm4950_vm14, %v4947_v35 }
 0xb83   : > { %v5077_v27 = vpop.f32.mrf.mxu3 }
 0xb84   : > { %5133 = vst.msk [vmem:[%s8444_s4 + $0x50] sm:$0xff] %vm5122_vm11, %v5077_v27 }
 0xb85   : > { %v4898_v52 = vpop.permute.xlu0 %4897 }
 0xb86   : > { %v4948_v56 = vmax.f32 %v8426_v11, %v4898_v52 }
 0xb88   : > { %5366 = vmatmul.msk.f32.gmra.mxu3 %vm4950_vm14, %v4948_v56 }
 0xb8b   : > { %v5080_v39 = vpop.f32.mrf.mxu3 }
 0xb8c   : > { %5134 = vst.msk [vmem:[%s8444_s4 + $0x58] sm:$0xff] %vm5122_vm11, %v5080_v39 }
 0xb93   : > { %v5083_v60 = vpop.f32.mrf.mxu3 }
 0xb94   : > { %5135 = vst.msk [vmem:[%s8444_s4 + $0x60] sm:$0xff] %vm5122_vm11, %v5083_v60 }
 0xb9b   : > { %v5086_v57 = vpop.f32.mrf.mxu3 }
 0xb9c   : > { %5136 = vst.msk [vmem:[%s8444_s4 + $0x68] sm:$0xff] %vm5122_vm11, %v5086_v57 }
 0xba3   : > { %v5089_v21 = vpop.f32.mrf.mxu3 }
 0xba4   : > { %5137 = vst.msk [vmem:[%s8444_s4 + $0x70] sm:$0xff] %vm5122_vm11, %v5089_v21 }
 0xbab   : > { %v5092_v24 = vpop.f32.mrf.mxu3 }
 0xbac   : > { %5138 = vst.msk [vmem:[%s8444_s4 + $0x78] sm:$0xff] %vm5122_vm11, %v5092_v24 }
 0xbb3   : > { %v5095_v12 = vpop.f32.mrf.mxu3 }
 0xbb4   : > { %5139 = vst.msk [vmem:[%s8444_s4 + $0x80] sm:$0xff] %vm5122_vm11, %v5095_v12 }
 0xbbb   : > { %v5098_v2 = vpop.f32.mrf.mxu3 }
 0xbbc   : > { %5140 = vst.msk [vmem:[%s8444_s4 + $0x88] sm:$0xff] %vm5122_vm11, %v5098_v2 }
 0xbc0   : > { %v4850_v42 = vpop.permute.xlu1 %4849 }
 0xbc1   : > { %v4924_v36 = vmax.f32 %v4799_v26, %v4850_v42 }
 0xbc3   : > { %5342 = vmatmul.msk.f32.vlgmr.msra.gmra.mxu1 %vm4950_vm14, %v4924_v36 }
 0xbdb   : > { %v5101_v30 = vpop.f32.mrf.mxu3 }
 0xbdc   : > { %5141 = vst.msk [vmem:[%s8444_s4 + $0x90] sm:$0xff] %vm5122_vm11, %v5101_v30 }
 0xbe3   : > { %v5104_v3 = vpop.f32.mrf.mxu3 }
 0xbe4   : > { %5142 = vst.msk [vmem:[%s8444_s4 + $0x98] sm:$0xff] %vm5122_vm11, %v5104_v3 }
 0xbeb   : > { %v5107_v19 = vpop.f32.mrf.mxu3 }
 0xbec   : > { %5143 = vst.msk [vmem:[%s8444_s4 + $0xa0] sm:$0xff] %vm5122_vm11, %v5107_v19 }
 0xbf3   : > { %v5110_v32 = vpop.f32.mrf.mxu3 }
 0xbf4   : > { %5144 = vst.msk [vmem:[%s8444_s4 + $0xa8] sm:$0xff] %vm5122_vm11, %v5110_v32 }
 0xbfb   : > { %v5113_v34 = vpop.f32.mrf.mxu3 }
 0xbfc   : > { %5145 = vst.msk [vmem:[%s8444_s4 + $0xb0] sm:$0xff] %vm5122_vm11, %v5113_v34 }
 0xc03   : > { %v5116_v47 = vpop.f32.mrf.mxu3 }
 0xc04   : > { %5146 = vst.msk [vmem:[%s8444_s4 + $0xb8] sm:$0xff] %vm5122_vm11, %v5116_v47 }
 0xc0b   : > { %v5119_v55 = vpop.f32.mrf.mxu3 }
 0xc0c   : > { %5147 = vst.msk [vmem:[%s8444_s4 + $0xc0] sm:$0xff] %vm5122_vm11, %v5119_v55 }
 0xc40   : > { %v5047_v58 = vpop.f32.mrf.mxu1 }
 0xc41   : > { %5123 = vst.msk [vmem:[%s8444_s4] sm:$0xff] %vm5122_vm11, %v5047_v58 }
 0xc42 PF: > { %s29_s24 = sadd.s32 1, %s6297_s24  }
 0xc43   : > { %p26_p7 = scmp.ge.s32.totalorder %s29_s24, 4  }
 0xc45   :  { %28 = sbr.rel (!%p26_p7) target bundleno = 10 (0xa), region = 127 }
 0xc4a   :  { %5169 = vsyncpa [#allocation3], 1 }
 0xc4b   :  { %5171 = vsyncpa [#allocation3 + $0x1], 1 }
 0xc4c   :  { %5172 = vsyncpa [#allocation5], 1 }

</bundles_post_ra>
